<compile_context>
chip_gen: v6e
topology: v6e:2x2x1
jax: 0.10.0
libtpu: 0.0.40
codegen_flags: <defaults>
</compile_context>

<pallas_src>
import jax
import jax.numpy as jnp
from jax.experimental import pallas as pl
from jax.experimental.pallas import tpu as pltpu


def _fused_conv5x5_kernel(x_ref, w_ref, b_ref, o_ref):
    # x_ref: (N, C0, H,  W )  VMEM — full input batch
    # w_ref: (C2*C0*K*K,)     SMEM — effective 5x5 weights, flattened OIHW
    # b_ref: (C2,)            SMEM — effective bias
    # o_ref: (N, C2, H2, W2)  VMEM — final output
    n, c0, h, w = x_ref.shape
    _, c2, h2, w2 = o_ref.shape
    k = h - h2 + 1  # 5

    for nb in range(n):
        for co in range(c2):
            acc = jnp.full((h2, w2), b_ref[co], dtype=jnp.float32)
            for ci in range(c0):
                xplane = x_ref[nb, ci, :, :]              # (H, W), loaded once per (n,ci)
                for kw in range(k):
                    shifted = xplane[:, kw:kw + w2]       # lane shift hoisted out of kh
                    for kh in range(k):
                        w_s = w_ref[((co * c0 + ci) * k + kh) * k + kw]
                        acc = acc + shifted[kh:kh + h2, :] * w_s
            o_ref[nb, co, :, :] = acc.astype(o_ref.dtype)


def model_forward(x, w1, b1, w2, b2):
    """Model.forward: conv2(conv1(x)) — both VALID 3x3 stride-1 convs with bias.

    x: (N, 3, H, W); w1: (6, 3, 3, 3); b1: (6,); w2: (1, 6, 3, 3); b2: (1,)."""
    n, c0, h, w = x.shape
    c1, _, k1, _ = w1.shape
    c2, _, k2, _ = w2.shape
    kk = k1 + k2 - 1                      # 5
    h2, w2_ = h - kk + 1, w - kk + 1      # 12, 12

    # --- algebraic fusion of the two linear convs into one effective 5x5 conv ---
    # w_eff[o, i, p+a, q+b] += sum_c1 w2[o, c1, p, q] * w1[c1, i, a, b]
    w_eff = jnp.zeros((c2, c0, kk, kk), dtype=jnp.float32)
    for p in range(k2):
        for q in range(k2):
            contrib = jnp.einsum("oc,cihw->oihw", w2[:, :, p, q], w1)
            w_eff = w_eff.at[:, :, p:p + k1, q:q + k1].add(contrib)
    # b_eff[o] = b2[o] + sum_{c1,p,q} w2[o,c1,p,q] * b1[c1]
    b_eff = (b2 + jnp.einsum("ochw,c->o", w2, b1)).astype(jnp.float32)

    return pl.pallas_call(
        _fused_conv5x5_kernel,
        out_shape=jax.ShapeDtypeStruct((n, c2, h2, w2_), x.dtype),
        in_specs=[
            pl.BlockSpec(memory_space=pltpu.MemorySpace.VMEM),
            pl.BlockSpec(memory_space=pltpu.MemorySpace.SMEM),
            pl.BlockSpec(memory_space=pltpu.MemorySpace.SMEM),
        ],
        out_specs=pl.BlockSpec(memory_space=pltpu.MemorySpace.VMEM),
    )(x, w_eff.reshape(-1), b_eff)


def _reference(x, w1, b1, w2, b2):
    dn = ("NCHW", "OIHW", "NCHW")
    y = jax.lax.conv_general_dilated(x, w1, (1, 1), "VALID", dimension_numbers=dn)
    y = y + b1[None, :, None, None]
    z = jax.lax.conv_general_dilated(y, w2, (1, 1), "VALID", dimension_numbers=dn)
    return z + b2[None, :, None, None]


if __name__ == "__main__":
    key = jax.random.PRNGKey(0)
    kx, k1, k2, k3, k4 = jax.random.split(key, 5)

    # Input NCHW, consistent with nn.Conv2d(3, 6, kernel_size=3)
    x = jax.random.normal(kx, (2, 3, 16, 16), dtype=jnp.float32)

    # Deterministic parameter init (fan-in-scaled normals; shapes from __init__)
    w1 = jax.random.normal(k1, (6, 3, 3, 3), dtype=jnp.float32) * (1.0 / (3 * 3 * 3) ** 0.5)
    b1 = jax.random.normal(k2, (6,), dtype=jnp.float32) * 0.05
    w2 = jax.random.normal(k3, (1, 6, 3, 3), dtype=jnp.float32) * (1.0 / (6 * 3 * 3) ** 0.5)
    b2 = jax.random.normal(k4, (1,), dtype=jnp.float32) * 0.05

    out = model_forward(x, w1, b1, w2, b2)
    out = jax.block_until_ready(out)
    assert out.shape == (2, 1, 12, 12), out.shape

    ref = _reference(x, w1, b1, w2, b2)
    assert jnp.allclose(out, ref, atol=1e-4, rtol=1e-4), float(jnp.max(jnp.abs(out - ref)))
    print("KERNEL_OK")
</pallas_src>

<mosaic_0001>
module attributes {stable_mosaic.version = 11 : i64} {
  func.func @_fused_conv5x5_kernel(%arg0: memref<2x3x16x16xf32, #tpu.memory_space<vmem>>, %arg1: memref<75xf32, #tpu.memory_space<smem>>, %arg2: memref<1xf32, #tpu.memory_space<smem>>, %arg3: memref<2x1x12x12xf32, #tpu.memory_space<vmem>>) attributes {dimension_semantics = [], scalar_prefetch = 0 : i64, scratch_operands = 0 : i64, tpu.core_type = #tpu.core_type<tc>} {
    %c0 = arith.constant 0 : index
    %0 = memref.load %arg2[%c0] : memref<1xf32, #tpu.memory_space<smem>>
    %1 = vector.broadcast %0 : f32 to vector<12x12xf32>
    %c0_0 = arith.constant 0 : index
    %c0_1 = arith.constant 0 : index
    %c0_2 = arith.constant 0 : index
    %c0_3 = arith.constant 0 : index
    %2 = vector.load %arg0[%c0_0, %c0_1, %c0_2, %c0_3] : memref<2x3x16x16xf32, #tpu.memory_space<vmem>>, vector<1x1x16x16xf32>
    %3 = vector.shape_cast %2 : vector<1x1x16x16xf32> to vector<16x16xf32>
    %4 = vector.extract_strided_slice %3 {offsets = [0, 0], sizes = [16, 12], strides = [1, 1]} : vector<16x16xf32> to vector<16x12xf32>
    %c0_4 = arith.constant 0 : index
    %5 = memref.load %arg1[%c0_4] : memref<75xf32, #tpu.memory_space<smem>>
    %6 = vector.extract_strided_slice %4 {offsets = [0, 0], sizes = [12, 12], strides = [1, 1]} : vector<16x12xf32> to vector<12x12xf32>
    %7 = vector.broadcast %5 : f32 to vector<12x12xf32>
    %8 = arith.mulf %6, %7 : vector<12x12xf32>
    %9 = arith.addf %1, %8 : vector<12x12xf32>
    %c5 = arith.constant 5 : index
    %10 = memref.load %arg1[%c5] : memref<75xf32, #tpu.memory_space<smem>>
    %11 = vector.extract_strided_slice %4 {offsets = [1, 0], sizes = [12, 12], strides = [1, 1]} : vector<16x12xf32> to vector<12x12xf32>
    %12 = vector.broadcast %10 : f32 to vector<12x12xf32>
    %13 = arith.mulf %11, %12 : vector<12x12xf32>
    %14 = arith.addf %9, %13 : vector<12x12xf32>
    %c10 = arith.constant 10 : index
    %15 = memref.load %arg1[%c10] : memref<75xf32, #tpu.memory_space<smem>>
    %16 = vector.extract_strided_slice %4 {offsets = [2, 0], sizes = [12, 12], strides = [1, 1]} : vector<16x12xf32> to vector<12x12xf32>
    %17 = vector.broadcast %15 : f32 to vector<12x12xf32>
    %18 = arith.mulf %16, %17 : vector<12x12xf32>
    %19 = arith.addf %14, %18 : vector<12x12xf32>
    %c15 = arith.constant 15 : index
    %20 = memref.load %arg1[%c15] : memref<75xf32, #tpu.memory_space<smem>>
    %21 = vector.extract_strided_slice %4 {offsets = [3, 0], sizes = [12, 12], strides = [1, 1]} : vector<16x12xf32> to vector<12x12xf32>
    %22 = vector.broadcast %20 : f32 to vector<12x12xf32>
    %23 = arith.mulf %21, %22 : vector<12x12xf32>
    %24 = arith.addf %19, %23 : vector<12x12xf32>
    %c20 = arith.constant 20 : index
    %25 = memref.load %arg1[%c20] : memref<75xf32, #tpu.memory_space<smem>>
    %26 = vector.extract_strided_slice %4 {offsets = [4, 0], sizes = [12, 12], strides = [1, 1]} : vector<16x12xf32> to vector<12x12xf32>
    %27 = vector.broadcast %25 : f32 to vector<12x12xf32>
    %28 = arith.mulf %26, %27 : vector<12x12xf32>
    %29 = arith.addf %24, %28 : vector<12x12xf32>
    %30 = vector.extract_strided_slice %3 {offsets = [0, 1], sizes = [16, 12], strides = [1, 1]} : vector<16x16xf32> to vector<16x12xf32>
    %c1 = arith.constant 1 : index
    %31 = memref.load %arg1[%c1] : memref<75xf32, #tpu.memory_space<smem>>
    %32 = vector.extract_strided_slice %30 {offsets = [0, 0], sizes = [12, 12], strides = [1, 1]} : vector<16x12xf32> to vector<12x12xf32>
    %33 = vector.broadcast %31 : f32 to vector<12x12xf32>
    %34 = arith.mulf %32, %33 : vector<12x12xf32>
    %35 = arith.addf %29, %34 : vector<12x12xf32>
    %c6 = arith.constant 6 : index
    %36 = memref.load %arg1[%c6] : memref<75xf32, #tpu.memory_space<smem>>
    %37 = vector.extract_strided_slice %30 {offsets = [1, 0], sizes = [12, 12], strides = [1, 1]} : vector<16x12xf32> to vector<12x12xf32>
    %38 = vector.broadcast %36 : f32 to vector<12x12xf32>
    %39 = arith.mulf %37, %38 : vector<12x12xf32>
    %40 = arith.addf %35, %39 : vector<12x12xf32>
    %c11 = arith.constant 11 : index
    %41 = memref.load %arg1[%c11] : memref<75xf32, #tpu.memory_space<smem>>
    %42 = vector.extract_strided_slice %30 {offsets = [2, 0], sizes = [12, 12], strides = [1, 1]} : vector<16x12xf32> to vector<12x12xf32>
    %43 = vector.broadcast %41 : f32 to vector<12x12xf32>
    %44 = arith.mulf %42, %43 : vector<12x12xf32>
    %45 = arith.addf %40, %44 : vector<12x12xf32>
    %c16 = arith.constant 16 : index
    %46 = memref.load %arg1[%c16] : memref<75xf32, #tpu.memory_space<smem>>
    %47 = vector.extract_strided_slice %30 {offsets = [3, 0], sizes = [12, 12], strides = [1, 1]} : vector<16x12xf32> to vector<12x12xf32>
    %48 = vector.broadcast %46 : f32 to vector<12x12xf32>
    %49 = arith.mulf %47, %48 : vector<12x12xf32>
    %50 = arith.addf %45, %49 : vector<12x12xf32>
    %c21 = arith.constant 21 : index
    %51 = memref.load %arg1[%c21] : memref<75xf32, #tpu.memory_space<smem>>
    %52 = vector.extract_strided_slice %30 {offsets = [4, 0], sizes = [12, 12], strides = [1, 1]} : vector<16x12xf32> to vector<12x12xf32>
    %53 = vector.broadcast %51 : f32 to vector<12x12xf32>
    %54 = arith.mulf %52, %53 : vector<12x12xf32>
    %55 = arith.addf %50, %54 : vector<12x12xf32>
    %56 = vector.extract_strided_slice %3 {offsets = [0, 2], sizes = [16, 12], strides = [1, 1]} : vector<16x16xf32> to vector<16x12xf32>
    %c2 = arith.constant 2 : index
    %57 = memref.load %arg1[%c2] : memref<75xf32, #tpu.memory_space<smem>>
    %58 = vector.extract_strided_slice %56 {offsets = [0, 0], sizes = [12, 12], strides = [1, 1]} : vector<16x12xf32> to vector<12x12xf32>
    %59 = vector.broadcast %57 : f32 to vector<12x12xf32>
    %60 = arith.mulf %58, %59 : vector<12x12xf32>
    %61 = arith.addf %55, %60 : vector<12x12xf32>
    %c7 = arith.constant 7 : index
    %62 = memref.load %arg1[%c7] : memref<75xf32, #tpu.memory_space<smem>>
    %63 = vector.extract_strided_slice %56 {offsets = [1, 0], sizes = [12, 12], strides = [1, 1]} : vector<16x12xf32> to vector<12x12xf32>
    %64 = vector.broadcast %62 : f32 to vector<12x12xf32>
    %65 = arith.mulf %63, %64 : vector<12x12xf32>
    %66 = arith.addf %61, %65 : vector<12x12xf32>
    %c12 = arith.constant 12 : index
    %67 = memref.load %arg1[%c12] : memref<75xf32, #tpu.memory_space<smem>>
    %68 = vector.extract_strided_slice %56 {offsets = [2, 0], sizes = [12, 12], strides = [1, 1]} : vector<16x12xf32> to vector<12x12xf32>
    %69 = vector.broadcast %67 : f32 to vector<12x12xf32>
    %70 = arith.mulf %68, %69 : vector<12x12xf32>
    %71 = arith.addf %66, %70 : vector<12x12xf32>
    %c17 = arith.constant 17 : index
    %72 = memref.load %arg1[%c17] : memref<75xf32, #tpu.memory_space<smem>>
    %73 = vector.extract_strided_slice %56 {offsets = [3, 0], sizes = [12, 12], strides = [1, 1]} : vector<16x12xf32> to vector<12x12xf32>
    %74 = vector.broadcast %72 : f32 to vector<12x12xf32>
    %75 = arith.mulf %73, %74 : vector<12x12xf32>
    %76 = arith.addf %71, %75 : vector<12x12xf32>
    %c22 = arith.constant 22 : index
    %77 = memref.load %arg1[%c22] : memref<75xf32, #tpu.memory_space<smem>>
    %78 = vector.extract_strided_slice %56 {offsets = [4, 0], sizes = [12, 12], strides = [1, 1]} : vector<16x12xf32> to vector<12x12xf32>
    %79 = vector.broadcast %77 : f32 to vector<12x12xf32>
    %80 = arith.mulf %78, %79 : vector<12x12xf32>
    %81 = arith.addf %76, %80 : vector<12x12xf32>
    %82 = vector.extract_strided_slice %3 {offsets = [0, 3], sizes = [16, 12], strides = [1, 1]} : vector<16x16xf32> to vector<16x12xf32>
    %c3 = arith.constant 3 : index
    %83 = memref.load %arg1[%c3] : memref<75xf32, #tpu.memory_space<smem>>
    %84 = vector.extract_strided_slice %82 {offsets = [0, 0], sizes = [12, 12], strides = [1, 1]} : vector<16x12xf32> to vector<12x12xf32>
    %85 = vector.broadcast %83 : f32 to vector<12x12xf32>
    %86 = arith.mulf %84, %85 : vector<12x12xf32>
    %87 = arith.addf %81, %86 : vector<12x12xf32>
    %c8 = arith.constant 8 : index
    %88 = memref.load %arg1[%c8] : memref<75xf32, #tpu.memory_space<smem>>
    %89 = vector.extract_strided_slice %82 {offsets = [1, 0], sizes = [12, 12], strides = [1, 1]} : vector<16x12xf32> to vector<12x12xf32>
    %90 = vector.broadcast %88 : f32 to vector<12x12xf32>
    %91 = arith.mulf %89, %90 : vector<12x12xf32>
    %92 = arith.addf %87, %91 : vector<12x12xf32>
    %c13 = arith.constant 13 : index
    %93 = memref.load %arg1[%c13] : memref<75xf32, #tpu.memory_space<smem>>
    %94 = vector.extract_strided_slice %82 {offsets = [2, 0], sizes = [12, 12], strides = [1, 1]} : vector<16x12xf32> to vector<12x12xf32>
    %95 = vector.broadcast %93 : f32 to vector<12x12xf32>
    %96 = arith.mulf %94, %95 : vector<12x12xf32>
    %97 = arith.addf %92, %96 : vector<12x12xf32>
    %c18 = arith.constant 18 : index
    %98 = memref.load %arg1[%c18] : memref<75xf32, #tpu.memory_space<smem>>
    %99 = vector.extract_strided_slice %82 {offsets = [3, 0], sizes = [12, 12], strides = [1, 1]} : vector<16x12xf32> to vector<12x12xf32>
    %100 = vector.broadcast %98 : f32 to vector<12x12xf32>
    %101 = arith.mulf %99, %100 : vector<12x12xf32>
    %102 = arith.addf %97, %101 : vector<12x12xf32>
    %c23 = arith.constant 23 : index
    %103 = memref.load %arg1[%c23] : memref<75xf32, #tpu.memory_space<smem>>
    %104 = vector.extract_strided_slice %82 {offsets = [4, 0], sizes = [12, 12], strides = [1, 1]} : vector<16x12xf32> to vector<12x12xf32>
    %105 = vector.broadcast %103 : f32 to vector<12x12xf32>
    %106 = arith.mulf %104, %105 : vector<12x12xf32>
    %107 = arith.addf %102, %106 : vector<12x12xf32>
    %108 = vector.extract_strided_slice %3 {offsets = [0, 4], sizes = [16, 12], strides = [1, 1]} : vector<16x16xf32> to vector<16x12xf32>
    %c4 = arith.constant 4 : index
    %109 = memref.load %arg1[%c4] : memref<75xf32, #tpu.memory_space<smem>>
    %110 = vector.extract_strided_slice %108 {offsets = [0, 0], sizes = [12, 12], strides = [1, 1]} : vector<16x12xf32> to vector<12x12xf32>
    %111 = vector.broadcast %109 : f32 to vector<12x12xf32>
    %112 = arith.mulf %110, %111 : vector<12x12xf32>
    %113 = arith.addf %107, %112 : vector<12x12xf32>
    %c9 = arith.constant 9 : index
    %114 = memref.load %arg1[%c9] : memref<75xf32, #tpu.memory_space<smem>>
    %115 = vector.extract_strided_slice %108 {offsets = [1, 0], sizes = [12, 12], strides = [1, 1]} : vector<16x12xf32> to vector<12x12xf32>
    %116 = vector.broadcast %114 : f32 to vector<12x12xf32>
    %117 = arith.mulf %115, %116 : vector<12x12xf32>
    %118 = arith.addf %113, %117 : vector<12x12xf32>
    %c14 = arith.constant 14 : index
    %119 = memref.load %arg1[%c14] : memref<75xf32, #tpu.memory_space<smem>>
    %120 = vector.extract_strided_slice %108 {offsets = [2, 0], sizes = [12, 12], strides = [1, 1]} : vector<16x12xf32> to vector<12x12xf32>
    %121 = vector.broadcast %119 : f32 to vector<12x12xf32>
    %122 = arith.mulf %120, %121 : vector<12x12xf32>
    %123 = arith.addf %118, %122 : vector<12x12xf32>
    %c19 = arith.constant 19 : index
    %124 = memref.load %arg1[%c19] : memref<75xf32, #tpu.memory_space<smem>>
    %125 = vector.extract_strided_slice %108 {offsets = [3, 0], sizes = [12, 12], strides = [1, 1]} : vector<16x12xf32> to vector<12x12xf32>
    %126 = vector.broadcast %124 : f32 to vector<12x12xf32>
    %127 = arith.mulf %125, %126 : vector<12x12xf32>
    %128 = arith.addf %123, %127 : vector<12x12xf32>
    %c24 = arith.constant 24 : index
    %129 = memref.load %arg1[%c24] : memref<75xf32, #tpu.memory_space<smem>>
    %130 = vector.extract_strided_slice %108 {offsets = [4, 0], sizes = [12, 12], strides = [1, 1]} : vector<16x12xf32> to vector<12x12xf32>
    %131 = vector.broadcast %129 : f32 to vector<12x12xf32>
    %132 = arith.mulf %130, %131 : vector<12x12xf32>
    %133 = arith.addf %128, %132 : vector<12x12xf32>
    %c0_5 = arith.constant 0 : index
    %c1_6 = arith.constant 1 : index
    %c0_7 = arith.constant 0 : index
    %c0_8 = arith.constant 0 : index
    %134 = vector.load %arg0[%c0_5, %c1_6, %c0_7, %c0_8] : memref<2x3x16x16xf32, #tpu.memory_space<vmem>>, vector<1x1x16x16xf32>
    %135 = vector.shape_cast %134 : vector<1x1x16x16xf32> to vector<16x16xf32>
    %136 = vector.extract_strided_slice %135 {offsets = [0, 0], sizes = [16, 12], strides = [1, 1]} : vector<16x16xf32> to vector<16x12xf32>
    %c25 = arith.constant 25 : index
    %137 = memref.load %arg1[%c25] : memref<75xf32, #tpu.memory_space<smem>>
    %138 = vector.extract_strided_slice %136 {offsets = [0, 0], sizes = [12, 12], strides = [1, 1]} : vector<16x12xf32> to vector<12x12xf32>
    %139 = vector.broadcast %137 : f32 to vector<12x12xf32>
    %140 = arith.mulf %138, %139 : vector<12x12xf32>
    %141 = arith.addf %133, %140 : vector<12x12xf32>
    %c30 = arith.constant 30 : index
    %142 = memref.load %arg1[%c30] : memref<75xf32, #tpu.memory_space<smem>>
    %143 = vector.extract_strided_slice %136 {offsets = [1, 0], sizes = [12, 12], strides = [1, 1]} : vector<16x12xf32> to vector<12x12xf32>
    %144 = vector.broadcast %142 : f32 to vector<12x12xf32>
    %145 = arith.mulf %143, %144 : vector<12x12xf32>
    %146 = arith.addf %141, %145 : vector<12x12xf32>
    %c35 = arith.constant 35 : index
    %147 = memref.load %arg1[%c35] : memref<75xf32, #tpu.memory_space<smem>>
    %148 = vector.extract_strided_slice %136 {offsets = [2, 0], sizes = [12, 12], strides = [1, 1]} : vector<16x12xf32> to vector<12x12xf32>
    %149 = vector.broadcast %147 : f32 to vector<12x12xf32>
    %150 = arith.mulf %148, %149 : vector<12x12xf32>
    %151 = arith.addf %146, %150 : vector<12x12xf32>
    %c40 = arith.constant 40 : index
    %152 = memref.load %arg1[%c40] : memref<75xf32, #tpu.memory_space<smem>>
    %153 = vector.extract_strided_slice %136 {offsets = [3, 0], sizes = [12, 12], strides = [1, 1]} : vector<16x12xf32> to vector<12x12xf32>
    %154 = vector.broadcast %152 : f32 to vector<12x12xf32>
    %155 = arith.mulf %153, %154 : vector<12x12xf32>
    %156 = arith.addf %151, %155 : vector<12x12xf32>
    %c45 = arith.constant 45 : index
    %157 = memref.load %arg1[%c45] : memref<75xf32, #tpu.memory_space<smem>>
    %158 = vector.extract_strided_slice %136 {offsets = [4, 0], sizes = [12, 12], strides = [1, 1]} : vector<16x12xf32> to vector<12x12xf32>
    %159 = vector.broadcast %157 : f32 to vector<12x12xf32>
    %160 = arith.mulf %158, %159 : vector<12x12xf32>
    %161 = arith.addf %156, %160 : vector<12x12xf32>
    %162 = vector.extract_strided_slice %135 {offsets = [0, 1], sizes = [16, 12], strides = [1, 1]} : vector<16x16xf32> to vector<16x12xf32>
    %c26 = arith.constant 26 : index
    %163 = memref.load %arg1[%c26] : memref<75xf32, #tpu.memory_space<smem>>
    %164 = vector.extract_strided_slice %162 {offsets = [0, 0], sizes = [12, 12], strides = [1, 1]} : vector<16x12xf32> to vector<12x12xf32>
    %165 = vector.broadcast %163 : f32 to vector<12x12xf32>
    %166 = arith.mulf %164, %165 : vector<12x12xf32>
    %167 = arith.addf %161, %166 : vector<12x12xf32>
    %c31 = arith.constant 31 : index
    %168 = memref.load %arg1[%c31] : memref<75xf32, #tpu.memory_space<smem>>
    %169 = vector.extract_strided_slice %162 {offsets = [1, 0], sizes = [12, 12], strides = [1, 1]} : vector<16x12xf32> to vector<12x12xf32>
    %170 = vector.broadcast %168 : f32 to vector<12x12xf32>
    %171 = arith.mulf %169, %170 : vector<12x12xf32>
    %172 = arith.addf %167, %171 : vector<12x12xf32>
    %c36 = arith.constant 36 : index
    %173 = memref.load %arg1[%c36] : memref<75xf32, #tpu.memory_space<smem>>
    %174 = vector.extract_strided_slice %162 {offsets = [2, 0], sizes = [12, 12], strides = [1, 1]} : vector<16x12xf32> to vector<12x12xf32>
    %175 = vector.broadcast %173 : f32 to vector<12x12xf32>
    %176 = arith.mulf %174, %175 : vector<12x12xf32>
    %177 = arith.addf %172, %176 : vector<12x12xf32>
    %c41 = arith.constant 41 : index
    %178 = memref.load %arg1[%c41] : memref<75xf32, #tpu.memory_space<smem>>
    %179 = vector.extract_strided_slice %162 {offsets = [3, 0], sizes = [12, 12], strides = [1, 1]} : vector<16x12xf32> to vector<12x12xf32>
    %180 = vector.broadcast %178 : f32 to vector<12x12xf32>
    %181 = arith.mulf %179, %180 : vector<12x12xf32>
    %182 = arith.addf %177, %181 : vector<12x12xf32>
    %c46 = arith.constant 46 : index
    %183 = memref.load %arg1[%c46] : memref<75xf32, #tpu.memory_space<smem>>
    %184 = vector.extract_strided_slice %162 {offsets = [4, 0], sizes = [12, 12], strides = [1, 1]} : vector<16x12xf32> to vector<12x12xf32>
    %185 = vector.broadcast %183 : f32 to vector<12x12xf32>
    %186 = arith.mulf %184, %185 : vector<12x12xf32>
    %187 = arith.addf %182, %186 : vector<12x12xf32>
    %188 = vector.extract_strided_slice %135 {offsets = [0, 2], sizes = [16, 12], strides = [1, 1]} : vector<16x16xf32> to vector<16x12xf32>
    %c27 = arith.constant 27 : index
    %189 = memref.load %arg1[%c27] : memref<75xf32, #tpu.memory_space<smem>>
    %190 = vector.extract_strided_slice %188 {offsets = [0, 0], sizes = [12, 12], strides = [1, 1]} : vector<16x12xf32> to vector<12x12xf32>
    %191 = vector.broadcast %189 : f32 to vector<12x12xf32>
    %192 = arith.mulf %190, %191 : vector<12x12xf32>
    %193 = arith.addf %187, %192 : vector<12x12xf32>
    %c32 = arith.constant 32 : index
    %194 = memref.load %arg1[%c32] : memref<75xf32, #tpu.memory_space<smem>>
    %195 = vector.extract_strided_slice %188 {offsets = [1, 0], sizes = [12, 12], strides = [1, 1]} : vector<16x12xf32> to vector<12x12xf32>
    %196 = vector.broadcast %194 : f32 to vector<12x12xf32>
    %197 = arith.mulf %195, %196 : vector<12x12xf32>
    %198 = arith.addf %193, %197 : vector<12x12xf32>
    %c37 = arith.constant 37 : index
    %199 = memref.load %arg1[%c37] : memref<75xf32, #tpu.memory_space<smem>>
    %200 = vector.extract_strided_slice %188 {offsets = [2, 0], sizes = [12, 12], strides = [1, 1]} : vector<16x12xf32> to vector<12x12xf32>
    %201 = vector.broadcast %199 : f32 to vector<12x12xf32>
    %202 = arith.mulf %200, %201 : vector<12x12xf32>
    %203 = arith.addf %198, %202 : vector<12x12xf32>
    %c42 = arith.constant 42 : index
    %204 = memref.load %arg1[%c42] : memref<75xf32, #tpu.memory_space<smem>>
    %205 = vector.extract_strided_slice %188 {offsets = [3, 0], sizes = [12, 12], strides = [1, 1]} : vector<16x12xf32> to vector<12x12xf32>
    %206 = vector.broadcast %204 : f32 to vector<12x12xf32>
    %207 = arith.mulf %205, %206 : vector<12x12xf32>
    %208 = arith.addf %203, %207 : vector<12x12xf32>
    %c47 = arith.constant 47 : index
    %209 = memref.load %arg1[%c47] : memref<75xf32, #tpu.memory_space<smem>>
    %210 = vector.extract_strided_slice %188 {offsets = [4, 0], sizes = [12, 12], strides = [1, 1]} : vector<16x12xf32> to vector<12x12xf32>
    %211 = vector.broadcast %209 : f32 to vector<12x12xf32>
    %212 = arith.mulf %210, %211 : vector<12x12xf32>
    %213 = arith.addf %208, %212 : vector<12x12xf32>
    %214 = vector.extract_strided_slice %135 {offsets = [0, 3], sizes = [16, 12], strides = [1, 1]} : vector<16x16xf32> to vector<16x12xf32>
    %c28 = arith.constant 28 : index
    %215 = memref.load %arg1[%c28] : memref<75xf32, #tpu.memory_space<smem>>
    %216 = vector.extract_strided_slice %214 {offsets = [0, 0], sizes = [12, 12], strides = [1, 1]} : vector<16x12xf32> to vector<12x12xf32>
    %217 = vector.broadcast %215 : f32 to vector<12x12xf32>
    %218 = arith.mulf %216, %217 : vector<12x12xf32>
    %219 = arith.addf %213, %218 : vector<12x12xf32>
    %c33 = arith.constant 33 : index
    %220 = memref.load %arg1[%c33] : memref<75xf32, #tpu.memory_space<smem>>
    %221 = vector.extract_strided_slice %214 {offsets = [1, 0], sizes = [12, 12], strides = [1, 1]} : vector<16x12xf32> to vector<12x12xf32>
    %222 = vector.broadcast %220 : f32 to vector<12x12xf32>
    %223 = arith.mulf %221, %222 : vector<12x12xf32>
    %224 = arith.addf %219, %223 : vector<12x12xf32>
    %c38 = arith.constant 38 : index
    %225 = memref.load %arg1[%c38] : memref<75xf32, #tpu.memory_space<smem>>
    %226 = vector.extract_strided_slice %214 {offsets = [2, 0], sizes = [12, 12], strides = [1, 1]} : vector<16x12xf32> to vector<12x12xf32>
    %227 = vector.broadcast %225 : f32 to vector<12x12xf32>
    %228 = arith.mulf %226, %227 : vector<12x12xf32>
    %229 = arith.addf %224, %228 : vector<12x12xf32>
    %c43 = arith.constant 43 : index
    %230 = memref.load %arg1[%c43] : memref<75xf32, #tpu.memory_space<smem>>
    %231 = vector.extract_strided_slice %214 {offsets = [3, 0], sizes = [12, 12], strides = [1, 1]} : vector<16x12xf32> to vector<12x12xf32>
    %232 = vector.broadcast %230 : f32 to vector<12x12xf32>
    %233 = arith.mulf %231, %232 : vector<12x12xf32>
    %234 = arith.addf %229, %233 : vector<12x12xf32>
    %c48 = arith.constant 48 : index
    %235 = memref.load %arg1[%c48] : memref<75xf32, #tpu.memory_space<smem>>
    %236 = vector.extract_strided_slice %214 {offsets = [4, 0], sizes = [12, 12], strides = [1, 1]} : vector<16x12xf32> to vector<12x12xf32>
    %237 = vector.broadcast %235 : f32 to vector<12x12xf32>
    %238 = arith.mulf %236, %237 : vector<12x12xf32>
    %239 = arith.addf %234, %238 : vector<12x12xf32>
    %240 = vector.extract_strided_slice %135 {offsets = [0, 4], sizes = [16, 12], strides = [1, 1]} : vector<16x16xf32> to vector<16x12xf32>
    %c29 = arith.constant 29 : index
    %241 = memref.load %arg1[%c29] : memref<75xf32, #tpu.memory_space<smem>>
    %242 = vector.extract_strided_slice %240 {offsets = [0, 0], sizes = [12, 12], strides = [1, 1]} : vector<16x12xf32> to vector<12x12xf32>
    %243 = vector.broadcast %241 : f32 to vector<12x12xf32>
    %244 = arith.mulf %242, %243 : vector<12x12xf32>
    %245 = arith.addf %239, %244 : vector<12x12xf32>
    %c34 = arith.constant 34 : index
    %246 = memref.load %arg1[%c34] : memref<75xf32, #tpu.memory_space<smem>>
    %247 = vector.extract_strided_slice %240 {offsets = [1, 0], sizes = [12, 12], strides = [1, 1]} : vector<16x12xf32> to vector<12x12xf32>
    %248 = vector.broadcast %246 : f32 to vector<12x12xf32>
    %249 = arith.mulf %247, %248 : vector<12x12xf32>
    %250 = arith.addf %245, %249 : vector<12x12xf32>
    %c39 = arith.constant 39 : index
    %251 = memref.load %arg1[%c39] : memref<75xf32, #tpu.memory_space<smem>>
    %252 = vector.extract_strided_slice %240 {offsets = [2, 0], sizes = [12, 12], strides = [1, 1]} : vector<16x12xf32> to vector<12x12xf32>
    %253 = vector.broadcast %251 : f32 to vector<12x12xf32>
    %254 = arith.mulf %252, %253 : vector<12x12xf32>
    %255 = arith.addf %250, %254 : vector<12x12xf32>
    %c44 = arith.constant 44 : index
    %256 = memref.load %arg1[%c44] : memref<75xf32, #tpu.memory_space<smem>>
    %257 = vector.extract_strided_slice %240 {offsets = [3, 0], sizes = [12, 12], strides = [1, 1]} : vector<16x12xf32> to vector<12x12xf32>
    %258 = vector.broadcast %256 : f32 to vector<12x12xf32>
    %259 = arith.mulf %257, %258 : vector<12x12xf32>
    %260 = arith.addf %255, %259 : vector<12x12xf32>
    %c49 = arith.constant 49 : index
    %261 = memref.load %arg1[%c49] : memref<75xf32, #tpu.memory_space<smem>>
    %262 = vector.extract_strided_slice %240 {offsets = [4, 0], sizes = [12, 12], strides = [1, 1]} : vector<16x12xf32> to vector<12x12xf32>
    %263 = vector.broadcast %261 : f32 to vector<12x12xf32>
    %264 = arith.mulf %262, %263 : vector<12x12xf32>
    %265 = arith.addf %260, %264 : vector<12x12xf32>
    %c0_9 = arith.constant 0 : index
    %c2_10 = arith.constant 2 : index
    %c0_11 = arith.constant 0 : index
    %c0_12 = arith.constant 0 : index
    %266 = vector.load %arg0[%c0_9, %c2_10, %c0_11, %c0_12] : memref<2x3x16x16xf32, #tpu.memory_space<vmem>>, vector<1x1x16x16xf32>
    %267 = vector.shape_cast %266 : vector<1x1x16x16xf32> to vector<16x16xf32>
    %268 = vector.extract_strided_slice %267 {offsets = [0, 0], sizes = [16, 12], strides = [1, 1]} : vector<16x16xf32> to vector<16x12xf32>
    %c50 = arith.constant 50 : index
    %269 = memref.load %arg1[%c50] : memref<75xf32, #tpu.memory_space<smem>>
    %270 = vector.extract_strided_slice %268 {offsets = [0, 0], sizes = [12, 12], strides = [1, 1]} : vector<16x12xf32> to vector<12x12xf32>
    %271 = vector.broadcast %269 : f32 to vector<12x12xf32>
    %272 = arith.mulf %270, %271 : vector<12x12xf32>
    %273 = arith.addf %265, %272 : vector<12x12xf32>
    %c55 = arith.constant 55 : index
    %274 = memref.load %arg1[%c55] : memref<75xf32, #tpu.memory_space<smem>>
    %275 = vector.extract_strided_slice %268 {offsets = [1, 0], sizes = [12, 12], strides = [1, 1]} : vector<16x12xf32> to vector<12x12xf32>
    %276 = vector.broadcast %274 : f32 to vector<12x12xf32>
    %277 = arith.mulf %275, %276 : vector<12x12xf32>
    %278 = arith.addf %273, %277 : vector<12x12xf32>
    %c60 = arith.constant 60 : index
    %279 = memref.load %arg1[%c60] : memref<75xf32, #tpu.memory_space<smem>>
    %280 = vector.extract_strided_slice %268 {offsets = [2, 0], sizes = [12, 12], strides = [1, 1]} : vector<16x12xf32> to vector<12x12xf32>
    %281 = vector.broadcast %279 : f32 to vector<12x12xf32>
    %282 = arith.mulf %280, %281 : vector<12x12xf32>
    %283 = arith.addf %278, %282 : vector<12x12xf32>
    %c65 = arith.constant 65 : index
    %284 = memref.load %arg1[%c65] : memref<75xf32, #tpu.memory_space<smem>>
    %285 = vector.extract_strided_slice %268 {offsets = [3, 0], sizes = [12, 12], strides = [1, 1]} : vector<16x12xf32> to vector<12x12xf32>
    %286 = vector.broadcast %284 : f32 to vector<12x12xf32>
    %287 = arith.mulf %285, %286 : vector<12x12xf32>
    %288 = arith.addf %283, %287 : vector<12x12xf32>
    %c70 = arith.constant 70 : index
    %289 = memref.load %arg1[%c70] : memref<75xf32, #tpu.memory_space<smem>>
    %290 = vector.extract_strided_slice %268 {offsets = [4, 0], sizes = [12, 12], strides = [1, 1]} : vector<16x12xf32> to vector<12x12xf32>
    %291 = vector.broadcast %289 : f32 to vector<12x12xf32>
    %292 = arith.mulf %290, %291 : vector<12x12xf32>
    %293 = arith.addf %288, %292 : vector<12x12xf32>
    %294 = vector.extract_strided_slice %267 {offsets = [0, 1], sizes = [16, 12], strides = [1, 1]} : vector<16x16xf32> to vector<16x12xf32>
    %c51 = arith.constant 51 : index
    %295 = memref.load %arg1[%c51] : memref<75xf32, #tpu.memory_space<smem>>
    %296 = vector.extract_strided_slice %294 {offsets = [0, 0], sizes = [12, 12], strides = [1, 1]} : vector<16x12xf32> to vector<12x12xf32>
    %297 = vector.broadcast %295 : f32 to vector<12x12xf32>
    %298 = arith.mulf %296, %297 : vector<12x12xf32>
    %299 = arith.addf %293, %298 : vector<12x12xf32>
    %c56 = arith.constant 56 : index
    %300 = memref.load %arg1[%c56] : memref<75xf32, #tpu.memory_space<smem>>
    %301 = vector.extract_strided_slice %294 {offsets = [1, 0], sizes = [12, 12], strides = [1, 1]} : vector<16x12xf32> to vector<12x12xf32>
    %302 = vector.broadcast %300 : f32 to vector<12x12xf32>
    %303 = arith.mulf %301, %302 : vector<12x12xf32>
    %304 = arith.addf %299, %303 : vector<12x12xf32>
    %c61 = arith.constant 61 : index
    %305 = memref.load %arg1[%c61] : memref<75xf32, #tpu.memory_space<smem>>
    %306 = vector.extract_strided_slice %294 {offsets = [2, 0], sizes = [12, 12], strides = [1, 1]} : vector<16x12xf32> to vector<12x12xf32>
    %307 = vector.broadcast %305 : f32 to vector<12x12xf32>
    %308 = arith.mulf %306, %307 : vector<12x12xf32>
    %309 = arith.addf %304, %308 : vector<12x12xf32>
    %c66 = arith.constant 66 : index
    %310 = memref.load %arg1[%c66] : memref<75xf32, #tpu.memory_space<smem>>
    %311 = vector.extract_strided_slice %294 {offsets = [3, 0], sizes = [12, 12], strides = [1, 1]} : vector<16x12xf32> to vector<12x12xf32>
    %312 = vector.broadcast %310 : f32 to vector<12x12xf32>
    %313 = arith.mulf %311, %312 : vector<12x12xf32>
    %314 = arith.addf %309, %313 : vector<12x12xf32>
    %c71 = arith.constant 71 : index
    %315 = memref.load %arg1[%c71] : memref<75xf32, #tpu.memory_space<smem>>
    %316 = vector.extract_strided_slice %294 {offsets = [4, 0], sizes = [12, 12], strides = [1, 1]} : vector<16x12xf32> to vector<12x12xf32>
    %317 = vector.broadcast %315 : f32 to vector<12x12xf32>
    %318 = arith.mulf %316, %317 : vector<12x12xf32>
    %319 = arith.addf %314, %318 : vector<12x12xf32>
    %320 = vector.extract_strided_slice %267 {offsets = [0, 2], sizes = [16, 12], strides = [1, 1]} : vector<16x16xf32> to vector<16x12xf32>
    %c52 = arith.constant 52 : index
    %321 = memref.load %arg1[%c52] : memref<75xf32, #tpu.memory_space<smem>>
    %322 = vector.extract_strided_slice %320 {offsets = [0, 0], sizes = [12, 12], strides = [1, 1]} : vector<16x12xf32> to vector<12x12xf32>
    %323 = vector.broadcast %321 : f32 to vector<12x12xf32>
    %324 = arith.mulf %322, %323 : vector<12x12xf32>
    %325 = arith.addf %319, %324 : vector<12x12xf32>
    %c57 = arith.constant 57 : index
    %326 = memref.load %arg1[%c57] : memref<75xf32, #tpu.memory_space<smem>>
    %327 = vector.extract_strided_slice %320 {offsets = [1, 0], sizes = [12, 12], strides = [1, 1]} : vector<16x12xf32> to vector<12x12xf32>
    %328 = vector.broadcast %326 : f32 to vector<12x12xf32>
    %329 = arith.mulf %327, %328 : vector<12x12xf32>
    %330 = arith.addf %325, %329 : vector<12x12xf32>
    %c62 = arith.constant 62 : index
    %331 = memref.load %arg1[%c62] : memref<75xf32, #tpu.memory_space<smem>>
    %332 = vector.extract_strided_slice %320 {offsets = [2, 0], sizes = [12, 12], strides = [1, 1]} : vector<16x12xf32> to vector<12x12xf32>
    %333 = vector.broadcast %331 : f32 to vector<12x12xf32>
    %334 = arith.mulf %332, %333 : vector<12x12xf32>
    %335 = arith.addf %330, %334 : vector<12x12xf32>
    %c67 = arith.constant 67 : index
    %336 = memref.load %arg1[%c67] : memref<75xf32, #tpu.memory_space<smem>>
    %337 = vector.extract_strided_slice %320 {offsets = [3, 0], sizes = [12, 12], strides = [1, 1]} : vector<16x12xf32> to vector<12x12xf32>
    %338 = vector.broadcast %336 : f32 to vector<12x12xf32>
    %339 = arith.mulf %337, %338 : vector<12x12xf32>
    %340 = arith.addf %335, %339 : vector<12x12xf32>
    %c72 = arith.constant 72 : index
    %341 = memref.load %arg1[%c72] : memref<75xf32, #tpu.memory_space<smem>>
    %342 = vector.extract_strided_slice %320 {offsets = [4, 0], sizes = [12, 12], strides = [1, 1]} : vector<16x12xf32> to vector<12x12xf32>
    %343 = vector.broadcast %341 : f32 to vector<12x12xf32>
    %344 = arith.mulf %342, %343 : vector<12x12xf32>
    %345 = arith.addf %340, %344 : vector<12x12xf32>
    %346 = vector.extract_strided_slice %267 {offsets = [0, 3], sizes = [16, 12], strides = [1, 1]} : vector<16x16xf32> to vector<16x12xf32>
    %c53 = arith.constant 53 : index
    %347 = memref.load %arg1[%c53] : memref<75xf32, #tpu.memory_space<smem>>
    %348 = vector.extract_strided_slice %346 {offsets = [0, 0], sizes = [12, 12], strides = [1, 1]} : vector<16x12xf32> to vector<12x12xf32>
    %349 = vector.broadcast %347 : f32 to vector<12x12xf32>
    %350 = arith.mulf %348, %349 : vector<12x12xf32>
    %351 = arith.addf %345, %350 : vector<12x12xf32>
    %c58 = arith.constant 58 : index
    %352 = memref.load %arg1[%c58] : memref<75xf32, #tpu.memory_space<smem>>
    %353 = vector.extract_strided_slice %346 {offsets = [1, 0], sizes = [12, 12], strides = [1, 1]} : vector<16x12xf32> to vector<12x12xf32>
    %354 = vector.broadcast %352 : f32 to vector<12x12xf32>
    %355 = arith.mulf %353, %354 : vector<12x12xf32>
    %356 = arith.addf %351, %355 : vector<12x12xf32>
    %c63 = arith.constant 63 : index
    %357 = memref.load %arg1[%c63] : memref<75xf32, #tpu.memory_space<smem>>
    %358 = vector.extract_strided_slice %346 {offsets = [2, 0], sizes = [12, 12], strides = [1, 1]} : vector<16x12xf32> to vector<12x12xf32>
    %359 = vector.broadcast %357 : f32 to vector<12x12xf32>
    %360 = arith.mulf %358, %359 : vector<12x12xf32>
    %361 = arith.addf %356, %360 : vector<12x12xf32>
    %c68 = arith.constant 68 : index
    %362 = memref.load %arg1[%c68] : memref<75xf32, #tpu.memory_space<smem>>
    %363 = vector.extract_strided_slice %346 {offsets = [3, 0], sizes = [12, 12], strides = [1, 1]} : vector<16x12xf32> to vector<12x12xf32>
    %364 = vector.broadcast %362 : f32 to vector<12x12xf32>
    %365 = arith.mulf %363, %364 : vector<12x12xf32>
    %366 = arith.addf %361, %365 : vector<12x12xf32>
    %c73 = arith.constant 73 : index
    %367 = memref.load %arg1[%c73] : memref<75xf32, #tpu.memory_space<smem>>
    %368 = vector.extract_strided_slice %346 {offsets = [4, 0], sizes = [12, 12], strides = [1, 1]} : vector<16x12xf32> to vector<12x12xf32>
    %369 = vector.broadcast %367 : f32 to vector<12x12xf32>
    %370 = arith.mulf %368, %369 : vector<12x12xf32>
    %371 = arith.addf %366, %370 : vector<12x12xf32>
    %372 = vector.extract_strided_slice %267 {offsets = [0, 4], sizes = [16, 12], strides = [1, 1]} : vector<16x16xf32> to vector<16x12xf32>
    %c54 = arith.constant 54 : index
    %373 = memref.load %arg1[%c54] : memref<75xf32, #tpu.memory_space<smem>>
    %374 = vector.extract_strided_slice %372 {offsets = [0, 0], sizes = [12, 12], strides = [1, 1]} : vector<16x12xf32> to vector<12x12xf32>
    %375 = vector.broadcast %373 : f32 to vector<12x12xf32>
    %376 = arith.mulf %374, %375 : vector<12x12xf32>
    %377 = arith.addf %371, %376 : vector<12x12xf32>
    %c59 = arith.constant 59 : index
    %378 = memref.load %arg1[%c59] : memref<75xf32, #tpu.memory_space<smem>>
    %379 = vector.extract_strided_slice %372 {offsets = [1, 0], sizes = [12, 12], strides = [1, 1]} : vector<16x12xf32> to vector<12x12xf32>
    %380 = vector.broadcast %378 : f32 to vector<12x12xf32>
    %381 = arith.mulf %379, %380 : vector<12x12xf32>
    %382 = arith.addf %377, %381 : vector<12x12xf32>
    %c64 = arith.constant 64 : index
    %383 = memref.load %arg1[%c64] : memref<75xf32, #tpu.memory_space<smem>>
    %384 = vector.extract_strided_slice %372 {offsets = [2, 0], sizes = [12, 12], strides = [1, 1]} : vector<16x12xf32> to vector<12x12xf32>
    %385 = vector.broadcast %383 : f32 to vector<12x12xf32>
    %386 = arith.mulf %384, %385 : vector<12x12xf32>
    %387 = arith.addf %382, %386 : vector<12x12xf32>
    %c69 = arith.constant 69 : index
    %388 = memref.load %arg1[%c69] : memref<75xf32, #tpu.memory_space<smem>>
    %389 = vector.extract_strided_slice %372 {offsets = [3, 0], sizes = [12, 12], strides = [1, 1]} : vector<16x12xf32> to vector<12x12xf32>
    %390 = vector.broadcast %388 : f32 to vector<12x12xf32>
    %391 = arith.mulf %389, %390 : vector<12x12xf32>
    %392 = arith.addf %387, %391 : vector<12x12xf32>
    %c74 = arith.constant 74 : index
    %393 = memref.load %arg1[%c74] : memref<75xf32, #tpu.memory_space<smem>>
    %394 = vector.extract_strided_slice %372 {offsets = [4, 0], sizes = [12, 12], strides = [1, 1]} : vector<16x12xf32> to vector<12x12xf32>
    %395 = vector.broadcast %393 : f32 to vector<12x12xf32>
    %396 = arith.mulf %394, %395 : vector<12x12xf32>
    %397 = arith.addf %392, %396 : vector<12x12xf32>
    %c0_13 = arith.constant 0 : index
    %c0_14 = arith.constant 0 : index
    %c0_15 = arith.constant 0 : index
    %c0_16 = arith.constant 0 : index
    %398 = vector.load %arg3[%c0_13, %c0_14, %c0_15, %c0_16] : memref<2x1x12x12xf32, #tpu.memory_space<vmem>>, vector<1x1x12x12xf32>
    %399 = vector.shape_cast %398 : vector<1x1x12x12xf32> to vector<12x12xf32>
    %400 = vector.shape_cast %397 : vector<12x12xf32> to vector<1x1x12x12xf32>
    tpu.vector_store %arg3[%c0_13, %c0_14, %c0_15, %c0_16], %400 {strides = array<i32>} : memref<2x1x12x12xf32, #tpu.memory_space<vmem>>, vector<1x1x12x12xf32>,
    %c0_17 = arith.constant 0 : index
    %401 = memref.load %arg2[%c0_17] : memref<1xf32, #tpu.memory_space<smem>>
    %402 = vector.broadcast %401 : f32 to vector<12x12xf32>
    %c1_18 = arith.constant 1 : index
    %c0_19 = arith.constant 0 : index
    %c0_20 = arith.constant 0 : index
    %c0_21 = arith.constant 0 : index
    %403 = vector.load %arg0[%c1_18, %c0_19, %c0_20, %c0_21] : memref<2x3x16x16xf32, #tpu.memory_space<vmem>>, vector<1x1x16x16xf32>
    %404 = vector.shape_cast %403 : vector<1x1x16x16xf32> to vector<16x16xf32>
    %405 = vector.extract_strided_slice %404 {offsets = [0, 0], sizes = [16, 12], strides = [1, 1]} : vector<16x16xf32> to vector<16x12xf32>
    %c0_22 = arith.constant 0 : index
    %406 = memref.load %arg1[%c0_22] : memref<75xf32, #tpu.memory_space<smem>>
    %407 = vector.extract_strided_slice %405 {offsets = [0, 0], sizes = [12, 12], strides = [1, 1]} : vector<16x12xf32> to vector<12x12xf32>
    %408 = vector.broadcast %406 : f32 to vector<12x12xf32>
    %409 = arith.mulf %407, %408 : vector<12x12xf32>
    %410 = arith.addf %402, %409 : vector<12x12xf32>
    %c5_23 = arith.constant 5 : index
    %411 = memref.load %arg1[%c5_23] : memref<75xf32, #tpu.memory_space<smem>>
    %412 = vector.extract_strided_slice %405 {offsets = [1, 0], sizes = [12, 12], strides = [1, 1]} : vector<16x12xf32> to vector<12x12xf32>
    %413 = vector.broadcast %411 : f32 to vector<12x12xf32>
    %414 = arith.mulf %412, %413 : vector<12x12xf32>
    %415 = arith.addf %410, %414 : vector<12x12xf32>
    %c10_24 = arith.constant 10 : index
    %416 = memref.load %arg1[%c10_24] : memref<75xf32, #tpu.memory_space<smem>>
    %417 = vector.extract_strided_slice %405 {offsets = [2, 0], sizes = [12, 12], strides = [1, 1]} : vector<16x12xf32> to vector<12x12xf32>
    %418 = vector.broadcast %416 : f32 to vector<12x12xf32>
    %419 = arith.mulf %417, %418 : vector<12x12xf32>
    %420 = arith.addf %415, %419 : vector<12x12xf32>
    %c15_25 = arith.constant 15 : index
    %421 = memref.load %arg1[%c15_25] : memref<75xf32, #tpu.memory_space<smem>>
    %422 = vector.extract_strided_slice %405 {offsets = [3, 0], sizes = [12, 12], strides = [1, 1]} : vector<16x12xf32> to vector<12x12xf32>
    %423 = vector.broadcast %421 : f32 to vector<12x12xf32>
    %424 = arith.mulf %422, %423 : vector<12x12xf32>
    %425 = arith.addf %420, %424 : vector<12x12xf32>
    %c20_26 = arith.constant 20 : index
    %426 = memref.load %arg1[%c20_26] : memref<75xf32, #tpu.memory_space<smem>>
    %427 = vector.extract_strided_slice %405 {offsets = [4, 0], sizes = [12, 12], strides = [1, 1]} : vector<16x12xf32> to vector<12x12xf32>
    %428 = vector.broadcast %426 : f32 to vector<12x12xf32>
    %429 = arith.mulf %427, %428 : vector<12x12xf32>
    %430 = arith.addf %425, %429 : vector<12x12xf32>
    %431 = vector.extract_strided_slice %404 {offsets = [0, 1], sizes = [16, 12], strides = [1, 1]} : vector<16x16xf32> to vector<16x12xf32>
    %c1_27 = arith.constant 1 : index
    %432 = memref.load %arg1[%c1_27] : memref<75xf32, #tpu.memory_space<smem>>
    %433 = vector.extract_strided_slice %431 {offsets = [0, 0], sizes = [12, 12], strides = [1, 1]} : vector<16x12xf32> to vector<12x12xf32>
    %434 = vector.broadcast %432 : f32 to vector<12x12xf32>
    %435 = arith.mulf %433, %434 : vector<12x12xf32>
    %436 = arith.addf %430, %435 : vector<12x12xf32>
    %c6_28 = arith.constant 6 : index
    %437 = memref.load %arg1[%c6_28] : memref<75xf32, #tpu.memory_space<smem>>
    %438 = vector.extract_strided_slice %431 {offsets = [1, 0], sizes = [12, 12], strides = [1, 1]} : vector<16x12xf32> to vector<12x12xf32>
    %439 = vector.broadcast %437 : f32 to vector<12x12xf32>
    %440 = arith.mulf %438, %439 : vector<12x12xf32>
    %441 = arith.addf %436, %440 : vector<12x12xf32>
    %c11_29 = arith.constant 11 : index
    %442 = memref.load %arg1[%c11_29] : memref<75xf32, #tpu.memory_space<smem>>
    %443 = vector.extract_strided_slice %431 {offsets = [2, 0], sizes = [12, 12], strides = [1, 1]} : vector<16x12xf32> to vector<12x12xf32>
    %444 = vector.broadcast %442 : f32 to vector<12x12xf32>
    %445 = arith.mulf %443, %444 : vector<12x12xf32>
    %446 = arith.addf %441, %445 : vector<12x12xf32>
    %c16_30 = arith.constant 16 : index
    %447 = memref.load %arg1[%c16_30] : memref<75xf32, #tpu.memory_space<smem>>
    %448 = vector.extract_strided_slice %431 {offsets = [3, 0], sizes = [12, 12], strides = [1, 1]} : vector<16x12xf32> to vector<12x12xf32>
    %449 = vector.broadcast %447 : f32 to vector<12x12xf32>
    %450 = arith.mulf %448, %449 : vector<12x12xf32>
    %451 = arith.addf %446, %450 : vector<12x12xf32>
    %c21_31 = arith.constant 21 : index
    %452 = memref.load %arg1[%c21_31] : memref<75xf32, #tpu.memory_space<smem>>
    %453 = vector.extract_strided_slice %431 {offsets = [4, 0], sizes = [12, 12], strides = [1, 1]} : vector<16x12xf32> to vector<12x12xf32>
    %454 = vector.broadcast %452 : f32 to vector<12x12xf32>
    %455 = arith.mulf %453, %454 : vector<12x12xf32>
    %456 = arith.addf %451, %455 : vector<12x12xf32>
    %457 = vector.extract_strided_slice %404 {offsets = [0, 2], sizes = [16, 12], strides = [1, 1]} : vector<16x16xf32> to vector<16x12xf32>
    %c2_32 = arith.constant 2 : index
    %458 = memref.load %arg1[%c2_32] : memref<75xf32, #tpu.memory_space<smem>>
    %459 = vector.extract_strided_slice %457 {offsets = [0, 0], sizes = [12, 12], strides = [1, 1]} : vector<16x12xf32> to vector<12x12xf32>
    %460 = vector.broadcast %458 : f32 to vector<12x12xf32>
    %461 = arith.mulf %459, %460 : vector<12x12xf32>
    %462 = arith.addf %456, %461 : vector<12x12xf32>
    %c7_33 = arith.constant 7 : index
    %463 = memref.load %arg1[%c7_33] : memref<75xf32, #tpu.memory_space<smem>>
    %464 = vector.extract_strided_slice %457 {offsets = [1, 0], sizes = [12, 12], strides = [1, 1]} : vector<16x12xf32> to vector<12x12xf32>
    %465 = vector.broadcast %463 : f32 to vector<12x12xf32>
    %466 = arith.mulf %464, %465 : vector<12x12xf32>
    %467 = arith.addf %462, %466 : vector<12x12xf32>
    %c12_34 = arith.constant 12 : index
    %468 = memref.load %arg1[%c12_34] : memref<75xf32, #tpu.memory_space<smem>>
    %469 = vector.extract_strided_slice %457 {offsets = [2, 0], sizes = [12, 12], strides = [1, 1]} : vector<16x12xf32> to vector<12x12xf32>
    %470 = vector.broadcast %468 : f32 to vector<12x12xf32>
    %471 = arith.mulf %469, %470 : vector<12x12xf32>
    %472 = arith.addf %467, %471 : vector<12x12xf32>
    %c17_35 = arith.constant 17 : index
    %473 = memref.load %arg1[%c17_35] : memref<75xf32, #tpu.memory_space<smem>>
    %474 = vector.extract_strided_slice %457 {offsets = [3, 0], sizes = [12, 12], strides = [1, 1]} : vector<16x12xf32> to vector<12x12xf32>
    %475 = vector.broadcast %473 : f32 to vector<12x12xf32>
    %476 = arith.mulf %474, %475 : vector<12x12xf32>
    %477 = arith.addf %472, %476 : vector<12x12xf32>
    %c22_36 = arith.constant 22 : index
    %478 = memref.load %arg1[%c22_36] : memref<75xf32, #tpu.memory_space<smem>>
    %479 = vector.extract_strided_slice %457 {offsets = [4, 0], sizes = [12, 12], strides = [1, 1]} : vector<16x12xf32> to vector<12x12xf32>
    %480 = vector.broadcast %478 : f32 to vector<12x12xf32>
    %481 = arith.mulf %479, %480 : vector<12x12xf32>
    %482 = arith.addf %477, %481 : vector<12x12xf32>
    %483 = vector.extract_strided_slice %404 {offsets = [0, 3], sizes = [16, 12], strides = [1, 1]} : vector<16x16xf32> to vector<16x12xf32>
    %c3_37 = arith.constant 3 : index
    %484 = memref.load %arg1[%c3_37] : memref<75xf32, #tpu.memory_space<smem>>
    %485 = vector.extract_strided_slice %483 {offsets = [0, 0], sizes = [12, 12], strides = [1, 1]} : vector<16x12xf32> to vector<12x12xf32>
    %486 = vector.broadcast %484 : f32 to vector<12x12xf32>
    %487 = arith.mulf %485, %486 : vector<12x12xf32>
    %488 = arith.addf %482, %487 : vector<12x12xf32>
    %c8_38 = arith.constant 8 : index
    %489 = memref.load %arg1[%c8_38] : memref<75xf32, #tpu.memory_space<smem>>
    %490 = vector.extract_strided_slice %483 {offsets = [1, 0], sizes = [12, 12], strides = [1, 1]} : vector<16x12xf32> to vector<12x12xf32>
    %491 = vector.broadcast %489 : f32 to vector<12x12xf32>
    %492 = arith.mulf %490, %491 : vector<12x12xf32>
    %493 = arith.addf %488, %492 : vector<12x12xf32>
    %c13_39 = arith.constant 13 : index
    %494 = memref.load %arg1[%c13_39] : memref<75xf32, #tpu.memory_space<smem>>
    %495 = vector.extract_strided_slice %483 {offsets = [2, 0], sizes = [12, 12], strides = [1, 1]} : vector<16x12xf32> to vector<12x12xf32>
    %496 = vector.broadcast %494 : f32 to vector<12x12xf32>
    %497 = arith.mulf %495, %496 : vector<12x12xf32>
    %498 = arith.addf %493, %497 : vector<12x12xf32>
    %c18_40 = arith.constant 18 : index
    %499 = memref.load %arg1[%c18_40] : memref<75xf32, #tpu.memory_space<smem>>
    %500 = vector.extract_strided_slice %483 {offsets = [3, 0], sizes = [12, 12], strides = [1, 1]} : vector<16x12xf32> to vector<12x12xf32>
    %501 = vector.broadcast %499 : f32 to vector<12x12xf32>
    %502 = arith.mulf %500, %501 : vector<12x12xf32>
    %503 = arith.addf %498, %502 : vector<12x12xf32>
    %c23_41 = arith.constant 23 : index
    %504 = memref.load %arg1[%c23_41] : memref<75xf32, #tpu.memory_space<smem>>
    %505 = vector.extract_strided_slice %483 {offsets = [4, 0], sizes = [12, 12], strides = [1, 1]} : vector<16x12xf32> to vector<12x12xf32>
    %506 = vector.broadcast %504 : f32 to vector<12x12xf32>
    %507 = arith.mulf %505, %506 : vector<12x12xf32>
    %508 = arith.addf %503, %507 : vector<12x12xf32>
    %509 = vector.extract_strided_slice %404 {offsets = [0, 4], sizes = [16, 12], strides = [1, 1]} : vector<16x16xf32> to vector<16x12xf32>
    %c4_42 = arith.constant 4 : index
    %510 = memref.load %arg1[%c4_42] : memref<75xf32, #tpu.memory_space<smem>>
    %511 = vector.extract_strided_slice %509 {offsets = [0, 0], sizes = [12, 12], strides = [1, 1]} : vector<16x12xf32> to vector<12x12xf32>
    %512 = vector.broadcast %510 : f32 to vector<12x12xf32>
    %513 = arith.mulf %511, %512 : vector<12x12xf32>
    %514 = arith.addf %508, %513 : vector<12x12xf32>
    %c9_43 = arith.constant 9 : index
    %515 = memref.load %arg1[%c9_43] : memref<75xf32, #tpu.memory_space<smem>>
    %516 = vector.extract_strided_slice %509 {offsets = [1, 0], sizes = [12, 12], strides = [1, 1]} : vector<16x12xf32> to vector<12x12xf32>
    %517 = vector.broadcast %515 : f32 to vector<12x12xf32>
    %518 = arith.mulf %516, %517 : vector<12x12xf32>
    %519 = arith.addf %514, %518 : vector<12x12xf32>
    %c14_44 = arith.constant 14 : index
    %520 = memref.load %arg1[%c14_44] : memref<75xf32, #tpu.memory_space<smem>>
    %521 = vector.extract_strided_slice %509 {offsets = [2, 0], sizes = [12, 12], strides = [1, 1]} : vector<16x12xf32> to vector<12x12xf32>
    %522 = vector.broadcast %520 : f32 to vector<12x12xf32>
    %523 = arith.mulf %521, %522 : vector<12x12xf32>
    %524 = arith.addf %519, %523 : vector<12x12xf32>
    %c19_45 = arith.constant 19 : index
    %525 = memref.load %arg1[%c19_45] : memref<75xf32, #tpu.memory_space<smem>>
    %526 = vector.extract_strided_slice %509 {offsets = [3, 0], sizes = [12, 12], strides = [1, 1]} : vector<16x12xf32> to vector<12x12xf32>
    %527 = vector.broadcast %525 : f32 to vector<12x12xf32>
    %528 = arith.mulf %526, %527 : vector<12x12xf32>
    %529 = arith.addf %524, %528 : vector<12x12xf32>
    %c24_46 = arith.constant 24 : index
    %530 = memref.load %arg1[%c24_46] : memref<75xf32, #tpu.memory_space<smem>>
    %531 = vector.extract_strided_slice %509 {offsets = [4, 0], sizes = [12, 12], strides = [1, 1]} : vector<16x12xf32> to vector<12x12xf32>
    %532 = vector.broadcast %530 : f32 to vector<12x12xf32>
    %533 = arith.mulf %531, %532 : vector<12x12xf32>
    %534 = arith.addf %529, %533 : vector<12x12xf32>
    %c1_47 = arith.constant 1 : index
    %c1_48 = arith.constant 1 : index
    %c0_49 = arith.constant 0 : index
    %c0_50 = arith.constant 0 : index
    %535 = vector.load %arg0[%c1_47, %c1_48, %c0_49, %c0_50] : memref<2x3x16x16xf32, #tpu.memory_space<vmem>>, vector<1x1x16x16xf32>
    %536 = vector.shape_cast %535 : vector<1x1x16x16xf32> to vector<16x16xf32>
    %537 = vector.extract_strided_slice %536 {offsets = [0, 0], sizes = [16, 12], strides = [1, 1]} : vector<16x16xf32> to vector<16x12xf32>
    %c25_51 = arith.constant 25 : index
    %538 = memref.load %arg1[%c25_51] : memref<75xf32, #tpu.memory_space<smem>>
    %539 = vector.extract_strided_slice %537 {offsets = [0, 0], sizes = [12, 12], strides = [1, 1]} : vector<16x12xf32> to vector<12x12xf32>
    %540 = vector.broadcast %538 : f32 to vector<12x12xf32>
    %541 = arith.mulf %539, %540 : vector<12x12xf32>
    %542 = arith.addf %534, %541 : vector<12x12xf32>
    %c30_52 = arith.constant 30 : index
    %543 = memref.load %arg1[%c30_52] : memref<75xf32, #tpu.memory_space<smem>>
    %544 = vector.extract_strided_slice %537 {offsets = [1, 0], sizes = [12, 12], strides = [1, 1]} : vector<16x12xf32> to vector<12x12xf32>
    %545 = vector.broadcast %543 : f32 to vector<12x12xf32>
    %546 = arith.mulf %544, %545 : vector<12x12xf32>
    %547 = arith.addf %542, %546 : vector<12x12xf32>
    %c35_53 = arith.constant 35 : index
    %548 = memref.load %arg1[%c35_53] : memref<75xf32, #tpu.memory_space<smem>>
    %549 = vector.extract_strided_slice %537 {offsets = [2, 0], sizes = [12, 12], strides = [1, 1]} : vector<16x12xf32> to vector<12x12xf32>
    %550 = vector.broadcast %548 : f32 to vector<12x12xf32>
    %551 = arith.mulf %549, %550 : vector<12x12xf32>
    %552 = arith.addf %547, %551 : vector<12x12xf32>
    %c40_54 = arith.constant 40 : index
    %553 = memref.load %arg1[%c40_54] : memref<75xf32, #tpu.memory_space<smem>>
    %554 = vector.extract_strided_slice %537 {offsets = [3, 0], sizes = [12, 12], strides = [1, 1]} : vector<16x12xf32> to vector<12x12xf32>
    %555 = vector.broadcast %553 : f32 to vector<12x12xf32>
    %556 = arith.mulf %554, %555 : vector<12x12xf32>
    %557 = arith.addf %552, %556 : vector<12x12xf32>
    %c45_55 = arith.constant 45 : index
    %558 = memref.load %arg1[%c45_55] : memref<75xf32, #tpu.memory_space<smem>>
    %559 = vector.extract_strided_slice %537 {offsets = [4, 0], sizes = [12, 12], strides = [1, 1]} : vector<16x12xf32> to vector<12x12xf32>
    %560 = vector.broadcast %558 : f32 to vector<12x12xf32>
    %561 = arith.mulf %559, %560 : vector<12x12xf32>
    %562 = arith.addf %557, %561 : vector<12x12xf32>
    %563 = vector.extract_strided_slice %536 {offsets = [0, 1], sizes = [16, 12], strides = [1, 1]} : vector<16x16xf32> to vector<16x12xf32>
    %c26_56 = arith.constant 26 : index
    %564 = memref.load %arg1[%c26_56] : memref<75xf32, #tpu.memory_space<smem>>
    %565 = vector.extract_strided_slice %563 {offsets = [0, 0], sizes = [12, 12], strides = [1, 1]} : vector<16x12xf32> to vector<12x12xf32>
    %566 = vector.broadcast %564 : f32 to vector<12x12xf32>
    %567 = arith.mulf %565, %566 : vector<12x12xf32>
    %568 = arith.addf %562, %567 : vector<12x12xf32>
    %c31_57 = arith.constant 31 : index
    %569 = memref.load %arg1[%c31_57] : memref<75xf32, #tpu.memory_space<smem>>
    %570 = vector.extract_strided_slice %563 {offsets = [1, 0], sizes = [12, 12], strides = [1, 1]} : vector<16x12xf32> to vector<12x12xf32>
    %571 = vector.broadcast %569 : f32 to vector<12x12xf32>
    %572 = arith.mulf %570, %571 : vector<12x12xf32>
    %573 = arith.addf %568, %572 : vector<12x12xf32>
    %c36_58 = arith.constant 36 : index
    %574 = memref.load %arg1[%c36_58] : memref<75xf32, #tpu.memory_space<smem>>
    %575 = vector.extract_strided_slice %563 {offsets = [2, 0], sizes = [12, 12], strides = [1, 1]} : vector<16x12xf32> to vector<12x12xf32>
    %576 = vector.broadcast %574 : f32 to vector<12x12xf32>
    %577 = arith.mulf %575, %576 : vector<12x12xf32>
    %578 = arith.addf %573, %577 : vector<12x12xf32>
    %c41_59 = arith.constant 41 : index
    %579 = memref.load %arg1[%c41_59] : memref<75xf32, #tpu.memory_space<smem>>
    %580 = vector.extract_strided_slice %563 {offsets = [3, 0], sizes = [12, 12], strides = [1, 1]} : vector<16x12xf32> to vector<12x12xf32>
    %581 = vector.broadcast %579 : f32 to vector<12x12xf32>
    %582 = arith.mulf %580, %581 : vector<12x12xf32>
    %583 = arith.addf %578, %582 : vector<12x12xf32>
    %c46_60 = arith.constant 46 : index
    %584 = memref.load %arg1[%c46_60] : memref<75xf32, #tpu.memory_space<smem>>
    %585 = vector.extract_strided_slice %563 {offsets = [4, 0], sizes = [12, 12], strides = [1, 1]} : vector<16x12xf32> to vector<12x12xf32>
    %586 = vector.broadcast %584 : f32 to vector<12x12xf32>
    %587 = arith.mulf %585, %586 : vector<12x12xf32>
    %588 = arith.addf %583, %587 : vector<12x12xf32>
    %589 = vector.extract_strided_slice %536 {offsets = [0, 2], sizes = [16, 12], strides = [1, 1]} : vector<16x16xf32> to vector<16x12xf32>
    %c27_61 = arith.constant 27 : index
    %590 = memref.load %arg1[%c27_61] : memref<75xf32, #tpu.memory_space<smem>>
    %591 = vector.extract_strided_slice %589 {offsets = [0, 0], sizes = [12, 12], strides = [1, 1]} : vector<16x12xf32> to vector<12x12xf32>
    %592 = vector.broadcast %590 : f32 to vector<12x12xf32>
    %593 = arith.mulf %591, %592 : vector<12x12xf32>
    %594 = arith.addf %588, %593 : vector<12x12xf32>
    %c32_62 = arith.constant 32 : index
    %595 = memref.load %arg1[%c32_62] : memref<75xf32, #tpu.memory_space<smem>>
    %596 = vector.extract_strided_slice %589 {offsets = [1, 0], sizes = [12, 12], strides = [1, 1]} : vector<16x12xf32> to vector<12x12xf32>
    %597 = vector.broadcast %595 : f32 to vector<12x12xf32>
    %598 = arith.mulf %596, %597 : vector<12x12xf32>
    %599 = arith.addf %594, %598 : vector<12x12xf32>
    %c37_63 = arith.constant 37 : index
    %600 = memref.load %arg1[%c37_63] : memref<75xf32, #tpu.memory_space<smem>>
    %601 = vector.extract_strided_slice %589 {offsets = [2, 0], sizes = [12, 12], strides = [1, 1]} : vector<16x12xf32> to vector<12x12xf32>
    %602 = vector.broadcast %600 : f32 to vector<12x12xf32>
    %603 = arith.mulf %601, %602 : vector<12x12xf32>
    %604 = arith.addf %599, %603 : vector<12x12xf32>
    %c42_64 = arith.constant 42 : index
    %605 = memref.load %arg1[%c42_64] : memref<75xf32, #tpu.memory_space<smem>>
    %606 = vector.extract_strided_slice %589 {offsets = [3, 0], sizes = [12, 12], strides = [1, 1]} : vector<16x12xf32> to vector<12x12xf32>
    %607 = vector.broadcast %605 : f32 to vector<12x12xf32>
    %608 = arith.mulf %606, %607 : vector<12x12xf32>
    %609 = arith.addf %604, %608 : vector<12x12xf32>
    %c47_65 = arith.constant 47 : index
    %610 = memref.load %arg1[%c47_65] : memref<75xf32, #tpu.memory_space<smem>>
    %611 = vector.extract_strided_slice %589 {offsets = [4, 0], sizes = [12, 12], strides = [1, 1]} : vector<16x12xf32> to vector<12x12xf32>
    %612 = vector.broadcast %610 : f32 to vector<12x12xf32>
    %613 = arith.mulf %611, %612 : vector<12x12xf32>
    %614 = arith.addf %609, %613 : vector<12x12xf32>
    %615 = vector.extract_strided_slice %536 {offsets = [0, 3], sizes = [16, 12], strides = [1, 1]} : vector<16x16xf32> to vector<16x12xf32>
    %c28_66 = arith.constant 28 : index
    %616 = memref.load %arg1[%c28_66] : memref<75xf32, #tpu.memory_space<smem>>
    %617 = vector.extract_strided_slice %615 {offsets = [0, 0], sizes = [12, 12], strides = [1, 1]} : vector<16x12xf32> to vector<12x12xf32>
    %618 = vector.broadcast %616 : f32 to vector<12x12xf32>
    %619 = arith.mulf %617, %618 : vector<12x12xf32>
    %620 = arith.addf %614, %619 : vector<12x12xf32>
    %c33_67 = arith.constant 33 : index
    %621 = memref.load %arg1[%c33_67] : memref<75xf32, #tpu.memory_space<smem>>
    %622 = vector.extract_strided_slice %615 {offsets = [1, 0], sizes = [12, 12], strides = [1, 1]} : vector<16x12xf32> to vector<12x12xf32>
    %623 = vector.broadcast %621 : f32 to vector<12x12xf32>
    %624 = arith.mulf %622, %623 : vector<12x12xf32>
    %625 = arith.addf %620, %624 : vector<12x12xf32>
    %c38_68 = arith.constant 38 : index
    %626 = memref.load %arg1[%c38_68] : memref<75xf32, #tpu.memory_space<smem>>
    %627 = vector.extract_strided_slice %615 {offsets = [2, 0], sizes = [12, 12], strides = [1, 1]} : vector<16x12xf32> to vector<12x12xf32>
    %628 = vector.broadcast %626 : f32 to vector<12x12xf32>
    %629 = arith.mulf %627, %628 : vector<12x12xf32>
    %630 = arith.addf %625, %629 : vector<12x12xf32>
    %c43_69 = arith.constant 43 : index
    %631 = memref.load %arg1[%c43_69] : memref<75xf32, #tpu.memory_space<smem>>
    %632 = vector.extract_strided_slice %615 {offsets = [3, 0], sizes = [12, 12], strides = [1, 1]} : vector<16x12xf32> to vector<12x12xf32>
    %633 = vector.broadcast %631 : f32 to vector<12x12xf32>
    %634 = arith.mulf %632, %633 : vector<12x12xf32>
    %635 = arith.addf %630, %634 : vector<12x12xf32>
    %c48_70 = arith.constant 48 : index
    %636 = memref.load %arg1[%c48_70] : memref<75xf32, #tpu.memory_space<smem>>
    %637 = vector.extract_strided_slice %615 {offsets = [4, 0], sizes = [12, 12], strides = [1, 1]} : vector<16x12xf32> to vector<12x12xf32>
    %638 = vector.broadcast %636 : f32 to vector<12x12xf32>
    %639 = arith.mulf %637, %638 : vector<12x12xf32>
    %640 = arith.addf %635, %639 : vector<12x12xf32>
    %641 = vector.extract_strided_slice %536 {offsets = [0, 4], sizes = [16, 12], strides = [1, 1]} : vector<16x16xf32> to vector<16x12xf32>
    %c29_71 = arith.constant 29 : index
    %642 = memref.load %arg1[%c29_71] : memref<75xf32, #tpu.memory_space<smem>>
    %643 = vector.extract_strided_slice %641 {offsets = [0, 0], sizes = [12, 12], strides = [1, 1]} : vector<16x12xf32> to vector<12x12xf32>
    %644 = vector.broadcast %642 : f32 to vector<12x12xf32>
    %645 = arith.mulf %643, %644 : vector<12x12xf32>
    %646 = arith.addf %640, %645 : vector<12x12xf32>
    %c34_72 = arith.constant 34 : index
    %647 = memref.load %arg1[%c34_72] : memref<75xf32, #tpu.memory_space<smem>>
    %648 = vector.extract_strided_slice %641 {offsets = [1, 0], sizes = [12, 12], strides = [1, 1]} : vector<16x12xf32> to vector<12x12xf32>
    %649 = vector.broadcast %647 : f32 to vector<12x12xf32>
    %650 = arith.mulf %648, %649 : vector<12x12xf32>
    %651 = arith.addf %646, %650 : vector<12x12xf32>
    %c39_73 = arith.constant 39 : index
    %652 = memref.load %arg1[%c39_73] : memref<75xf32, #tpu.memory_space<smem>>
    %653 = vector.extract_strided_slice %641 {offsets = [2, 0], sizes = [12, 12], strides = [1, 1]} : vector<16x12xf32> to vector<12x12xf32>
    %654 = vector.broadcast %652 : f32 to vector<12x12xf32>
    %655 = arith.mulf %653, %654 : vector<12x12xf32>
    %656 = arith.addf %651, %655 : vector<12x12xf32>
    %c44_74 = arith.constant 44 : index
    %657 = memref.load %arg1[%c44_74] : memref<75xf32, #tpu.memory_space<smem>>
    %658 = vector.extract_strided_slice %641 {offsets = [3, 0], sizes = [12, 12], strides = [1, 1]} : vector<16x12xf32> to vector<12x12xf32>
    %659 = vector.broadcast %657 : f32 to vector<12x12xf32>
    %660 = arith.mulf %658, %659 : vector<12x12xf32>
    %661 = arith.addf %656, %660 : vector<12x12xf32>
    %c49_75 = arith.constant 49 : index
    %662 = memref.load %arg1[%c49_75] : memref<75xf32, #tpu.memory_space<smem>>
    %663 = vector.extract_strided_slice %641 {offsets = [4, 0], sizes = [12, 12], strides = [1, 1]} : vector<16x12xf32> to vector<12x12xf32>
    %664 = vector.broadcast %662 : f32 to vector<12x12xf32>
    %665 = arith.mulf %663, %664 : vector<12x12xf32>
    %666 = arith.addf %661, %665 : vector<12x12xf32>
    %c1_76 = arith.constant 1 : index
    %c2_77 = arith.constant 2 : index
    %c0_78 = arith.constant 0 : index
    %c0_79 = arith.constant 0 : index
    %667 = vector.load %arg0[%c1_76, %c2_77, %c0_78, %c0_79] : memref<2x3x16x16xf32, #tpu.memory_space<vmem>>, vector<1x1x16x16xf32>
    %668 = vector.shape_cast %667 : vector<1x1x16x16xf32> to vector<16x16xf32>
    %669 = vector.extract_strided_slice %668 {offsets = [0, 0], sizes = [16, 12], strides = [1, 1]} : vector<16x16xf32> to vector<16x12xf32>
    %c50_80 = arith.constant 50 : index
    %670 = memref.load %arg1[%c50_80] : memref<75xf32, #tpu.memory_space<smem>>
    %671 = vector.extract_strided_slice %669 {offsets = [0, 0], sizes = [12, 12], strides = [1, 1]} : vector<16x12xf32> to vector<12x12xf32>
    %672 = vector.broadcast %670 : f32 to vector<12x12xf32>
    %673 = arith.mulf %671, %672 : vector<12x12xf32>
    %674 = arith.addf %666, %673 : vector<12x12xf32>
    %c55_81 = arith.constant 55 : index
    %675 = memref.load %arg1[%c55_81] : memref<75xf32, #tpu.memory_space<smem>>
    %676 = vector.extract_strided_slice %669 {offsets = [1, 0], sizes = [12, 12], strides = [1, 1]} : vector<16x12xf32> to vector<12x12xf32>
    %677 = vector.broadcast %675 : f32 to vector<12x12xf32>
    %678 = arith.mulf %676, %677 : vector<12x12xf32>
    %679 = arith.addf %674, %678 : vector<12x12xf32>
    %c60_82 = arith.constant 60 : index
    %680 = memref.load %arg1[%c60_82] : memref<75xf32, #tpu.memory_space<smem>>
    %681 = vector.extract_strided_slice %669 {offsets = [2, 0], sizes = [12, 12], strides = [1, 1]} : vector<16x12xf32> to vector<12x12xf32>
    %682 = vector.broadcast %680 : f32 to vector<12x12xf32>
    %683 = arith.mulf %681, %682 : vector<12x12xf32>
    %684 = arith.addf %679, %683 : vector<12x12xf32>
    %c65_83 = arith.constant 65 : index
    %685 = memref.load %arg1[%c65_83] : memref<75xf32, #tpu.memory_space<smem>>
    %686 = vector.extract_strided_slice %669 {offsets = [3, 0], sizes = [12, 12], strides = [1, 1]} : vector<16x12xf32> to vector<12x12xf32>
    %687 = vector.broadcast %685 : f32 to vector<12x12xf32>
    %688 = arith.mulf %686, %687 : vector<12x12xf32>
    %689 = arith.addf %684, %688 : vector<12x12xf32>
    %c70_84 = arith.constant 70 : index
    %690 = memref.load %arg1[%c70_84] : memref<75xf32, #tpu.memory_space<smem>>
    %691 = vector.extract_strided_slice %669 {offsets = [4, 0], sizes = [12, 12], strides = [1, 1]} : vector<16x12xf32> to vector<12x12xf32>
    %692 = vector.broadcast %690 : f32 to vector<12x12xf32>
    %693 = arith.mulf %691, %692 : vector<12x12xf32>
    %694 = arith.addf %689, %693 : vector<12x12xf32>
    %695 = vector.extract_strided_slice %668 {offsets = [0, 1], sizes = [16, 12], strides = [1, 1]} : vector<16x16xf32> to vector<16x12xf32>
    %c51_85 = arith.constant 51 : index
    %696 = memref.load %arg1[%c51_85] : memref<75xf32, #tpu.memory_space<smem>>
    %697 = vector.extract_strided_slice %695 {offsets = [0, 0], sizes = [12, 12], strides = [1, 1]} : vector<16x12xf32> to vector<12x12xf32>
    %698 = vector.broadcast %696 : f32 to vector<12x12xf32>
    %699 = arith.mulf %697, %698 : vector<12x12xf32>
    %700 = arith.addf %694, %699 : vector<12x12xf32>
    %c56_86 = arith.constant 56 : index
    %701 = memref.load %arg1[%c56_86] : memref<75xf32, #tpu.memory_space<smem>>
    %702 = vector.extract_strided_slice %695 {offsets = [1, 0], sizes = [12, 12], strides = [1, 1]} : vector<16x12xf32> to vector<12x12xf32>
    %703 = vector.broadcast %701 : f32 to vector<12x12xf32>
    %704 = arith.mulf %702, %703 : vector<12x12xf32>
    %705 = arith.addf %700, %704 : vector<12x12xf32>
    %c61_87 = arith.constant 61 : index
    %706 = memref.load %arg1[%c61_87] : memref<75xf32, #tpu.memory_space<smem>>
    %707 = vector.extract_strided_slice %695 {offsets = [2, 0], sizes = [12, 12], strides = [1, 1]} : vector<16x12xf32> to vector<12x12xf32>
    %708 = vector.broadcast %706 : f32 to vector<12x12xf32>
    %709 = arith.mulf %707, %708 : vector<12x12xf32>
    %710 = arith.addf %705, %709 : vector<12x12xf32>
    %c66_88 = arith.constant 66 : index
    %711 = memref.load %arg1[%c66_88] : memref<75xf32, #tpu.memory_space<smem>>
    %712 = vector.extract_strided_slice %695 {offsets = [3, 0], sizes = [12, 12], strides = [1, 1]} : vector<16x12xf32> to vector<12x12xf32>
    %713 = vector.broadcast %711 : f32 to vector<12x12xf32>
    %714 = arith.mulf %712, %713 : vector<12x12xf32>
    %715 = arith.addf %710, %714 : vector<12x12xf32>
    %c71_89 = arith.constant 71 : index
    %716 = memref.load %arg1[%c71_89] : memref<75xf32, #tpu.memory_space<smem>>
    %717 = vector.extract_strided_slice %695 {offsets = [4, 0], sizes = [12, 12], strides = [1, 1]} : vector<16x12xf32> to vector<12x12xf32>
    %718 = vector.broadcast %716 : f32 to vector<12x12xf32>
    %719 = arith.mulf %717, %718 : vector<12x12xf32>
    %720 = arith.addf %715, %719 : vector<12x12xf32>
    %721 = vector.extract_strided_slice %668 {offsets = [0, 2], sizes = [16, 12], strides = [1, 1]} : vector<16x16xf32> to vector<16x12xf32>
    %c52_90 = arith.constant 52 : index
    %722 = memref.load %arg1[%c52_90] : memref<75xf32, #tpu.memory_space<smem>>
    %723 = vector.extract_strided_slice %721 {offsets = [0, 0], sizes = [12, 12], strides = [1, 1]} : vector<16x12xf32> to vector<12x12xf32>
    %724 = vector.broadcast %722 : f32 to vector<12x12xf32>
    %725 = arith.mulf %723, %724 : vector<12x12xf32>
    %726 = arith.addf %720, %725 : vector<12x12xf32>
    %c57_91 = arith.constant 57 : index
    %727 = memref.load %arg1[%c57_91] : memref<75xf32, #tpu.memory_space<smem>>
    %728 = vector.extract_strided_slice %721 {offsets = [1, 0], sizes = [12, 12], strides = [1, 1]} : vector<16x12xf32> to vector<12x12xf32>
    %729 = vector.broadcast %727 : f32 to vector<12x12xf32>
    %730 = arith.mulf %728, %729 : vector<12x12xf32>
    %731 = arith.addf %726, %730 : vector<12x12xf32>
    %c62_92 = arith.constant 62 : index
    %732 = memref.load %arg1[%c62_92] : memref<75xf32, #tpu.memory_space<smem>>
    %733 = vector.extract_strided_slice %721 {offsets = [2, 0], sizes = [12, 12], strides = [1, 1]} : vector<16x12xf32> to vector<12x12xf32>
    %734 = vector.broadcast %732 : f32 to vector<12x12xf32>
    %735 = arith.mulf %733, %734 : vector<12x12xf32>
    %736 = arith.addf %731, %735 : vector<12x12xf32>
    %c67_93 = arith.constant 67 : index
    %737 = memref.load %arg1[%c67_93] : memref<75xf32, #tpu.memory_space<smem>>
    %738 = vector.extract_strided_slice %721 {offsets = [3, 0], sizes = [12, 12], strides = [1, 1]} : vector<16x12xf32> to vector<12x12xf32>
    %739 = vector.broadcast %737 : f32 to vector<12x12xf32>
    %740 = arith.mulf %738, %739 : vector<12x12xf32>
    %741 = arith.addf %736, %740 : vector<12x12xf32>
    %c72_94 = arith.constant 72 : index
    %742 = memref.load %arg1[%c72_94] : memref<75xf32, #tpu.memory_space<smem>>
    %743 = vector.extract_strided_slice %721 {offsets = [4, 0], sizes = [12, 12], strides = [1, 1]} : vector<16x12xf32> to vector<12x12xf32>
    %744 = vector.broadcast %742 : f32 to vector<12x12xf32>
    %745 = arith.mulf %743, %744 : vector<12x12xf32>
    %746 = arith.addf %741, %745 : vector<12x12xf32>
    %747 = vector.extract_strided_slice %668 {offsets = [0, 3], sizes = [16, 12], strides = [1, 1]} : vector<16x16xf32> to vector<16x12xf32>
    %c53_95 = arith.constant 53 : index
    %748 = memref.load %arg1[%c53_95] : memref<75xf32, #tpu.memory_space<smem>>
    %749 = vector.extract_strided_slice %747 {offsets = [0, 0], sizes = [12, 12], strides = [1, 1]} : vector<16x12xf32> to vector<12x12xf32>
    %750 = vector.broadcast %748 : f32 to vector<12x12xf32>
    %751 = arith.mulf %749, %750 : vector<12x12xf32>
    %752 = arith.addf %746, %751 : vector<12x12xf32>
    %c58_96 = arith.constant 58 : index
    %753 = memref.load %arg1[%c58_96] : memref<75xf32, #tpu.memory_space<smem>>
    %754 = vector.extract_strided_slice %747 {offsets = [1, 0], sizes = [12, 12], strides = [1, 1]} : vector<16x12xf32> to vector<12x12xf32>
    %755 = vector.broadcast %753 : f32 to vector<12x12xf32>
    %756 = arith.mulf %754, %755 : vector<12x12xf32>
    %757 = arith.addf %752, %756 : vector<12x12xf32>
    %c63_97 = arith.constant 63 : index
    %758 = memref.load %arg1[%c63_97] : memref<75xf32, #tpu.memory_space<smem>>
    %759 = vector.extract_strided_slice %747 {offsets = [2, 0], sizes = [12, 12], strides = [1, 1]} : vector<16x12xf32> to vector<12x12xf32>
    %760 = vector.broadcast %758 : f32 to vector<12x12xf32>
    %761 = arith.mulf %759, %760 : vector<12x12xf32>
    %762 = arith.addf %757, %761 : vector<12x12xf32>
    %c68_98 = arith.constant 68 : index
    %763 = memref.load %arg1[%c68_98] : memref<75xf32, #tpu.memory_space<smem>>
    %764 = vector.extract_strided_slice %747 {offsets = [3, 0], sizes = [12, 12], strides = [1, 1]} : vector<16x12xf32> to vector<12x12xf32>
    %765 = vector.broadcast %763 : f32 to vector<12x12xf32>
    %766 = arith.mulf %764, %765 : vector<12x12xf32>
    %767 = arith.addf %762, %766 : vector<12x12xf32>
    %c73_99 = arith.constant 73 : index
    %768 = memref.load %arg1[%c73_99] : memref<75xf32, #tpu.memory_space<smem>>
    %769 = vector.extract_strided_slice %747 {offsets = [4, 0], sizes = [12, 12], strides = [1, 1]} : vector<16x12xf32> to vector<12x12xf32>
    %770 = vector.broadcast %768 : f32 to vector<12x12xf32>
    %771 = arith.mulf %769, %770 : vector<12x12xf32>
    %772 = arith.addf %767, %771 : vector<12x12xf32>
    %773 = vector.extract_strided_slice %668 {offsets = [0, 4], sizes = [16, 12], strides = [1, 1]} : vector<16x16xf32> to vector<16x12xf32>
    %c54_100 = arith.constant 54 : index
    %774 = memref.load %arg1[%c54_100] : memref<75xf32, #tpu.memory_space<smem>>
    %775 = vector.extract_strided_slice %773 {offsets = [0, 0], sizes = [12, 12], strides = [1, 1]} : vector<16x12xf32> to vector<12x12xf32>
    %776 = vector.broadcast %774 : f32 to vector<12x12xf32>
    %777 = arith.mulf %775, %776 : vector<12x12xf32>
    %778 = arith.addf %772, %777 : vector<12x12xf32>
    %c59_101 = arith.constant 59 : index
    %779 = memref.load %arg1[%c59_101] : memref<75xf32, #tpu.memory_space<smem>>
    %780 = vector.extract_strided_slice %773 {offsets = [1, 0], sizes = [12, 12], strides = [1, 1]} : vector<16x12xf32> to vector<12x12xf32>
    %781 = vector.broadcast %779 : f32 to vector<12x12xf32>
    %782 = arith.mulf %780, %781 : vector<12x12xf32>
    %783 = arith.addf %778, %782 : vector<12x12xf32>
    %c64_102 = arith.constant 64 : index
    %784 = memref.load %arg1[%c64_102] : memref<75xf32, #tpu.memory_space<smem>>
    %785 = vector.extract_strided_slice %773 {offsets = [2, 0], sizes = [12, 12], strides = [1, 1]} : vector<16x12xf32> to vector<12x12xf32>
    %786 = vector.broadcast %784 : f32 to vector<12x12xf32>
    %787 = arith.mulf %785, %786 : vector<12x12xf32>
    %788 = arith.addf %783, %787 : vector<12x12xf32>
    %c69_103 = arith.constant 69 : index
    %789 = memref.load %arg1[%c69_103] : memref<75xf32, #tpu.memory_space<smem>>
    %790 = vector.extract_strided_slice %773 {offsets = [3, 0], sizes = [12, 12], strides = [1, 1]} : vector<16x12xf32> to vector<12x12xf32>
    %791 = vector.broadcast %789 : f32 to vector<12x12xf32>
    %792 = arith.mulf %790, %791 : vector<12x12xf32>
    %793 = arith.addf %788, %792 : vector<12x12xf32>
    %c74_104 = arith.constant 74 : index
    %794 = memref.load %arg1[%c74_104] : memref<75xf32, #tpu.memory_space<smem>>
    %795 = vector.extract_strided_slice %773 {offsets = [4, 0], sizes = [12, 12], strides = [1, 1]} : vector<16x12xf32> to vector<12x12xf32>
    %796 = vector.broadcast %794 : f32 to vector<12x12xf32>
    %797 = arith.mulf %795, %796 : vector<12x12xf32>
    %798 = arith.addf %793, %797 : vector<12x12xf32>
    %c1_105 = arith.constant 1 : index
    %c0_106 = arith.constant 0 : index
    %c0_107 = arith.constant 0 : index
    %c0_108 = arith.constant 0 : index
    %799 = vector.load %arg3[%c1_105, %c0_106, %c0_107, %c0_108] : memref<2x1x12x12xf32, #tpu.memory_space<vmem>>, vector<1x1x12x12xf32>
    %800 = vector.shape_cast %799 : vector<1x1x12x12xf32> to vector<12x12xf32>
    %801 = vector.shape_cast %798 : vector<12x12xf32> to vector<1x1x12x12xf32>
    tpu.vector_store %arg3[%c1_105, %c0_106, %c0_107, %c0_108], %801 {strides = array<i32>} : memref<2x1x12x12xf32, #tpu.memory_space<vmem>>, vector<1x1x12x12xf32>,
    return
  }
}

</mosaic_0001>

<bundles_post_ra>
// kernel: tpu_custom_call.1
= control target key start
LH: loop header
LB: loop body
LE: loop exit
PB: predicated region body
PF: predicated region fallthrough
CT: control target
= control target key end

     0   :  { %9 = vsyncpa [#allocation4], 0  ;;  %s4142_s0 = inlined_call_operand.hbm [shape: f32[2,3,16,16], index: 0, kind: input, shape index: {}]   ;;  %s4143_s1 = inlined_call_operand.vmem [shape: f32[75], index: 1, kind: input, shape index: {}]   ;;  %s4144_s2 = inlined_call_operand.<no memory space> [shape: f32[1], index: 2, kind: input, shape index: {}]   ;;  %s4145_s3 = inlined_call_operand.vmem [shape: f32[2,1,12,12], index: 3, kind: output, shape index: {}]  }
   0x1   :  { %10 = vsyncpa [#allocation5], 0  ;;  %s2590_s12 = smov [#allocation3]   ;;  %s29_s16 = sshll.u32 %s4143_s1, 4  ;;  %s30_s16 = int_to_ptr.vmem [resolvable:$true] %s29_s16 }
   0x2   :  { %s16_s13 = sshll.u32 %s2590_s12, 4  ;;  %s17_s13 = int_to_ptr.vmem [resolvable:$true] %s16_s13 }
   0x3   :  { %s2562_s17 = scalar_lea.vmem %s17_s13, 1536  ;;  %p2567_p1 = scmp.lt.s32.totalorder %s17_s13, %s17_s13 }
   0x4   :  { %p2563_p0 = scmp.ne.s32.totalorder %s17_s13, %s2562_s17  ;;  %p2568_p2 = scmp.lt.s32.totalorder %s2562_s17, %s2562_s17 }
   0x6   :  { %p2569_p3 = por %p2568_p2, %p2567_p1 }
   0x8   :  { %p2570_p4 = pnand %p2569_p3, %p2563_p0 }
   0xa   :  { %2573 = shalt.err (!%p2570_p4)
}
   0xb   :  { %s2591_s18 = smov 128   ;;  %s2592_s19 = smov 8  }
   0xc   :  { %22 = dma.hbm_to_vmem [thread:$0]  %s4142_s0, 1536, %s17_s13, [#allocation4], %s2591_s18, %s2591_s18, %s2592_s19  }
   0xd   :  { %s2574_s22 = scalar_lea.vmem %s30_s16, 16  ;;  %p2579_p6 = scmp.lt.s32.totalorder %s30_s16, %s30_s16 }
   0xe   :  { %p2575_p5 = scmp.ne.s32.totalorder %s30_s16, %s2574_s22  ;;  %p2580_p7 = scmp.lt.s32.totalorder %s2574_s22, %s2574_s22 }
  0x10   :  { %p2581_p8 = por %p2580_p7, %p2579_p6 }
  0x12   :  { %p2582_p9 = pnand %p2581_p8, %p2575_p5 }
  0x14   :  { %2585 = shalt.err (!%p2582_p9)
}
  0x15   :  { %s2593_s1 = smov [#allocation6]  }
  0x16   :  { %32 = dma.vmem_to_smem %s30_s16, 16, %s2593_s1, [#allocation5]  }
  0x17   :  { %2586 = dma.done.wait [#allocation4], 1536  }
  0x18   :  { %2587 = vsyncadd [#allocation4], 4294965760 }
  0x19   :  { %2588 = dma.done.wait [#allocation5], 16  }
  0x1a   :  { %2589 = vsyncadd [#allocation5], 4294967280 }
  0x1b   :  { %41 = sfence }
  0x1c   :  { %s2400_s23 = sld [smem:[#allocation6 + $0x1]]  ;;  %v2624_v0 = vld [vmem:[#allocation3] sm:$0xff]  ;;  %v2626_v1 = vld [vmem:[#allocation3 + $0x8] sm:$0xff]  ;;  %s2594_s27 = smov 127   ;;  %vm72_vm0 = vcmask 1045504   ;;  %vm86_vm1 = vcmask 1044480  }
  0x1d   :  { %s2401_s24 = sld [smem:[#allocation6 + $0x6]]  ;;  %vm58_vm2 = vcmask 1046528   ;;  %vm100_vm3 = vcmask 1043456   ;;  %s2595_s9 = smov 126   ;;  %vm1214_vm4 = vcmask 97280   ;;  %vm1216_vm5 = vcmask 93184  }
  0x1e   :  { %s2402_s25 = sld [smem:[#allocation6 + $0xb]] }
  0x1f   :  { %s2403_s26 = sld [smem:[#allocation6 + $0x10]] }
  0x20   :  { %s2404_s0 = sld [smem:[#allocation6 + $0x15]] }
  0x21   :  { %s2636_s28 = sld [smem:[#allocation6 + $0x7]] }
  0x22   :  { %v109_v2 = vstv %s2400_s23  ;;  %s2641_s29 = sld [smem:[#allocation6 + $0xc]] }
  0x23   :  { %v110_v3 = vmul.f32 %v109_v2, %v2624_v0  ;;  %v123_v4 = vstv %s2401_s24  ;;  %v111_v7 = vmul.f32 %v109_v2, %v2626_v1  ;;  %s2646_s30 = sld [smem:[#allocation6 + $0x2]] }
  0x24   :  { %v125_v5 = vmul.f32 %v123_v4, %v2626_v1  ;;  %v140_v6 = vstv %s2402_s25  ;;  %v124_v17 = vmul.f32 %v123_v4, %v2624_v0  ;;  %s2650_s4 = sld [smem:[#allocation6 + $0x11]] }
  0x25   :  { %114 = vrot.lane.b32.xlu0 %v110_v3, %s2594_s27  ;;  %v142_v8 = vmul.f32 %v140_v6, %v2626_v1  ;;  %v141_v9 = vmul.f32 %v140_v6, %v2624_v0  ;;  %v157_v10 = vstv %s2403_s26  ;;  %s2653_s5 = sld [smem:[#allocation6 + $0x16]] }
  0x26   :  { %v129_v11 = vrot.slane %v125_v5, 1  ;;  %v159_v12 = vmul.f32 %v157_v10, %v2626_v1  ;;  %v158_v13 = vmul.f32 %v157_v10, %v2624_v0  ;;  %v174_v16 = vstv %s2404_s0  ;;  %s2656_s6 = sld [smem:[#allocation6 + $0xe]]  ;;  %s2597_s0 = smov 124  }
  0x27   :  { %v146_v14 = vrot.slane %v142_v8, 2  ;;  %v145_v15 = vrot.slane %v141_v9, 2  ;;  %v175_v21 = vmul.f32 %v174_v16, %v2624_v0  ;;  %v176_v22 = vmul.f32 %v174_v16, %v2626_v1  ;;  %s2659_s7 = sld [smem:[#allocation6 + $0x13]] }
  0x28   :  { %133 = vrot.lane.b32.xlu1 %v129_v11, %s2594_s27  ;;  %v163_v18 = vrot.slane %v159_v12, 3  ;;  %v162_v20 = vrot.slane %v158_v13, 3  ;;  %v128_v23 = vrot.slane %v124_v17, 1  ;;  %v205_v27 = vstv %s2636_s28  ;;  %s2664_s8 = sld [smem:[#allocation6 + $0x18]] }
  0x29   :  { %116 = vrot.lane.b32.xlu0 %v111_v7, %s2594_s27  ;;  %v147_v19 = vsel %vm72_vm0, %v145_v15, %v146_v14  ;;  %v179_v25 = vrot.slane %v175_v21, 4  ;;  %v180_v26 = vrot.slane %v176_v22, 4  ;;  %v222_v29 = vstv %s2641_s29  ;;  %s2680_s10 = sld [smem:[#allocation6 + $0x8]] }
  0x2a   :  { %v164_v24 = vsel %vm86_vm1, %v162_v20, %v163_v18  ;;  %v130_v28 = vsel %vm58_vm2, %v128_v23, %v129_v11  ;;  %v191_v31 = vstv %s2646_s30  ;;  %v206_v32 = vmul.f32 %v205_v27, %v2624_v0  ;;  %s2700_s11 = sld [smem:[#allocation6 + $0xd]] }
  0x2b   :  { %v181_v30 = vsel %vm100_vm3, %v179_v25, %v180_v26  ;;  %v207_v33 = vmul.f32 %v205_v27, %v2626_v1  ;;  %v223_v34 = vmul.f32 %v222_v29, %v2624_v0  ;;  %v192_v35 = vmul.f32 %v191_v31, %v2624_v0  ;;  %s2706_s12 = sld [smem:[#allocation6 + $0x3]] }
  0x2c   :  { %150 = vrot.lane.b32.xlu1 %v146_v14, %s2594_s27  ;;  %v224_v36 = vmul.f32 %v222_v29, %v2626_v1  ;;  %v210_v37 = vrot.slane %v206_v32, 1  ;;  %v239_v39 = vstv %s2650_s4  ;;  %v193_v40 = vmul.f32 %v191_v31, %v2626_v1  ;;  %s2711_s13 = sld [smem:[#allocation6 + $0x12]] }
  0x2d   :  { %148 = vrot.lane.b32.xlu0 %v147_v19, %s2594_s27  ;;  %v211_v38 = vrot.slane %v207_v33, 1  ;;  %v227_v41 = vrot.slane %v223_v34, 2  ;;  %v256_v42 = vstv %s2653_s5  ;;  %v386_v44 = vstv %s2656_s6  ;;  %s2724_s14 = sld [smem:[#allocation6 + $0x5]] }
  0x2e   :  { %v228_v43 = vrot.slane %v224_v36, 2  ;;  %v403_v45 = vstv %s2659_s7  ;;  %v420_v46 = vstv %s2664_s8  ;;  %v240_v48 = vmul.f32 %v239_v39, %v2624_v0  ;;  %s2727_s15 = sld [smem:[#allocation6 + $0x17]] }
  0x2f   :  { %v212_v47 = vsel %vm58_vm2, %v210_v37, %v211_v38  ;;  %v241_v49 = vmul.f32 %v239_v39, %v2626_v1  ;;  %v387_v50 = vmul.f32 %v386_v44, %v2624_v0  ;;  %v2690_v51 = vmul.f32 %v386_v44, %v2626_v1  ;;  %s2736_s16 = sld [smem:[#allocation6 + $0xa]] }
  0x30   :  { %167 = vrot.lane.b32.xlu1 %v163_v18, %s2594_s27  ;;  %v404_v52 = vmul.f32 %v403_v45, %v2624_v0  ;;  %v2694_v53 = vmul.f32 %v403_v45, %v2626_v1  ;;  %v421_v54 = vmul.f32 %v420_v46, %v2624_v0  ;;  %v257_v55 = vmul.f32 %v256_v42, %v2624_v0  ;;  %s2739_s17 = sld [smem:[#allocation6]] }
  0x31   :  { %165 = vrot.lane.b32.xlu0 %v164_v24, %s2594_s27  ;;  %v258_v56 = vmul.f32 %v256_v42, %v2626_v1  ;;  %v391_v57 = vrot.slane %v387_v50, 2  ;;  %v2703_v58 = vmul.f32 %v420_v46, %v2626_v1  ;;  %v392_v59 = vrot.slane %v2690_v51, 2  ;;  %s2741_s18 = sld [smem:[#allocation6 + $0xf]] }
  0x32   :  { %v408_v60 = vrot.slane %v404_v52, 3  ;;  %v409_v61 = vrot.slane %v2694_v53, 3  ;;  %v425_v62 = vrot.slane %v421_v54, 4  ;;  %v229_v63 = vsel %vm72_vm0, %v227_v41, %v228_v43  ;;  %s2749_s19 = sld [smem:[#allocation6 + $0x14]] }
  0x33   :  { %v244_v2 = vrot.slane %v240_v48, 3  ;;  %v245_v3 = vrot.slane %v241_v49, 3  ;;  %v426_v4 = vrot.slane %v2703_v58, 4  ;;  %v2717_v5 = vsel %vm72_vm0, %v391_v57, %v392_v59  ;;  %s2791_s22 = sld [smem:[#allocation6 + $0x9]] }
  0x34   :  { %131 = vrot.lane.b32.xlu1 %v130_v28, %s2594_s27  ;;  %v2722_v6 = vsel %vm86_vm1, %v408_v60, %v409_v61  ;;  %v287_v8 = vstv %s2680_s10  ;;  %v261_v10 = vrot.slane %v257_v55, 4  ;;  %v262_v11 = vrot.slane %v258_v56, 4  ;;  %s2815_s1 = sld [smem:[#allocation6 + $0x4]] }
  0x35   :  { %182 = vrot.lane.b32.xlu0 %v181_v30, %s2594_s27  ;;  %v2732_v7 = vsel %vm100_vm3, %v425_v62, %v426_v4  ;;  %v246_v9 = vsel %vm86_vm1, %v244_v2, %v245_v3  ;;  %v288_v12 = vmul.f32 %v287_v8, %v2624_v0  ;;  %v2746_v13 = vmul.f32 %v287_v8, %v2626_v1  ;;  %s2442_s23 = sld [smem:[#allocation6 + $0x27]] }
  0x36   :  { %v304_v14 = vstv %s2700_s11  ;;  %v263_v15 = vsel %vm100_vm3, %v261_v10, %v262_v11  ;;  %v273_v16 = vstv %s2706_s12  ;;  %v321_v19 = vstv %s2711_s13  ;;  %s2829_s24 = sld [smem:[#allocation6 + $0x2c]] }
  0x37   :  { %v305_v17 = vmul.f32 %v304_v14, %v2624_v0  ;;  %v2756_v18 = vmul.f32 %v304_v14, %v2626_v1  ;;  %v53_v20 = vstv %s2724_s14  ;;  %v292_v21 = vrot.slane %v288_v12, 1  ;;  %s2444_s25 = sld [smem:[#allocation6 + $0x31]] }
  0x38   :  { %184 = vrot.lane.b32.xlu1 %v180_v26, %s2594_s27  ;;  %v293_v22 = vrot.slane %v2746_v13, 1  ;;  %v2765_v23 = vstv %s4144_s2  ;;  %v274_v24 = vmul.f32 %v273_v16, %v2624_v0  ;;  %v275_v25 = vmul.f32 %v273_v16, %v2626_v1  ;;  %s2596_s2 = smov 125   ;;  %s2853_s26 = sld [smem:[#allocation6 + $0x1f]] }
  0x39   :  { %196 = vrot.lane.b32.xlu0 %v192_v35, %s2595_s9  ;;  %v2771_v26 = vmul.f32 %v53_v20, %v2626_v1  ;;  %v67_v27 = vstv %s2736_s16  ;;  %v322_v28 = vmul.f32 %v321_v19, %v2624_v0  ;;  %v323_v29 = vmul.f32 %v321_v19, %v2626_v1  ;;  %s2867_s28 = sld [smem:[#allocation6 + $0x1a]] }
  0x3a   :  { %v47_v30 = vstv %s2739_s17  ;;  %v2778_v31 = vmul.f32 %v67_v27, %v2626_v1  ;;  %v309_v32 = vrot.slane %v305_v17, 2  ;;  %v310_v33 = vrot.slane %v2756_v18, 2  ;;  %s2421_s29 = sld [smem:[#allocation6 + $0x1e]] }
  0x3b   :  { %v338_v34 = vstv %s2727_s15  ;;  %v81_v35 = vstv %s2741_s18  ;;  %v294_v36 = vsel %vm58_vm2, %v292_v21, %v293_v22  ;;  %v60_v37 = vrot.slane %v2771_v26, 1  ;;  %s2422_s30 = sld [smem:[#allocation6 + $0x23]] }
  0x3c   :  { %198 = vrot.lane.b32.xlu1 %v193_v40, %s2595_s9  ;;  %v95_v39 = vstv %s2749_s19  ;;  %v74_v40 = vrot.slane %v2778_v31, 2  ;;  %v48_v42 = vmul.f32 %v47_v30, %v2624_v0  ;;  %v68_v45 = vmul.f32 %v67_v27, %v2624_v0  ;;  %s2888_s4 = sld [smem:[#allocation6 + $0x24]] }
  0x3d   :  { %213 = vrot.lane.b32.xlu0 %v212_v47, %s2595_s9  ;;  %v2795_v41 = vmul.f32 %v95_v39, %v2626_v1  ;;  %v82_v46 = vmul.f32 %v81_v35, %v2624_v0  ;;  %v96_v47 = vmul.f32 %v95_v39, %v2624_v0  ;;  %v326_v48 = vrot.slane %v322_v28, 3  ;;  %s2890_s5 = sld [smem:[#allocation6 + $0x29]] }
  0x3e   :  { %v50_v50 = vadd.f32 %v48_v42, %v2765_v23  ;;  %v327_v54 = vrot.slane %v323_v29, 3  ;;  %v73_v55 = vrot.slane %v68_v45, 2  ;;  %v311_v60 = vsel %vm72_vm0, %v309_v32, %v310_v33  ;;  %v2845_v29 = vld [vmem:[#allocation3 + $0x18] sm:$0xff]  ;;  %s2423_s6 = sld [smem:[#allocation6 + $0x28]] }
  0x3f   :  { %v102_v49 = vrot.slane %v2795_v41, 4  ;;  %v87_v56 = vrot.slane %v82_v46, 3  ;;  %v101_v57 = vrot.slane %v96_v47, 4  ;;  %v339_v62 = vmul.f32 %v338_v34, %v2624_v0  ;;  %s2896_s7 = sld [smem:[#allocation6 + $0x2d]] }
  0x40   :  { %215 = vrot.lane.b32.xlu1 %v211_v38, %s2595_s9  ;;  %v2787_v38 = vmul.f32 %v81_v35, %v2626_v1  ;;  %v75_v8 = vsel %vm72_vm0, %v73_v55, %v74_v40  ;;  %v369_v12 = vstv %s2791_s22  ;;  %v328_v13 = vsel %vm86_vm1, %v326_v48, %v327_v54  ;;  %s2908_s8 = sld [smem:[#allocation6 + $0x2e]] }
  0x41   :  { %230 = vrot.lane.b32.xlu0 %v229_v63, %s2595_s9  ;;  %v340_v63 = vmul.f32 %v338_v34, %v2626_v1  ;;  %v103_v10 = vsel %vm100_vm3, %v101_v57, %v102_v49  ;;  %v343_v14 = vrot.slane %v339_v62, 4  ;;  %v370_v18 = vmul.f32 %v369_v12, %v2624_v0  ;;  %s2431_s10 = sld [smem:[#allocation6 + $0x20]] }
  0x42   :  { %v88_v44 = vrot.slane %v2787_v38, 3  ;;  %v371_v19 = vmul.f32 %v369_v12, %v2626_v1  ;;  %v355_v21 = vstv %s2815_s1  ;;  %v792_v34 = vstv %s2829_s24  ;;  %s2430_s11 = sld [smem:[#allocation6 + $0x1b]] }
  0x43   :  { %v374_v27 = vrot.slane %v370_v18, 1  ;;  %v809_v35 = vstv %s2444_s25  ;;  %v498_v62 = vstv %s2867_s28  ;;  %s2432_s12 = sld [smem:[#allocation6 + $0x25]] }
  0x44   :  { %232 = vrot.lane.b32.xlu1 %v228_v43, %s2595_s9  ;;  %v54_v43 = vmul.f32 %v53_v20, %v2624_v0  ;;  %v375_v28 = vrot.slane %v371_v19, 1  ;;  %v2863_v46 = vmul.f32 %v809_v35, %v2845_v29  ;;  %s2433_s13 = sld [smem:[#allocation6 + $0x2a]] }
  0x45   :  { %247 = vrot.lane.b32.xlu0 %v246_v9, %s2595_s9  ;;  %v89_v9 = vsel %vm86_vm1, %v87_v56, %v88_v44  ;;  %s2434_s14 = sld [smem:[#allocation6 + $0x2f]] }
  0x46   :  { %v59_v52 = vrot.slane %v54_v43, 1  ;;  %v2859_v43 = vmul.f32 %v792_v34, %v2845_v29  ;;  %v376_v47 = vsel %vm58_vm2, %v374_v27, %v375_v28  ;;  %v815_v55 = vrot.slane %v2863_v46, 4  ;;  %s2436_s15 = sld [smem:[#allocation6 + $0x21]] }
  0x47   :  { %s2994_s16 = sld [smem:[#allocation6 + $0x1c]] }
  0x48   :  { %249 = vrot.lane.b32.xlu1 %v245_v3, %s2595_s9  ;;  %v61_v2 = vsel %vm58_vm2, %v59_v52, %v60_v37  ;;  %v798_v52 = vrot.slane %v2859_v43, 3  ;;  %s2437_s18 = sld [smem:[#allocation6 + $0x26]] }
  0x49   :  { %264 = vrot.lane.b32.xlu0 %v263_v15, %s2595_s9  ;;  %v64_v3 = vadd.f32 %v61_v2, %v50_v50  ;;  %v344_v15 = vrot.slane %v340_v63, 4  ;;  %s2438_s19 = sld [smem:[#allocation6 + $0x2b]] }
  0x4a   :  { %s2439_s20 = sld [smem:[#allocation6 + $0x30]] }
  0x4b   :  { %v345_v20 = vsel %vm100_vm3, %v343_v14, %v344_v15  ;;  %s2441_s21 = sld [smem:[#allocation6 + $0x22]] }
  0x4c   :  { %266 = vrot.lane.b32.xlu1 %v262_v11, %s2595_s9  ;;  %v78_v11 = vadd.f32 %v75_v8, %v64_v3  ;;  %v446_v3 = vstv %s2421_s29  ;;  %v459_v8 = vstv %s2422_s30  ;;  %s3034_s22 = sld [smem:[#allocation6 + $0x1d]] }
  0x4d   :  { %278 = vrot.lane.b32.xlu0 %v274_v24, %s2596_s2  ;;  %v2841_v24 = vld [vmem:[#allocation3 + $0x10] sm:$0xff]  ;;  %v2917_v51 = vmul.f32 %v459_v8, %v2845_v29  ;;  %s2451_s17 = sld [smem:[#allocation6 + $0x38]] }
  0x4e   :  { %v92_v16 = vadd.f32 %v89_v9, %v78_v11  ;;  %v793_v42 = vmul.f32 %v792_v34, %v2841_v24  ;;  %v810_v45 = vmul.f32 %v809_v35, %v2841_v24  ;;  %v499_v9 = vmul.f32 %v498_v62, %v2841_v24  ;;  %s3080_s1 = sld [smem:[#allocation6 + $0x33]] }
  0x4f   :  { %v2912_v11 = vmul.f32 %v446_v3, %v2845_v29  ;;  %v460_v14 = vmul.f32 %v459_v8, %v2841_v24  ;;  %v465_v19 = vrot.slane %v2917_v51, 2  ;;  %v500_v35 = vmul.f32 %v498_v62, %v2845_v29  ;;  %s3091_s24 = sld [smem:[#allocation6 + $0x42]] }
  0x50   :  { %280 = vrot.lane.b32.xlu1 %v275_v25, %s2596_s2  ;;  %v2833_v17 = vadd.f32 %v103_v10, %v92_v16  ;;  %v356_v25 = vmul.f32 %v355_v21, %v2624_v0  ;;  %v797_v48 = vrot.slane %v793_v42, 3  ;;  %v529_v10 = vstv %s2888_s4  ;;  %s3108_s25 = sld [smem:[#allocation6 + $0x47]] }
  0x51   :  { %295 = vrot.lane.b32.xlu0 %v294_v36, %s2596_s2  ;;  %v357_v36 = vmul.f32 %v355_v21, %v2626_v1  ;;  %v472_v16 = vstv %s2423_s6  ;;  %v464_v18 = vrot.slane %v460_v14, 2  ;;  %v580_v14 = vstv %s2430_s11  ;;  %s3145_s28 = sld [smem:[#allocation6 + $0x34]] }
  0x52   :  { %v2880_v56 = vsel %vm86_vm1, %v797_v48, %v798_v52  ;;  %v2926_v21 = vmul.f32 %v472_v16, %v2845_v29  ;;  %s3150_s29 = sld [smem:[#allocation6 + $0x3e]] }
  0x53   :  { %v2941_v27 = vsel %vm72_vm0, %v464_v18, %v465_v19  ;;  %v581_v18 = vmul.f32 %v580_v14, %v2841_v24  ;;  %v901_v41 = vstv %s2451_s17  ;;  %s3161_s30 = sld [smem:[#allocation6 + $0x43]] }
  0x54   :  { %297 = vrot.lane.b32.xlu1 %v293_v22, %s2596_s2  ;;  %v775_v22 = vstv %s2442_s23  ;;  %s3086_s23 = sld [smem:[#allocation6 + $0x3d]] }
  0x55   :  { %312 = vrot.lane.b32.xlu0 %v311_v60, %s2596_s2  ;;  %v776_v32 = vmul.f32 %v775_v22, %v2841_v24  ;;  %v512_v60 = vstv %s2853_s26  ;;  %s3136_s26 = sld [smem:[#allocation6 + $0x39]] }
  0x56   :  { %v513_v63 = vmul.f32 %v512_v60, %v2841_v24  ;;  %v514_v2 = vmul.f32 %v512_v60, %v2845_v29  ;;  %s3172_s4 = sld [smem:[#allocation6 + $0x48]] }
  0x57   :  { %v780_v39 = vrot.slane %v776_v32, 2  ;;  %v478_v32 = vrot.slane %v2926_v21, 3  ;;  %s3188_s6 = sld [smem:[#allocation6 + $0x3a]] }
  0x58   :  { %314 = vrot.lane.b32.xlu1 %v310_v33, %s2596_s2  ;;  %v2849_v33 = vmul.f32 %v775_v22, %v2845_v29  ;;  %v517_v12 = vrot.slane %v513_v63, 1  ;;  %v530_v22 = vmul.f32 %v529_v10, %v2841_v24  ;;  %s3214_s11 = sld [smem:[#allocation6 + $0x49]] }
  0x59   :  { %329 = vrot.lane.b32.xlu0 %v328_v13, %s2596_s2  ;;  %v546_v13 = vstv %s2890_s5  ;;  %s3181_s5 = sld [smem:[#allocation6 + $0x19]] }
  0x5a   :  { %v781_v0 = vrot.slane %v2849_v33, 2  ;;  %v547_v42 = vmul.f32 %v546_v13, %v2841_v24  ;;  %s3375_s17 = sld [smem:[#allocation6 + $0x7]] }
  0x5c   :  { %331 = vrot.lane.b32.xlu1 %v327_v54, %s2596_s2  ;;  %v2872_v50 = vsel %vm72_vm0, %v780_v39, %v781_v0  ;;  %v814_v54 = vrot.slane %v810_v45, 4  ;;  %v563_v45 = vstv %s2908_s8  ;;  %s3201_s8 = sld [smem:[#allocation6 + $0x3f]] }
  0x5d   :  { %346 = vrot.lane.b32.xlu0 %v345_v20, %s2596_s2  ;;  %v473_v20 = vmul.f32 %v472_v16, %v2841_v24  ;;  %v564_v62 = vmul.f32 %v563_v45, %v2841_v24  ;;  %v565_v8 = vmul.f32 %v563_v45, %v2845_v29 }
  0x5e   :  { %v2885_v57 = vsel %vm100_vm3, %v814_v54, %v815_v55  ;;  %v534_v54 = vrot.slane %v530_v22, 2 }
  0x60   :  { %348 = vrot.lane.b32.xlu1 %v344_v15, %s2596_s2  ;;  %v452_v15 = vrot.slane %v2912_v11, 1 }
  0x61   :  { %360 = vrot.lane.b32.xlu0 %v356_v25, %s2597_s0  ;;  %v531_v25 = vmul.f32 %v529_v10, %v2845_v29  ;;  %v568_v10 = vrot.slane %v564_v62, 4 }
  0x63   :  { %v535_v58 = vrot.slane %v531_v25, 2 }
  0x64   :  { %362 = vrot.lane.b32.xlu1 %v357_v36, %s2597_s0 }
  0x65   :  { %377 = vrot.lane.b32.xlu0 %v376_v47, %s2597_s0  ;;  %v536_v63 = vsel %vm72_vm0, %v534_v54, %v535_v58  ;;  %v645_v54 = vstv %s2434_s14  ;;  %s2467_s14 = sld [smem:[#allocation6 + $0x40]] }
  0x68   :  { %379 = vrot.lane.b32.xlu1 %v375_v28, %s2597_s0  ;;  %v477_v28 = vrot.slane %v473_v20, 3  ;;  %v628_v20 = vstv %s2433_s13  ;;  %s3263_s13 = sld [smem:[#allocation6 + $0x36]] }
  0x69   :  { %394 = vrot.lane.b32.xlu0 %v2717_v5, %s2597_s0  ;;  %v447_v5 = vmul.f32 %v446_v3, %v2841_v24 }
  0x6a   :  { %v2955_v36 = vsel %vm86_vm1, %v477_v28, %v478_v32 }
  0x6c   :  { %396 = vrot.lane.b32.xlu1 %v392_v59, %s2597_s0  ;;  %v518_v59 = vrot.slane %v514_v2, 1  ;;  %v551_v2 = vrot.slane %v547_v42, 3 }
  0x6d   :  { %411 = vrot.lane.b32.xlu0 %v2722_v6, %s2597_s0  ;;  %v451_v6 = vrot.slane %v447_v5, 1  ;;  %v569_v5 = vrot.slane %v565_v8, 4 }
  0x6e   :  { %v519_v48 = vsel %vm58_vm2, %v517_v12, %v518_v59  ;;  %v594_v12 = vstv %s2431_s10  ;;  %s3207_s10 = sld [smem:[#allocation6 + $0x44]] }
  0x6f   :  { %v2935_v53 = vsel %vm58_vm2, %v451_v6, %v452_v15  ;;  %v595_v6 = vmul.f32 %v594_v12, %v2841_v24  ;;  %v596_v16 = vmul.f32 %v594_v12, %v2845_v29 }
  0x70   :  { %413 = vrot.lane.b32.xlu1 %v409_v61, %s2597_s0  ;;  %v485_v61 = vstv %s2896_s7  ;;  %s3199_s7 = sld [smem:[#allocation6 + $0x35]] }
  0x71   :  { %428 = vrot.lane.b32.xlu0 %v2732_v7, %s2597_s0  ;;  %v486_v7 = vmul.f32 %v485_v61, %v2841_v24  ;;  %v2946_v34 = vmul.f32 %v485_v61, %v2845_v29  ;;  %v599_v22 = vrot.slane %v595_v6, 1  ;;  %v600_v25 = vrot.slane %v596_v16, 1 }
  0x72   :  { %v693_v6 = vstv %s2437_s18  ;;  %s2475_s18 = sld [smem:[#allocation6 + $0x6]] }
  0x73   :  { %v490_v39 = vrot.slane %v486_v7, 4  ;;  %v491_v47 = vrot.slane %v2946_v34, 4  ;;  %v582_v7 = vmul.f32 %v580_v14, %v2845_v29 }
  0x74   :  { %430 = vrot.lane.b32.xlu1 %v426_v4, %s2597_s0  ;;  %v548_v4 = vmul.f32 %v546_v13, %v2845_v29  ;;  %v570_v13 = vsel %vm100_vm3, %v568_v10, %v569_v5  ;;  %v676_v10 = vstv %s2436_s15  ;;  %s2468_s15 = sld [smem:[#allocation6 + $0x45]] }
  0x75   :  { %503 = vrot.lane.b32.xlu0 %v499_v9, %s2594_s27  ;;  %v2966_v60 = vsel %vm100_vm3, %v490_v39, %v491_v47  ;;  %v601_v39 = vsel %vm58_vm2, %v599_v22, %v600_v25  ;;  %v678_v14 = vmul.f32 %v676_v10, %v2845_v29 }
  0x76   :  { %v552_v3 = vrot.slane %v548_v4, 3 }
  0x78   :  { %505 = vrot.lane.b32.xlu1 %v500_v35, %s2594_s27  ;;  %v553_v9 = vsel %vm86_vm1, %v551_v2, %v552_v3  ;;  %v629_v35 = vmul.f32 %v628_v20, %v2841_v24  ;;  %v647_v2 = vmul.f32 %v645_v54, %v2845_v29 }
  0x79   :  { %520 = vrot.lane.b32.xlu0 %v519_v48, %s2594_s27  ;;  %v630_v48 = vmul.f32 %v628_v20, %v2845_v29 }
  0x7b   :  { %v634_v62 = vrot.slane %v630_v48, 3 }
  0x7c   :  { %522 = vrot.lane.b32.xlu1 %v518_v59, %s2594_s27  ;;  %v611_v59 = vstv %s2432_s12  ;;  %s2466_s12 = sld [smem:[#allocation6 + $0x3b]] }
  0x7d   :  { %537 = vrot.lane.b32.xlu0 %v536_v63, %s2594_s27  ;;  %v612_v61 = vmul.f32 %v611_v59, %v2841_v24  ;;  %v613_v28 = vmul.f32 %v611_v59, %v2845_v29  ;;  %v646_v63 = vmul.f32 %v645_v54, %v2841_v24 }
  0x7f   :  { %v616_v42 = vrot.slane %v612_v61, 2  ;;  %v617_v45 = vrot.slane %v613_v28, 2  ;;  %v650_v8 = vrot.slane %v646_v63, 4  ;;  %v695_v61 = vmul.f32 %v693_v6, %v2845_v29 }
  0x80   :  { %539 = vrot.lane.b32.xlu1 %v535_v58, %s2594_s27  ;;  %v633_v58 = vrot.slane %v629_v35, 3  ;;  %v710_v28 = vstv %s2438_s19  ;;  %s3312_s19 = sld [smem:[#allocation6 + $0x1]] }
  0x81   :  { %554 = vrot.lane.b32.xlu0 %v553_v9, %s2594_s27  ;;  %v618_v4 = vsel %vm72_vm0, %v616_v42, %v617_v45  ;;  %v651_v9 = vrot.slane %v647_v2, 4  ;;  %v699_v54 = vrot.slane %v695_v61, 2  ;;  %v758_v61 = vstv %s2441_s21  ;;  %s3333_s21 = sld [smem:[#allocation6 + $0x10]] }
  0x83   :  { %v652_v12 = vsel %vm100_vm3, %v650_v8, %v651_v9 }
  0x84   :  { %556 = vrot.lane.b32.xlu1 %v552_v3, %s2594_s27  ;;  %v635_v3 = vsel %vm86_vm1, %v633_v58, %v634_v62  ;;  %v712_v58 = vmul.f32 %v710_v28, %v2845_v29 }
  0x85   :  { %571 = vrot.lane.b32.xlu0 %v570_v13, %s2594_s27  ;;  %v677_v13 = vmul.f32 %v676_v10, %v2841_v24 }
  0x86   :  { %v716_v8 = vrot.slane %v712_v58, 3 }
  0x87   :  { %v681_v22 = vrot.slane %v677_v13, 1 }
  0x88   :  { %573 = vrot.lane.b32.xlu1 %v569_v5, %s2594_s27  ;;  %v662_v5 = vstv %s2994_s16  ;;  %s3287_s16 = sld [smem:[#allocation6 + $0x4a]] }
  0x89   :  { %585 = vrot.lane.b32.xlu0 %v581_v18, %s2595_s9  ;;  %v663_v59 = vmul.f32 %v662_v5, %v2841_v24  ;;  %v694_v18 = vmul.f32 %v693_v6, %v2841_v24  ;;  %v664_v35 = vmul.f32 %v662_v5, %v2845_v29  ;;  %v49_v5 = vmul.f32 %v47_v30, %v2626_v1 }
  0x8a   :  { %v744_v30 = vstv %s3034_s22  ;;  %s3344_s22 = sld [smem:[#allocation6 + $0x15]] }
  0x8b   :  { %v698_v48 = vrot.slane %v694_v18, 2  ;;  %v51_v18 = vadd.f32 %v49_v5, %v2765_v23  ;;  %v746_v26 = vmul.f32 %v744_v30, %v2845_v29 }
  0x8c   :  { %587 = vrot.lane.b32.xlu1 %v582_v7, %s2595_s9 }
  0x8d   :  { %602 = vrot.lane.b32.xlu0 %v601_v39, %s2595_s9  ;;  %v711_v39 = vmul.f32 %v710_v28, %v2841_v24 }
  0x8f   :  { %v715_v63 = vrot.slane %v711_v39, 3  ;;  %v65_v39 = vadd.f32 %v60_v37, %v51_v18 }
  0x90   :  { %604 = vrot.lane.b32.xlu1 %v600_v25, %s2595_s9  ;;  %v682_v25 = vrot.slane %v678_v14, 1 }
  0x91   :  { %619 = vrot.lane.b32.xlu0 %v618_v4, %s2595_s9  ;;  %v717_v14 = vsel %vm86_vm1, %v715_v63, %v716_v8  ;;  %v79_v63 = vadd.f32 %v74_v40, %v65_v39 }
  0x94   :  { %621 = vrot.lane.b32.xlu1 %v617_v45, %s2595_s9  ;;  %v683_v45 = vsel %vm58_vm2, %v681_v22, %v682_v25 }
  0x95   :  { %636 = vrot.lane.b32.xlu0 %v635_v3, %s2595_s9  ;;  %v700_v3 = vsel %vm72_vm0, %v698_v48, %v699_v54  ;;  %v745_v48 = vmul.f32 %v744_v30, %v2841_v24  ;;  %v918_v30 = vstv %s3086_s23  ;;  %s3387_s23 = sld [smem:[#allocation6 + $0xc]] }
  0x97   :  { %v3008_v16 = vpop.permute.xlu0 %114 }
  0x98   :  { %638 = vrot.lane.b32.xlu1 %v634_v62, %s2595_s9  ;;  %v727_v62 = vstv %s2439_s20  ;;  %v120_v31 = vadd.f32 %v3008_v16, %v2833_v17  ;;  %v3095_v17 = vld [vmem:[#allocation3 + $0x20] sm:$0xff]  ;;  %s3318_s20 = sld [smem:[#allocation6 + $0xb]] }
  0x99   :  { %653 = vrot.lane.b32.xlu0 %v652_v12, %s2595_s9  ;;  %v729_v10 = vmul.f32 %v727_v62, %v2845_v29 }
  0x9a   :  { %v3014_v20 = vpop.permute.xlu1 %133 }
  0x9b   :  { %v3017_v7 = vpop.permute.xlu0 %116 }
  0x9c   :  { %655 = vrot.lane.b32.xlu1 %v651_v9, %s2595_s9  ;;  %v728_v9 = vmul.f32 %v727_v62, %v2841_v24 }
  0x9d   :  { %667 = vrot.lane.b32.xlu0 %v663_v59, %s2596_s2  ;;  %v733_v59 = vrot.slane %v729_v10, 4 }
  0x9e   :  { %v3023_v42 = vpop.permute.xlu1 %150  ;;  %v732_v6 = vrot.slane %v728_v9, 4  ;;  %v93_v9 = vadd.f32 %v88_v44, %v79_v63 }
  0x9f   :  { %v149_v4 = vpop.permute.xlu0 %148 }
  0xa0   :  { %669 = vrot.lane.b32.xlu1 %v664_v35, %s2596_s2  ;;  %v734_v1 = vsel %vm100_vm3, %v732_v6, %v733_v59  ;;  %v760_v35 = vmul.f32 %v758_v61, %v2845_v29 }
  0xa1   :  { %684 = vrot.lane.b32.xlu0 %v683_v45, %s2596_s2 }
  0xa2   :  { %v3029_v2 = vpop.permute.xlu1 %167  ;;  %v764_v62 = vrot.slane %v760_v35, 1 }
  0xa3   :  { %v166_v12 = vpop.permute.xlu0 %165 }
  0xa4   :  { %686 = vrot.lane.b32.xlu1 %v682_v25, %s2596_s2  ;;  %v759_v25 = vmul.f32 %v758_v61, %v2841_v24 }
  0xa5   :  { %701 = vrot.lane.b32.xlu0 %v700_v3, %s2596_s2 }
  0xa6   :  { %v132_v13 = vpop.permute.xlu1 %131  ;;  %v763_v58 = vrot.slane %v759_v25, 1 }
  0xa7   :  { %v183_v22 = vpop.permute.xlu0 %182  ;;  %v137_v40 = vadd.f32 %v132_v13, %v120_v31  ;;  %v3100_v13 = vld [vmem:[#allocation3 + $0x28] sm:$0xff] }
  0xa8   :  { %703 = vrot.lane.b32.xlu1 %v699_v54, %s2596_s2  ;;  %v903_v18 = vmul.f32 %v901_v41, %v3100_v13  ;;  %v920_v39 = vmul.f32 %v918_v30, %v3100_v13 }
  0xa9   :  { %718 = vrot.lane.b32.xlu0 %v717_v14, %s2596_s2  ;;  %v107_v14 = vadd.f32 %v102_v49, %v93_v9  ;;  %v154_v38 = vadd.f32 %v149_v4, %v137_v40 }
  0xaa   :  { %v3045_v28 = vpop.permute.xlu1 %184  ;;  %v907_v35 = vrot.slane %v903_v18, 1 }
  0xab   :  { %v3053_v45 = vpop.permute.xlu0 %196  ;;  %v121_v49 = vadd.f32 %v3017_v7, %v107_v14  ;;  %v171_v4 = vadd.f32 %v166_v12, %v154_v38  ;;  %v887_v7 = vstv %s3080_s1  ;;  %s3382_s1 = sld [smem:[#allocation6 + $0x2]] }
  0xac   :  { %720 = vrot.lane.b32.xlu1 %v716_v8, %s2596_s2  ;;  %v765_v8 = vsel %vm58_vm2, %v763_v58, %v764_v62  ;;  %v888_v33 = vmul.f32 %v887_v7, %v3095_v17  ;;  %v952_v58 = vstv %s3108_s25  ;;  %s3418_s25 = sld [smem:[#allocation6 + $0x16]] }
  0xad   :  { %735 = vrot.lane.b32.xlu0 %v734_v1, %s2596_s2  ;;  %v138_v61 = vadd.f32 %v3014_v20, %v121_v49  ;;  %v188_v12 = vadd.f32 %v183_v22, %v171_v4  ;;  %v919_v20 = vmul.f32 %v918_v30, %v3095_v17  ;;  %v953_v40 = vmul.f32 %v952_v58, %v3095_v17 }
  0xae   :  { %v3058_v54 = vpop.permute.xlu1 %198 }
  0xaf   :  { %v3062_v3 = vpop.permute.xlu0 %213  ;;  %v957_v30 = vrot.slane %v953_v40, 4 }
  0xb0   :  { %737 = vrot.lane.b32.xlu1 %v733_v59, %s2596_s2 }
  0xb1   :  { %749 = vrot.lane.b32.xlu0 %v745_v48, %s2597_s0  ;;  %v155_v48 = vadd.f32 %v3023_v42, %v138_v61 }
  0xb2   :  { %v3067_v37 = vpop.permute.xlu1 %215 }
  0xb3   :  { %v3072_v10 = vpop.permute.xlu0 %230  ;;  %v172_v46 = vadd.f32 %v3029_v2, %v155_v48  ;;  %v954_v2 = vmul.f32 %v952_v58, %v3100_v13 }
  0xb4   :  { %751 = vrot.lane.b32.xlu1 %v746_v26, %s2597_s0  ;;  %v923_v26 = vrot.slane %v919_v20, 2 }
  0xb5   :  { %766 = vrot.lane.b32.xlu0 %v765_v8, %s2597_s0  ;;  %v924_v8 = vrot.slane %v920_v39, 2  ;;  %v189_v9 = vadd.f32 %v3045_v28, %v172_v46  ;;  %v1000_v39 = vstv %s3150_s29  ;;  %s3456_s29 = sld [smem:[#allocation6 + $0x3]] }
  0xb6   :  { %v3078_v5 = vpop.permute.xlu1 %232  ;;  %v1001_v58 = vmul.f32 %v1000_v39, %v3095_v17 }
  0xb7   :  { %v3084_v6 = vpop.permute.xlu0 %247  ;;  %v925_v38 = vsel %vm72_vm0, %v923_v26, %v924_v8  ;;  %v203_v28 = vadd.f32 %v3058_v54, %v189_v9 }
  0xb8   :  { %768 = vrot.lane.b32.xlu1 %v764_v62, %s2597_s0  ;;  %v202_v62 = vadd.f32 %v3053_v45, %v188_v12  ;;  %v1005_v40 = vrot.slane %v1001_v58, 2 }
  0xb9   :  { %783 = vrot.lane.b32.xlu0 %v2872_v50, %s2597_s0  ;;  %v902_v50 = vmul.f32 %v901_v41, %v3095_v17  ;;  %v220_v4 = vadd.f32 %v3067_v37, %v203_v28 }
  0xba   :  { %v3093_v44 = vpop.permute.xlu1 %249  ;;  %v219_v45 = vadd.f32 %v3062_v3, %v202_v62  ;;  %v983_v3 = vstv %s3136_s26  ;;  %v1002_v62 = vmul.f32 %v1000_v39, %v3100_v13  ;;  %s3440_s26 = sld [smem:[#allocation6 + $0x8]] }
  0xbb   :  { %v3098_v16 = vpop.permute.xlu0 %264  ;;  %v237_v54 = vadd.f32 %v3078_v5, %v220_v4  ;;  %v984_v37 = vmul.f32 %v983_v3, %v3095_v17  ;;  %v985_v12 = vmul.f32 %v983_v3, %v3100_v13  ;;  %v440_v3 = vstv %s3181_s5  ;;  %s3470_s5 = sld [smem:[#allocation6 + $0x3c]] }
  0xbc   :  { %785 = vrot.lane.b32.xlu1 %v781_v0, %s2597_s0  ;;  %v906_v0 = vrot.slane %v902_v50, 1  ;;  %v236_v50 = vadd.f32 %v3072_v10, %v219_v45  ;;  %v1006_v45 = vrot.slane %v1002_v62, 2 }
  0xbd   :  { %800 = vrot.lane.b32.xlu0 %v2880_v56, %s2597_s0  ;;  %v935_v56 = vstv %s3091_s24  ;;  %s3398_s24 = sld [smem:[#allocation6 + $0x11]] }
  0xbe   :  { %v3110_v59 = vpop.permute.xlu1 %266  ;;  %v937_v22 = vmul.f32 %v935_v56, %v3100_v13  ;;  %v908_v42 = vsel %vm58_vm2, %v906_v0, %v907_v35  ;;  %v1007_v4 = vsel %vm72_vm0, %v1005_v40, %v1006_v45 }
  0xbf   :  { %v279_v1 = vpop.permute.xlu0 %278 }
  0xc0   :  { %802 = vrot.lane.b32.xlu1 %v798_v52, %s2597_s0  ;;  %v889_v52 = vmul.f32 %v887_v7, %v3100_v13  ;;  %v941_v41 = vrot.slane %v937_v22, 3  ;;  %v253_v7 = vadd.f32 %v3084_v6, %v236_v50  ;;  %v969_v6 = vstv %s3145_s28  ;;  %s3451_s28 = sld [smem:[#allocation6 + $0x37]] }
  0xc1   :  { %817 = vrot.lane.b32.xlu0 %v2885_v57, %s2597_s0  ;;  %v936_v57 = vmul.f32 %v935_v56, %v3095_v17  ;;  %v254_v56 = vadd.f32 %v3093_v44, %v237_v54  ;;  %v970_v44 = vmul.f32 %v969_v6, %v3095_v17 }
  0xc2   :  { %v3123_v25 = vpop.permute.xlu1 %280  ;;  %v270_v10 = vadd.f32 %v3098_v16, %v253_v7 }
  0xc3   :  { %v296_v43 = vpop.permute.xlu0 %295  ;;  %v940_v31 = vrot.slane %v936_v57, 3  ;;  %v271_v16 = vadd.f32 %v3110_v59, %v254_v56  ;;  %v988_v57 = vrot.slane %v984_v37, 1 }
  0xc4   :  { %819 = vrot.lane.b32.xlu1 %v815_v55, %s2597_s0 }
  0xc5   :  { %892 = vrot.lane.b32.xlu0 %v888_v33, %s2594_s27  ;;  %v942_v61 = vsel %vm86_vm1, %v940_v31, %v941_v41  ;;  %v958_v33 = vrot.slane %v954_v2, 4  ;;  %v285_v22 = vadd.f32 %v3123_v25, %v271_v16  ;;  %v971_v25 = vmul.f32 %v969_v6, %v3100_v13 }
  0xc6   :  { %v298_v63 = vpop.permute.xlu1 %297  ;;  %v1034_v2 = vstv %s3172_s4  ;;  %v441_v6 = vmul.f32 %v440_v3, %v2841_v24  ;;  %s3466_s4 = sld [smem:[#allocation6 + $0x32]] }
  0xc7   :  { %v313_v55 = vpop.permute.xlu0 %312  ;;  %v959_v5 = vsel %vm100_vm3, %v957_v30, %v958_v33  ;;  %v302_v26 = vadd.f32 %v298_v63, %v285_v22  ;;  %v1035_v7 = vmul.f32 %v1034_v2, %v3095_v17  ;;  %v442_v22 = vmul.f32 %v440_v3, %v2845_v29 }
  0xc8   :  { %894 = vrot.lane.b32.xlu1 %v889_v52, %s2594_s27 }
  0xc9   :  { %909 = vrot.lane.b32.xlu0 %v908_v42, %s2594_s27  ;;  %v1039_v39 = vrot.slane %v1035_v7, 4 }
  0xca   :  { %v315_v14 = vpop.permute.xlu1 %314 }
  0xcb   :  { %v330_v49 = vpop.permute.xlu0 %329  ;;  %v319_v9 = vadd.f32 %v315_v14, %v302_v26 }
  0xcc   :  { %911 = vrot.lane.b32.xlu1 %v907_v35, %s2594_s27  ;;  %v284_v35 = vadd.f32 %v279_v1, %v270_v10  ;;  %v989_v1 = vrot.slane %v985_v12, 1  ;;  %v1065_v12 = vstv %s3188_s6  ;;  %s3478_s6 = sld [smem:[#allocation6 + $0x12]] }
  0xcd   :  { %926 = vrot.lane.b32.xlu0 %v925_v38, %s2594_s27  ;;  %v1066_v24 = vmul.f32 %v1065_v12, %v3095_v17 }
  0xce   :  { %v332_v18 = vpop.permute.xlu1 %331  ;;  %v301_v52 = vadd.f32 %v296_v43, %v284_v35  ;;  %v990_v31 = vsel %vm58_vm2, %v988_v57, %v989_v1 }
  0xcf   :  { %v347_v0 = vpop.permute.xlu0 %346  ;;  %v336_v28 = vadd.f32 %v332_v18, %v319_v9  ;;  %v1070_v9 = vrot.slane %v1066_v24, 1 }
  0xd0   :  { %928 = vrot.lane.b32.xlu1 %v924_v8, %s2594_s27  ;;  %v318_v59 = vadd.f32 %v313_v55, %v301_v52  ;;  %v1017_v8 = vstv %s3161_s30  ;;  %s3463_s30 = sld [smem:[#allocation6 + $0xd]] }
  0xd1   :  { %943 = vrot.lane.b32.xlu0 %v942_v61, %s2594_s27  ;;  %v1018_v38 = vmul.f32 %v1017_v8, %v3095_v17 }
  0xd2   :  { %v349_v20 = vpop.permute.xlu1 %348  ;;  %v335_v46 = vadd.f32 %v330_v49, %v318_v59  ;;  %v1051_v59 = vstv %s3199_s7  ;;  %s3492_s7 = sld [smem:[#allocation6 + $0x17]] }
  0xd3   :  { %v361_v48 = vpop.permute.xlu0 %360  ;;  %v353_v14 = vadd.f32 %v349_v20, %v336_v28  ;;  %v1053_v28 = vmul.f32 %v1051_v59, %v3100_v13 }
  0xd4   :  { %945 = vrot.lane.b32.xlu1 %v941_v41, %s2594_s27  ;;  %v352_v55 = vadd.f32 %v347_v0, %v335_v46  ;;  %v1019_v41 = vmul.f32 %v1017_v8, %v3100_v13  ;;  %v1036_v0 = vmul.f32 %v1034_v2, %v3100_v13  ;;  %v1082_v8 = vstv %s3201_s8  ;;  %s3502_s8 = sld [smem:[#allocation6 + $0x41]] }
  0xd5   :  { %960 = vrot.lane.b32.xlu0 %v959_v5, %s2594_s27 }
  0xd6   :  { %v363_v42 = vpop.permute.xlu1 %362  ;;  %v366_v50 = vadd.f32 %v361_v48, %v352_v55  ;;  %v1023_v54 = vrot.slane %v1019_v41, 3  ;;  %v1040_v16 = vrot.slane %v1036_v0, 4 }
  0xd7   :  { %v378_v43 = vpop.permute.xlu0 %377  ;;  %v367_v18 = vadd.f32 %v363_v42, %v353_v14  ;;  %v1067_v42 = vmul.f32 %v1065_v12, %v3100_v13  ;;  %v1116_v14 = vstv %s3214_s11  ;;  %v1133_v12 = vstv %s3263_s13  ;;  %s3543_s11 = sld [smem:[#allocation6 + $0x9]] }
  0xd8   :  { %962 = vrot.lane.b32.xlu1 %v958_v33, %s2594_s27  ;;  %v383_v61 = vadd.f32 %v378_v43, %v366_v50  ;;  %v1022_v33 = vrot.slane %v1018_v38, 3  ;;  %v1041_v62 = vsel %vm100_vm3, %v1039_v39, %v1040_v16  ;;  %v1084_v38 = vmul.f32 %v1082_v8, %v3100_v13  ;;  %s3557_s13 = sld [smem:[#allocation6 + $0xe]] }
  0xd9   :  { %974 = vrot.lane.b32.xlu0 %v970_v44, %s2595_s9  ;;  %v1071_v55 = vrot.slane %v1067_v42, 1 }
  0xda   :  { %v380_v63 = vpop.permute.xlu1 %379  ;;  %v1024_v5 = vsel %vm86_vm1, %v1022_v33, %v1023_v54  ;;  %v1088_v3 = vrot.slane %v1084_v38, 2 }
  0xdb   :  { %v395_v49 = vpop.permute.xlu0 %394  ;;  %v384_v56 = vadd.f32 %v380_v63, %v367_v18  ;;  %v1083_v63 = vmul.f32 %v1082_v8, %v3095_v17 }
  0xdc   :  { %976 = vrot.lane.b32.xlu1 %v971_v25, %s2595_s9  ;;  %v400_v37 = vadd.f32 %v395_v49, %v383_v61  ;;  %v1052_v25 = vmul.f32 %v1051_v59, %v3095_v17  ;;  %v1118_v61 = vmul.f32 %v1116_v14, %v3100_v13 }
  0xdd   :  { %991 = vrot.lane.b32.xlu0 %v990_v31, %s2595_s9  ;;  %v1099_v31 = vstv %s3207_s10  ;;  %s3520_s10 = sld [smem:[#allocation6 + $0x46]] }
  0xde   :  { %v397_v30 = vpop.permute.xlu1 %396  ;;  %v1100_v49 = vmul.f32 %v1099_v31, %v3095_v17  ;;  %v1101_v50 = vmul.f32 %v1099_v31, %v3100_v13 }
  0xdf   :  { %v412_v10 = vpop.permute.xlu0 %411  ;;  %v401_v48 = vadd.f32 %v397_v30, %v384_v56 }
  0xe0   :  { %993 = vrot.lane.b32.xlu1 %v989_v1, %s2595_s9  ;;  %v417_v35 = vadd.f32 %v412_v10, %v400_v37  ;;  %v1105_v33 = vrot.slane %v1101_v50, 3  ;;  %v1147_v37 = vstv %s2466_s12  ;;  %v3327_v50 = vld [vmem:[#allocation3 + $0x30] sm:$0xff]  ;;  %s3552_s12 = sld [smem:[#allocation6 + $0x4]] }
  0xe1   :  { %1008 = vrot.lane.b32.xlu0 %v1007_v4, %s2595_s9  ;;  %v1087_v4 = vrot.slane %v1083_v63, 2 }
  0xe2   :  { %v414_v20 = vpop.permute.xlu1 %413 }
  0xe3   :  { %v429_v52 = vpop.permute.xlu0 %428  ;;  %v418_v57 = vadd.f32 %v414_v20, %v401_v48  ;;  %v1089_v21 = vsel %vm72_vm0, %v1087_v4, %v1088_v3  ;;  %v1149_v20 = vmul.f32 %v1147_v37, %v3100_v13 }
  0xe4   :  { %1010 = vrot.lane.b32.xlu1 %v1006_v45, %s2595_s9  ;;  %v434_v44 = vadd.f32 %v429_v52, %v417_v35  ;;  %v1148_v35 = vmul.f32 %v1147_v37, %v3095_v17 }
  0xe5   :  { %1025 = vrot.lane.b32.xlu0 %v1024_v5, %s2595_s9  ;;  %v1164_v5 = vstv %s2467_s14  ;;  %s3572_s14 = sld [smem:[#allocation6 + $0x13]] }
  0xe6   :  { %v443_v1 = vadd.f32 %v441_v6, %v434_v44  ;;  %v431_v58 = vpop.permute.xlu1 %430  ;;  %v1165_v48 = vmul.f32 %v1164_v5, %v3095_v17  ;;  %v1166_v52 = vmul.f32 %v1164_v5, %v3100_v13 }
  0xe7   :  { %v435_v26 = vadd.f32 %v431_v58, %v418_v57  ;;  %v3219_v43 = vpop.permute.xlu0 %503  ;;  %v1152_v57 = vrot.slane %v1148_v35, 1  ;;  %v1135_v58 = vmul.f32 %v1133_v12, %v3100_v13 }
  0xe8   :  { %v456_v29 = vadd.f32 %v2935_v53, %v443_v1  ;;  %1027 = vrot.lane.b32.xlu1 %v1023_v54, %s2595_s9  ;;  %v1181_v1 = vstv %s2468_s15  ;;  %v1170_v59 = vrot.slane %v1166_v52, 2  ;;  %s3590_s15 = sld [smem:[#allocation6 + $0x18]] }
  0xe9   :  { %v444_v46 = vadd.f32 %v442_v22, %v435_v26  ;;  %1042 = vrot.lane.b32.xlu0 %v1041_v62, %s2595_s9  ;;  %v1153_v22 = vrot.slane %v1149_v20, 1  ;;  %v1169_v62 = vrot.slane %v1165_v48, 2  ;;  %v1182_v8 = vmul.f32 %v1181_v1, %v3095_v17 }
  0xea   :  { %v469_v40 = vadd.f32 %v2941_v27, %v456_v29  ;;  %v3228_v45 = vpop.permute.xlu1 %505  ;;  %v1183_v29 = vmul.f32 %v1181_v1, %v3100_v13 }
  0xeb   :  { %v457_v53 = vadd.f32 %v452_v15, %v444_v46  ;;  %v3234_v41 = vpop.permute.xlu0 %520  ;;  %v1154_v26 = vsel %vm58_vm2, %v1152_v57, %v1153_v22 }
  0xec   :  { %v482_v2 = vadd.f32 %v2955_v36, %v469_v40  ;;  %1044 = vrot.lane.b32.xlu1 %v1040_v16, %s2595_s9  ;;  %v1072_v36 = vsel %vm58_vm2, %v1070_v9, %v1071_v55  ;;  %v1134_v16 = vmul.f32 %v1133_v12, %v3095_v17  ;;  %v1171_v9 = vsel %vm72_vm0, %v1169_v62, %v1170_v59 }
  0xed   :  { %v470_v27 = vadd.f32 %v465_v19, %v457_v53  ;;  %1056 = vrot.lane.b32.xlu0 %v1052_v25, %s2596_s2  ;;  %v1198_v25 = vstv %s3287_s16  ;;  %v1186_v40 = vrot.slane %v1182_v8, 3  ;;  %s3607_s16 = sld [smem:[#allocation6 + $0x1f]] }
  0xee   :  { %v3246_v11 = vadd.f32 %v2966_v60, %v482_v2  ;;  %v3248_v15 = vpop.permute.xlu1 %522  ;;  %v1117_v60 = vmul.f32 %v1116_v14, %v3095_v17  ;;  %v1199_v63 = vmul.f32 %v1198_v25, %v3095_v17  ;;  %v1200_v38 = vmul.f32 %v1198_v25, %v3100_v13  ;;  %v3329_v14 = vld [vmem:[#allocation3 + $0x38] sm:$0xff] }
  0xef   :  { %v483_v51 = vadd.f32 %v478_v32, %v470_v27  ;;  %v3253_v19 = vpop.permute.xlu0 %537  ;;  %v1104_v32 = vrot.slane %v1100_v49, 3 }
  0xf0   :  { %1058 = vrot.lane.b32.xlu1 %v1053_v28, %s2596_s2  ;;  %v1121_v34 = vrot.slane %v1117_v60, 4  ;;  %v1203_v27 = vrot.slane %v1199_v63, 4  ;;  %v1204_v49 = vrot.slane %v1200_v38, 4 }
  0xf1   :  { %v3258_v7 = vadd.f32 %v491_v47, %v483_v51  ;;  %1073 = vrot.lane.b32.xlu0 %v1072_v36, %s2596_s2  ;;  %v1122_v47 = vrot.slane %v1118_v61, 4  ;;  %v1106_v18 = vsel %vm86_vm1, %v1104_v32, %v1105_v33  ;;  %v1296_v36 = vstv %s2475_s18  ;;  %s3619_s18 = sld [smem:[#allocation6 + $0x1a]] }
  0xf2   :  { %v3265_v30 = vpop.permute.xlu1 %539  ;;  %v1298_v51 = vmul.f32 %v1296_v36, %v3329_v14  ;;  %v1205_v61 = vsel %vm100_vm3, %v1203_v27, %v1204_v49  ;;  %v1313_v32 = vstv %s3318_s20  ;;  %s3644_s20 = sld [smem:[#allocation6 + $0x29]] }
  0xf3   :  { %v3268_v54 = vpop.permute.xlu0 %554  ;;  %v1123_v56 = vsel %vm100_vm3, %v1121_v34, %v1122_v47  ;;  %v509_v34 = vadd.f32 %v3219_v43, %v3246_v11  ;;  %v1315_v35 = vmul.f32 %v1313_v32, %v3329_v14  ;;  %v510_v20 = vadd.f32 %v3228_v45, %v3258_v7 }
  0xf4   :  { %1075 = vrot.lane.b32.xlu1 %v1071_v55, %s2596_s2  ;;  %v1187_v55 = vrot.slane %v1183_v29, 3  ;;  %v1302_v37 = vrot.slane %v1298_v51, 1  ;;  %v1330_v43 = vstv %s3333_s21  ;;  %v1347_v7 = vstv %s3344_s22  ;;  %s3657_s21 = sld [smem:[#allocation6 + $0x2e]] }
  0xf5   :  { %1090 = vrot.lane.b32.xlu0 %v1089_v21, %s2596_s2  ;;  %v1282_v21 = vstv %s3312_s19  ;;  %v526_v11 = vadd.f32 %v3234_v41, %v509_v34  ;;  %v1331_v1 = vmul.f32 %v1330_v43, %v3327_v50  ;;  %v1332_v45 = vmul.f32 %v1330_v43, %v3329_v14  ;;  %s3626_s19 = sld [smem:[#allocation6 + $0x24]] }
  0xf6   :  { %v3272_v0 = vpop.permute.xlu1 %556  ;;  %v1188_v28 = vsel %vm86_vm1, %v1186_v40, %v1187_v55  ;;  %s3676_s22 = sld [smem:[#allocation6 + $0x20]] }
  0xf7   :  { %v3275_v10 = vpop.permute.xlu0 %571  ;;  %v543_v62 = vadd.f32 %v3253_v19, %v526_v11  ;;  %v1335_v29 = vrot.slane %v1331_v1, 3  ;;  %v1336_v25 = vrot.slane %v1332_v45, 3  ;;  %v1412_v11 = vstv %s3398_s24  ;;  %s3711_s24 = sld [smem:[#allocation6 + $0x2f]] }
  0xf8   :  { %1092 = vrot.lane.b32.xlu1 %v1088_v3, %s2596_s2  ;;  %v1297_v3 = vmul.f32 %v1296_v36, %v3327_v50  ;;  %v1413_v1 = vmul.f32 %v1412_v11, %v3327_v50 }
  0xf9   :  { %1107 = vrot.lane.b32.xlu0 %v1106_v18, %s2596_s2  ;;  %v560_v40 = vadd.f32 %v3268_v54, %v543_v62 }
  0xfa   :  { %v3280_v6 = vpop.permute.xlu1 %573  ;;  %v1301_v18 = vrot.slane %v1297_v3, 1  ;;  %v1364_v3 = vstv %s3382_s1  ;;  %s3688_s1 = sld [smem:[#allocation6 + $0x25]] }
  0xfb   :  { %v3285_v39 = vpop.permute.xlu0 %585  ;;  %v577_v54 = vadd.f32 %v3275_v10, %v560_v40 }
  0xfc   :  { %1109 = vrot.lane.b32.xlu1 %v1105_v33, %s2596_s2  ;;  %v1303_v48 = vsel %vm58_vm2, %v1301_v18, %v1302_v37  ;;  %v1365_v18 = vmul.f32 %v1364_v3, %v3327_v50 }
  0xfd   :  { %1124 = vrot.lane.b32.xlu0 %v1123_v56, %s2596_s2  ;;  %v1314_v56 = vmul.f32 %v1313_v32, %v3327_v50  ;;  %v591_v51 = vadd.f32 %v3285_v39, %v577_v54  ;;  %v1395_v32 = vstv %s3387_s23  ;;  %s3697_s23 = sld [smem:[#allocation6 + $0x2a]] }
  0xfe   :  { %v3294_v44 = vpop.permute.xlu1 %587 }
  0xff   :  { %v3296_v24 = vpop.permute.xlu0 %602  ;;  %v1318_v52 = vrot.slane %v1314_v56, 2  ;;  %v1397_v56 = vmul.f32 %v1395_v32, %v3329_v14 }
 0x100   :  { %1126 = vrot.lane.b32.xlu1 %v1122_v47, %s2596_s2  ;;  %v1283_v47 = vmul.f32 %v1282_v21, %v3327_v50 }
 0x101   :  { %1138 = vrot.lane.b32.xlu0 %v1134_v16, %s2597_s0  ;;  %v1284_v16 = vmul.f32 %v1282_v21, %v3329_v14 }
 0x102   :  { %v3301_v42 = vpop.permute.xlu1 %604 }
 0x103   :  { %v3306_v46 = vpop.permute.xlu0 %619 }
 0x104   :  { %1140 = vrot.lane.b32.xlu1 %v1135_v58, %s2597_s0  ;;  %v527_v58 = vadd.f32 %v3248_v15, %v510_v20 }
 0x105   :  { %1155 = vrot.lane.b32.xlu0 %v1154_v26, %s2597_s0  ;;  %v1349_v26 = vmul.f32 %v1347_v7, %v3329_v14 }
 0x106   :  { %v3314_v31 = vpop.permute.xlu1 %621  ;;  %v544_v19 = vadd.f32 %v3265_v30, %v527_v58 }
 0x107   :  { %v3320_v53 = vpop.permute.xlu0 %636  ;;  %v1353_v63 = vrot.slane %v1349_v26, 4 }
 0x108   :  { %1157 = vrot.lane.b32.xlu1 %v1153_v22, %s2597_s0  ;;  %v1319_v22 = vrot.slane %v1315_v35, 2  ;;  %v561_v30 = vadd.f32 %v3272_v0, %v544_v19 }
 0x109   :  { %1172 = vrot.lane.b32.xlu0 %v1171_v9, %s2597_s0 }
 0x10a   :  { %v3324_v2 = vpop.permute.xlu1 %638  ;;  %v1320_v15 = vsel %vm72_vm0, %v1318_v52, %v1319_v22  ;;  %v578_v34 = vadd.f32 %v3280_v6, %v561_v30 }
 0x10b   :  { %v3331_v4 = vpop.permute.xlu0 %653 }
 0x10c   :  { %1174 = vrot.lane.b32.xlu1 %v1170_v59, %s2597_s0  ;;  %v1348_v59 = vmul.f32 %v1347_v7, %v3327_v50  ;;  %v592_v39 = vadd.f32 %v3294_v44, %v578_v34  ;;  %v1414_v7 = vmul.f32 %v1412_v11, %v3329_v14  ;;  %v1477_v34 = vstv %s3463_s30  ;;  %s3739_s30 = sld [smem:[#allocation6 + $0xf]] }
 0x10d   :  { %1189 = vrot.lane.b32.xlu0 %v1188_v28, %s2597_s0  ;;  %v1337_v28 = vsel %vm86_vm1, %v1335_v29, %v1336_v25 }
 0x10e   :  { %v3339_v60 = vpop.permute.xlu1 %655 }
 0x10f   :  { %v3346_v33 = vpop.permute.xlu0 %667 }
 0x110   :  { %1191 = vrot.lane.b32.xlu1 %v1187_v55, %s2597_s0  ;;  %v1352_v55 = vrot.slane %v1348_v59, 4 }
 0x111   :  { %1206 = vrot.lane.b32.xlu0 %v1205_v61, %s2597_s0 }
 0x112   :  { %v3354_v12 = vpop.permute.xlu1 %669  ;;  %v1354_v36 = vsel %vm100_vm3, %v1352_v55, %v1353_v63 }
 0x113   :  { %v3359_v5 = vpop.permute.xlu0 %684 }
 0x114   :  { %1208 = vrot.lane.b32.xlu1 %v1204_v49, %s2597_s0  ;;  %v1378_v49 = vstv %s3375_s17  ;;  %s3684_s17 = sld [smem:[#allocation6 + $0x1b]] }
 0x115   :  { %1287 = vrot.lane.b32.xlu0 %v1283_v47, %s2594_s27  ;;  %v1379_v21 = vmul.f32 %v1378_v49, %v3327_v50  ;;  %v1380_v0 = vmul.f32 %v1378_v49, %v3329_v14  ;;  %v608_v47 = vadd.f32 %v3296_v24, %v591_v51  ;;  %v609_v24 = vadd.f32 %v3301_v42, %v592_v39 }
 0x116   :  { %v3367_v57 = vpop.permute.xlu1 %686  ;;  %v1446_v51 = vstv %s3456_s29  ;;  %v835_v39 = vstv %s3451_s28  ;;  %s3730_s28 = sld [smem:[#allocation6 + $0xa]] }
 0x117   :  { %v3373_v41 = vpop.permute.xlu0 %701  ;;  %v625_v6 = vadd.f32 %v3306_v46, %v608_v47  ;;  %v1383_v20 = vrot.slane %v1379_v21, 1  ;;  %v1384_v43 = vrot.slane %v1380_v0, 1  ;;  %v626_v52 = vadd.f32 %v3314_v31, %v609_v24  ;;  %s3735_s29 = sld [smem:[#allocation6 + $0x21]] }
 0x118   :  { %1289 = vrot.lane.b32.xlu1 %v1284_v16, %s2594_s27  ;;  %v1429_v31 = vstv %s3418_s25  ;;  %v829_v47 = vstv %s3466_s4  ;;  %v836_v24 = vmul.f32 %v835_v39, %v3095_v17  ;;  %s3714_s25 = sld [smem:[#allocation6 + $0x5]] }
 0x119   :  { %1304 = vrot.lane.b32.xlu0 %v1303_v48, %s2594_s27  ;;  %v642_v44 = vadd.f32 %v3320_v53, %v625_v6  ;;  %v1366_v48 = vmul.f32 %v1364_v3, %v3329_v14  ;;  %v1385_v53 = vsel %vm58_vm2, %v1383_v20, %v1384_v43  ;;  %v643_v58 = vadd.f32 %v3324_v2, %v626_v52  ;;  %s3744_s4 = sld [smem:[#allocation6 + $0x1c]] }
 0x11a   :  { %v3384_v8 = vpop.permute.xlu1 %703  ;;  %v1431_v19 = vmul.f32 %v1429_v31, %v3329_v14  ;;  %v1478_v20 = vmul.f32 %v1477_v34, %v3327_v50 }
 0x11b   :  { %v3390_v9 = vpop.permute.xlu0 %718  ;;  %v659_v42 = vadd.f32 %v3331_v4, %v642_v44  ;;  %v660_v26 = vadd.f32 %v3339_v60, %v643_v58 }
 0x11c   :  { %1306 = vrot.lane.b32.xlu1 %v1302_v37, %s2594_s27  ;;  %v1396_v37 = vmul.f32 %v1395_v32, %v3327_v50  ;;  %v1435_v54 = vrot.slane %v1431_v19, 4  ;;  %v1482_v58 = vrot.slane %v1478_v20, 2  ;;  %v831_v19 = vmul.f32 %v829_v47, %v3100_v13 }
 0x11d   :  { %1321 = vrot.lane.b32.xlu0 %v1320_v15, %s2594_s27  ;;  %v673_v59 = vadd.f32 %v3346_v33, %v659_v42  ;;  %v1417_v15 = vrot.slane %v1413_v1, 3  ;;  %v1430_v33 = vmul.f32 %v1429_v31, %v3327_v50  ;;  %v674_v60 = vadd.f32 %v3354_v12, %v660_v26 }
 0x11e   :  { %v3395_v38 = vpop.permute.xlu1 %720  ;;  %v1400_v46 = vrot.slane %v1396_v37, 2  ;;  %v848_v37 = vstv %s3470_s5  ;;  %v1528_v20 = vstv %s3552_s12  ;;  %s3750_s5 = sld [smem:[#allocation6 + $0x26]] }
 0x11f   :  { %v3401_v27 = vpop.permute.xlu0 %735  ;;  %v690_v2 = vadd.f32 %v3359_v5, %v673_v59  ;;  %v691_v5 = vadd.f32 %v3367_v57, %v674_v60  ;;  %v1434_v49 = vrot.slane %v1430_v33, 4  ;;  %v849_v1 = vmul.f32 %v848_v37, %v3095_v17  ;;  %s4049_s12 = sld [smem:[#allocation6 + $0x3b]] }
 0x120   :  { %1323 = vrot.lane.b32.xlu1 %v1319_v22, %s2594_s27  ;;  %v1401_v22 = vrot.slane %v1397_v56, 2  ;;  %v3527_v42 = vmul.f32 %v848_v37, %v3100_v13 }
 0x121   :  { %1338 = vrot.lane.b32.xlu0 %v1337_v28, %s2594_s27  ;;  %v707_v55 = vadd.f32 %v3373_v41, %v690_v2  ;;  %v708_v41 = vadd.f32 %v3384_v8, %v691_v5  ;;  %v1436_v32 = vsel %vm100_vm3, %v1434_v49, %v1435_v54  ;;  %v853_v60 = vrot.slane %v849_v1, 2 }
 0x122   :  { %v3410_v61 = vpop.permute.xlu1 %737  ;;  %v1402_v4 = vsel %vm72_vm0, %v1400_v46, %v1401_v22  ;;  %v1494_v46 = vstv %s3478_s6  ;;  %v854_v5 = vrot.slane %v3527_v42, 2  ;;  %v1529_v42 = vmul.f32 %v1528_v20, %v3327_v50  ;;  %s3765_s6 = sld [smem:[#allocation6 + $0x2b]] }
 0x123   :  { %v3416_v10 = vpop.permute.xlu0 %749  ;;  %v724_v28 = vadd.f32 %v3390_v9, %v707_v55  ;;  %v725_v9 = vadd.f32 %v3395_v38, %v708_v41  ;;  %v1495_v26 = vmul.f32 %v1494_v46, %v3327_v50 }
 0x124   :  { %1340 = vrot.lane.b32.xlu1 %v1336_v25, %s2594_s27  ;;  %v1418_v25 = vrot.slane %v1414_v7, 3 }
 0x125   :  { %1355 = vrot.lane.b32.xlu0 %v1354_v36, %s2594_s27  ;;  %v741_v57 = vadd.f32 %v3401_v27, %v724_v28  ;;  %v742_v27 = vadd.f32 %v3410_v61, %v725_v9  ;;  %v874_v9 = vstv %s3520_s10  ;;  %s4020_s10 = sld [smem:[#allocation6 + $0x44]] }
 0x126   :  { %v3428_v35 = vpop.permute.xlu1 %751  ;;  %v1419_v12 = vsel %vm86_vm1, %v1417_v15, %v1418_v25  ;;  %v1511_v15 = vstv %s3492_s7  ;;  %s3773_s7 = sld [smem:[#allocation6 + $0x14]] }
 0x127   :  { %v3432_v16 = vpop.permute.xlu0 %766  ;;  %v755_v8 = vadd.f32 %v3416_v10, %v741_v57  ;;  %v1447_v10 = vmul.f32 %v1446_v51, %v3327_v50  ;;  %v756_v6 = vadd.f32 %v3428_v35, %v742_v27  ;;  %v3518_v35 = vmul.f32 %v835_v39, %v3100_v13 }
 0x128   :  { %1357 = vrot.lane.b32.xlu1 %v1353_v63, %s2594_s27  ;;  %v1460_v63 = vstv %s3440_s26  ;;  %v1513_v28 = vmul.f32 %v1511_v15, %v3329_v14  ;;  %v875_v27 = vmul.f32 %v874_v9, %v3095_v17  ;;  %s3722_s26 = sld [smem:[#allocation6]] }
 0x129   :  { %1369 = vrot.lane.b32.xlu0 %v1365_v18, %s2595_s9  ;;  %v1461_v3 = vmul.f32 %v1460_v63, %v3327_v50  ;;  %v3487_v21 = vmul.f32 %v1460_v63, %v3329_v14  ;;  %v772_v38 = vadd.f32 %v3432_v16, %v755_v8  ;;  %v1512_v63 = vmul.f32 %v1511_v15, %v3327_v50 }
 0x12a   :  { %v3443_v45 = vpop.permute.xlu1 %768 }
 0x12b   :  { %v784_v62 = vpop.permute.xlu0 %783  ;;  %v1465_v56 = vrot.slane %v1461_v3, 1  ;;  %v1466_v61 = vrot.slane %v3487_v21, 1  ;;  %v773_v44 = vadd.f32 %v3443_v45, %v756_v6  ;;  %v1448_v45 = vmul.f32 %v1446_v51, %v3329_v14 }
 0x12c   :  { %1371 = vrot.lane.b32.xlu1 %v1366_v48, %s2595_s9  ;;  %v789_v11 = vadd.f32 %v784_v62, %v772_v38  ;;  %v830_v48 = vmul.f32 %v829_v47, %v3095_v17  ;;  %v1516_v8 = vrot.slane %v1512_v63, 4  ;;  %v1542_v6 = vstv %s3543_s11  ;;  %s3788_s11 = sld [smem:[#allocation6 + $0x30]] }
 0x12d   :  { %1386 = vrot.lane.b32.xlu0 %v1385_v53, %s2595_s9  ;;  %v1467_v7 = vsel %vm58_vm2, %v1465_v56, %v1466_v61 }
 0x12e   :  { %v3459_v29 = vpop.permute.xlu1 %785 }
 0x12f   :  { %v801_v40 = vpop.permute.xlu0 %800  ;;  %v790_v53 = vadd.f32 %v3459_v29, %v773_v44  ;;  %v841_v29 = vrot.slane %v3518_v35, 1  ;;  %v1544_v44 = vmul.f32 %v1542_v6, %v3329_v14  ;;  %v879_v35 = vrot.slane %v875_v27, 4 }
 0x130   :  { %1388 = vrot.lane.b32.xlu1 %v1384_v43, %s2595_s9  ;;  %v3510_v43 = vmul.f32 %v1477_v34, %v3329_v14  ;;  %v855_v34 = vsel %vm72_vm0, %v853_v60, %v854_v5 }
 0x131   :  { %1403 = vrot.lane.b32.xlu0 %v1402_v4, %s2595_s9  ;;  %v1496_v4 = vmul.f32 %v1494_v46, %v3329_v14 }
 0x132   :  { %v803_v30 = vpop.permute.xlu1 %802  ;;  %v1483_v62 = vrot.slane %v3510_v43, 2 }
 0x133   :  { %v818_v36 = vpop.permute.xlu0 %817  ;;  %v807_v2 = vadd.f32 %v803_v30, %v790_v53  ;;  %v1500_v41 = vrot.slane %v1496_v4, 3 }
 0x134   :  { %1405 = vrot.lane.b32.xlu1 %v1401_v22, %s2595_s9  ;;  %v806_v22 = vadd.f32 %v801_v40, %v789_v11  ;;  %v861_v40 = vstv %s3502_s8  ;;  %v1484_v49 = vsel %vm72_vm0, %v1482_v58, %v1483_v62  ;;  %s4001_s8 = sld [smem:[#allocation6 + $0x3f]] }
 0x135   :  { %1420 = vrot.lane.b32.xlu0 %v1419_v12, %s2595_s9  ;;  %v862_v57 = vmul.f32 %v861_v40, %v3095_v17  ;;  %v863_v3 = vmul.f32 %v861_v40, %v3100_v13 }
 0x136   :  { %v820_v0 = vpop.permute.xlu1 %819  ;;  %v823_v31 = vadd.f32 %v818_v36, %v806_v22 }
 0x137   :  { %v3497_v18 = vpop.permute.xlu0 %892  ;;  %v824_v55 = vadd.f32 %v820_v0, %v807_v2  ;;  %v1517_v0 = vrot.slane %v1513_v28, 4  ;;  %v866_v38 = vrot.slane %v862_v57, 3  ;;  %v867_v37 = vrot.slane %v863_v3, 3 }
 0x138   :  { %1422 = vrot.lane.b32.xlu1 %v1418_v25, %s2595_s9  ;;  %v840_v25 = vrot.slane %v836_v24, 1  ;;  %v832_v30 = vadd.f32 %v830_v48, %v823_v31  ;;  %v1543_v24 = vmul.f32 %v1542_v6, %v3327_v50  ;;  %v1559_v48 = vstv %s3557_s13  ;;  %s2541_s13 = sld [smem:[#allocation6 + $0x40]] }
 0x139   :  { %1437 = vrot.lane.b32.xlu0 %v1436_v32, %s2595_s9  ;;  %v833_v21 = vadd.f32 %v831_v19, %v824_v55  ;;  %v1518_v17 = vsel %vm100_vm3, %v1516_v8, %v1517_v0  ;;  %v1561_v53 = vmul.f32 %v1559_v48, %v3329_v14  ;;  %v1548_v31 = vrot.slane %v1544_v44, 1 }
 0x13a   :  { %v3513_v16 = vpop.permute.xlu1 %894  ;;  %v842_v36 = vsel %vm58_vm2, %v840_v25, %v841_v29  ;;  %v1530_v2 = vmul.f32 %v1528_v20, %v3329_v14  ;;  %v1702_v44 = vstv %s3626_s19  ;;  %s3865_s19 = sld [smem:[#allocation6 + $0x31]] }
 0x13b   :  { %v3522_v52 = vpop.permute.xlu0 %909  ;;  %v845_v32 = vadd.f32 %v842_v36, %v832_v30  ;;  %v1565_v19 = vrot.slane %v1561_v53, 2  ;;  %v1593_v30 = vstv %s3590_s15  ;;  %s3839_s15 = sld [smem:[#allocation6 + $0x1d]] }
 0x13c   :  { %1439 = vrot.lane.b32.xlu1 %v1435_v54, %s2595_s9  ;;  %v1499_v54 = vrot.slane %v1495_v26, 3  ;;  %v1576_v26 = vstv %s3572_s14  ;;  %s3827_s14 = sld [smem:[#allocation6 + $0x22]] }
 0x13d   :  { %1451 = vrot.lane.b32.xlu0 %v1447_v10, %s2596_s2  ;;  %v876_v10 = vmul.f32 %v874_v9, %v3100_v13  ;;  %v858_v43 = vadd.f32 %v855_v34, %v845_v32  ;;  %v868_v13 = vsel %vm86_vm1, %v866_v38, %v867_v37  ;;  %v1577_v60 = vmul.f32 %v1576_v26, %v3327_v50  ;;  %v3633_v32 = vld [vmem:[#allocation3 + $0x40] sm:$0xff] }
 0x13e   :  { %v3535_v59 = vpop.permute.xlu1 %911  ;;  %v1501_v39 = vsel %vm86_vm1, %v1499_v54, %v1500_v41  ;;  %v1578_v63 = vmul.f32 %v1576_v26, %v3329_v14  ;;  %v1594_v9 = vmul.f32 %v1593_v30, %v3327_v50 }
 0x13f   :  { %v3541_v33 = vpop.permute.xlu0 %926  ;;  %v880_v46 = vrot.slane %v876_v10, 4  ;;  %v3640_v10 = vld [vmem:[#allocation3 + $0x48] sm:$0xff] }
 0x140   :  { %1453 = vrot.lane.b32.xlu1 %v1448_v45, %s2596_s2  ;;  %v1560_v45 = vmul.f32 %v1559_v48, %v3327_v50  ;;  %v1582_v3 = vrot.slane %v1578_v63, 3  ;;  %v1598_v38 = vrot.slane %v1594_v9, 4 }
 0x141   :  { %1468 = vrot.lane.b32.xlu0 %v1467_v7, %s2596_s2  ;;  %v871_v7 = vadd.f32 %v868_v13, %v858_v43  ;;  %v881_v4 = vsel %vm100_vm3, %v879_v35, %v880_v46 }
 0x142   :  { %v3554_v12 = vpop.permute.xlu1 %928 }
 0x143   :  { %v3563_v51 = vpop.permute.xlu0 %943  ;;  %v884_v40 = vadd.f32 %v881_v4, %v871_v7  ;;  %v1719_v7 = vstv %s3644_s20  ;;  %s3883_s20 = sld [smem:[#allocation6 + $0x38]] }
 0x144   :  { %1470 = vrot.lane.b32.xlu1 %v1466_v61, %s2596_s2  ;;  %v846_v61 = vadd.f32 %v841_v29, %v833_v21  ;;  %v1564_v29 = vrot.slane %v1560_v45, 2  ;;  %v1595_v21 = vmul.f32 %v1593_v30, %v3329_v14 }
 0x145   :  { %1485 = vrot.lane.b32.xlu0 %v1484_v49, %s2596_s2  ;;  %v898_v36 = vadd.f32 %v3497_v18, %v884_v40  ;;  %v1685_v18 = vstv %s3607_s16  ;;  %s3845_s16 = sld [smem:[#allocation6 + $0x27]] }
 0x146   :  { %v3569_v47 = vpop.permute.xlu1 %945  ;;  %v859_v1 = vadd.f32 %v854_v5, %v846_v61  ;;  %v1566_v54 = vsel %vm72_vm0, %v1564_v29, %v1565_v19  ;;  %v1721_v29 = vmul.f32 %v1719_v7, %v3640_v10 }
 0x147   :  { %v3575_v56 = vpop.permute.xlu0 %960  ;;  %v915_v34 = vadd.f32 %v3522_v52, %v898_v36  ;;  %v1671_v52 = vstv %s3619_s18  ;;  %s3856_s18 = sld [smem:[#allocation6 + $0x2c]] }
 0x148   :  { %1487 = vrot.lane.b32.xlu1 %v1483_v62, %s2596_s2  ;;  %v1547_v62 = vrot.slane %v1543_v24, 1  ;;  %v872_v25 = vadd.f32 %v867_v37, %v859_v1  ;;  %v1599_v37 = vrot.slane %v1595_v21, 4  ;;  %v1704_v1 = vmul.f32 %v1702_v44, %v3640_v10 }
 0x149   :  { %1502 = vrot.lane.b32.xlu0 %v1501_v39, %s2596_s2  ;;  %v932_v20 = vadd.f32 %v3541_v33, %v915_v34  ;;  %v1703_v33 = vmul.f32 %v1702_v44, %v3633_v32  ;;  %v1767_v34 = vstv %s3676_s22  ;;  %s3894_s22 = sld [smem:[#allocation6 + $0x3d]] }
 0x14a   :  { %v3582_v11 = vpop.permute.xlu1 %962  ;;  %v1549_v5 = vsel %vm58_vm2, %v1547_v62, %v1548_v31  ;;  %v885_v49 = vadd.f32 %v880_v46, %v872_v25  ;;  %v1600_v24 = vsel %vm100_vm3, %v1598_v38, %v1599_v37  ;;  %v1673_v62 = vmul.f32 %v1671_v52, %v3640_v10 }
 0x14b   :  { %v3588_v22 = vpop.permute.xlu0 %974  ;;  %v1707_v26 = vrot.slane %v1703_v33, 2  ;;  %v1708_v4 = vrot.slane %v1704_v1, 2  ;;  %v1753_v38 = vstv %s3684_s17  ;;  %s3906_s17 = sld [smem:[#allocation6 + $0x42]] }
 0x14c   :  { %1504 = vrot.lane.b32.xlu1 %v1500_v41, %s2596_s2  ;;  %v1581_v41 = vrot.slane %v1577_v60, 3 }
 0x14d   :  { %1519 = vrot.lane.b32.xlu0 %v1518_v17, %s2596_s2  ;;  %v1687_v17 = vmul.f32 %v1685_v18, %v3640_v10 }
 0x14e   :  { %v3597_v58 = vpop.permute.xlu1 %976  ;;  %v1583_v39 = vsel %vm86_vm1, %v1581_v41, %v1582_v3  ;;  %v1725_v41 = vrot.slane %v1721_v29, 3  ;;  %v1818_v29 = vstv %s3711_s24  ;;  %s3937_s24 = sld [smem:[#allocation6 + $0x34]] }
 0x14f   :  { %v3601_v15 = vpop.permute.xlu0 %991  ;;  %v1691_v46 = vrot.slane %v1687_v17, 1 }
 0x150   :  { %1521 = vrot.lane.b32.xlu1 %v1517_v0, %s2596_s2  ;;  %v899_v0 = vadd.f32 %v3513_v16, %v885_v49  ;;  %v1686_v16 = vmul.f32 %v1685_v18, %v3633_v32  ;;  %v1709_v49 = vsel %vm72_vm0, %v1707_v26, %v1708_v4 }
 0x151   :  { %1533 = vrot.lane.b32.xlu0 %v1529_v42, %s2597_s0  ;;  %v949_v42 = vadd.f32 %v3563_v51, %v932_v20  ;;  %v1720_v51 = vmul.f32 %v1719_v7, %v3633_v32 }
 0x152   :  { %v3609_v55 = vpop.permute.xlu1 %993  ;;  %v916_v61 = vadd.f32 %v3535_v59, %v899_v0  ;;  %v1672_v59 = vmul.f32 %v1671_v52, %v3633_v32  ;;  %v1690_v13 = vrot.slane %v1686_v16, 1  ;;  %v1769_v52 = vmul.f32 %v1767_v34, %v3640_v10 }
 0x153   :  { %v3613_v28 = vpop.permute.xlu0 %1008 }
 0x154   :  { %1535 = vrot.lane.b32.xlu1 %v1530_v2, %s2597_s0  ;;  %v933_v35 = vadd.f32 %v3554_v12, %v916_v61  ;;  %v1692_v12 = vsel %vm58_vm2, %v1690_v13, %v1691_v46  ;;  %v966_v2 = vadd.f32 %v3575_v56, %v949_v42  ;;  %v1768_v61 = vmul.f32 %v1767_v34, %v3633_v32 }
 0x155   :  { %1550 = vrot.lane.b32.xlu0 %v1549_v5, %s2597_s0 }
 0x156   :  { %v3622_v57 = vpop.permute.xlu1 %1010  ;;  %v980_v40 = vadd.f32 %v3588_v22, %v966_v2  ;;  %v1772_v13 = vrot.slane %v1768_v61, 1 }
 0x157   :  { %v3628_v8 = vpop.permute.xlu0 %1025 }
 0x158   :  { %1552 = vrot.lane.b32.xlu1 %v1548_v31, %s2597_s0  ;;  %v950_v31 = vadd.f32 %v3569_v47, %v933_v35  ;;  %v997_v63 = vadd.f32 %v3601_v15, %v980_v40  ;;  %v1773_v35 = vrot.slane %v1769_v52, 1 }
 0x159   :  { %1567 = vrot.lane.b32.xlu0 %v1566_v54, %s2597_s0  ;;  %v1724_v54 = vrot.slane %v1720_v51, 3 }
 0x15a   :  { %v3637_v27 = vpop.permute.xlu1 %1027  ;;  %v967_v47 = vadd.f32 %v3582_v11, %v950_v31  ;;  %v1014_v36 = vadd.f32 %v3613_v28, %v997_v63 }
 0x15b   :  { %v3642_v6 = vpop.permute.xlu0 %1042  ;;  %v1726_v18 = vsel %vm86_vm1, %v1724_v54, %v1725_v41  ;;  %v1819_v54 = vmul.f32 %v1818_v29, %v3633_v32 }
 0x15c   :  { %1569 = vrot.lane.b32.xlu1 %v1565_v19, %s2597_s0  ;;  %v1736_v19 = vstv %s3657_s21  ;;  %v981_v11 = vadd.f32 %v3597_v58, %v967_v47  ;;  %v1031_v21 = vadd.f32 %v3628_v8, %v1014_v36  ;;  %s3891_s21 = sld [smem:[#allocation6 + $0x33]] }
 0x15d   :  { %1584 = vrot.lane.b32.xlu0 %v1583_v39, %s2597_s0  ;;  %v1737_v5 = vmul.f32 %v1736_v19, %v3633_v32  ;;  %v1738_v56 = vmul.f32 %v1736_v19, %v3640_v10  ;;  %v1823_v34 = vrot.slane %v1819_v54, 4 }
 0x15e   :  { %v3653_v43 = vpop.permute.xlu1 %1044  ;;  %v1048_v39 = vadd.f32 %v3642_v6, %v1031_v21 }
 0x15f   :  { %v1057_v48 = vpop.permute.xlu0 %1056  ;;  %v1741_v15 = vrot.slane %v1737_v5, 4  ;;  %v1742_v9 = vrot.slane %v1738_v56, 4  ;;  %v1224_v56 = vstv %s3722_s26  ;;  %s3943_s26 = sld [smem:[#allocation6 + $0x43]] }
 0x160   :  { %1586 = vrot.lane.b32.xlu1 %v1582_v3, %s2597_s0  ;;  %v998_v3 = vadd.f32 %v3609_v55, %v981_v11  ;;  %v1225_v21 = vmul.f32 %v1224_v56, %v3327_v50 }
 0x161   :  { %1601 = vrot.lane.b32.xlu0 %v1600_v24, %s2597_s0  ;;  %v1743_v8 = vsel %vm100_vm3, %v1741_v15, %v1742_v9  ;;  %v1754_v24 = vmul.f32 %v1753_v38, %v3633_v32 }
 0x162   :  { %v1059_v45 = vpop.permute.xlu1 %1058  ;;  %v1015_v58 = vadd.f32 %v3622_v57, %v998_v3  ;;  %v1784_v57 = vstv %s3688_s1  ;;  %s3915_s1 = sld [smem:[#allocation6 + $0x47]] }
 0x163   :  { %v1074_v53 = vpop.permute.xlu0 %1073  ;;  %v1785_v44 = vmul.f32 %v1784_v57, %v3633_v32 }
 0x164   :  { %1603 = vrot.lane.b32.xlu1 %v1599_v37, %s2597_s0  ;;  %v1032_v55 = vadd.f32 %v3637_v27, %v1015_v58  ;;  %v1062_v37 = vadd.f32 %v1057_v48, %v1048_v39  ;;  %v3720_v48 = vmul.f32 %v1784_v57, %v3640_v10 }
 0x165   :  { %1676 = vrot.lane.b32.xlu0 %v1672_v59, %s2594_s27  ;;  %v1789_v7 = vrot.slane %v1785_v44, 2 }
 0x166   :  { %v1076_v25 = vpop.permute.xlu1 %1075  ;;  %v1049_v17 = vadd.f32 %v3653_v43, %v1032_v55  ;;  %v1079_v20 = vadd.f32 %v1074_v53, %v1062_v37  ;;  %v1849_v37 = vstv %s3735_s29  ;;  %s3955_s29 = sld [smem:[#allocation6 + $0x19]] }
 0x167   :  { %v1091_v60 = vpop.permute.xlu0 %1090  ;;  %v1850_v44 = vmul.f32 %v1849_v37, %v3633_v32 }
 0x168   :  { %1678 = vrot.lane.b32.xlu1 %v1673_v62, %s2594_s27  ;;  %v1063_v27 = vadd.f32 %v1059_v45, %v1049_v17  ;;  %v1096_v43 = vadd.f32 %v1091_v60, %v1079_v20  ;;  %v1755_v45 = vmul.f32 %v1753_v38, %v3640_v10  ;;  %v1790_v62 = vrot.slane %v3720_v48, 2 }
 0x169   :  { %1693 = vrot.lane.b32.xlu0 %v1692_v12, %s2594_s27  ;;  %v1230_v60 = vstv %s3714_s25  ;;  %v1835_v20 = vstv %s3744_s4  ;;  %v1851_v48 = vmul.f32 %v1849_v37, %v3640_v10  ;;  %s3939_s25 = sld [smem:[#allocation6 + $0x3e]] }
 0x16a   :  { %v1093_v30 = vpop.permute.xlu1 %1092  ;;  %v1080_v33 = vadd.f32 %v1076_v25, %v1063_v27  ;;  %v1791_v47 = vsel %vm72_vm0, %v1789_v7, %v1790_v62  ;;  %v1231_v36 = vmul.f32 %v1230_v60, %v3327_v50  ;;  %v3755_v15 = vmul.f32 %v1230_v60, %v3329_v14  ;;  %s3961_s4 = sld [smem:[#allocation6 + $0x23]] }
 0x16b   :  { %v1108_v22 = vpop.permute.xlu0 %1107 }
 0x16c   :  { %1695 = vrot.lane.b32.xlu1 %v1691_v46, %s2594_s27  ;;  %v1801_v46 = vstv %s3697_s23  ;;  %v1113_v42 = vadd.f32 %v1108_v22, %v1096_v43  ;;  %v1097_v53 = vadd.f32 %v1093_v30, %v1080_v33  ;;  %v1235_v38 = vrot.slane %v1231_v36, 1  ;;  %s3930_s23 = sld [smem:[#allocation6 + $0x39]] }
 0x16d   :  { %1710 = vrot.lane.b32.xlu0 %v1709_v49, %s2594_s27  ;;  %v1802_v31 = vmul.f32 %v1801_v46, %v3633_v32  ;;  %v1803_v2 = vmul.f32 %v1801_v46, %v3640_v10  ;;  %v1236_v61 = vrot.slane %v3755_v15, 1  ;;  %v1866_v43 = vstv %s3750_s5  ;;  %s3965_s5 = sld [smem:[#allocation6 + $0x28]] }
 0x16e   :  { %v1110_v0 = vpop.permute.xlu1 %1109 }
 0x16f   :  { %v1125_v28 = vpop.permute.xlu0 %1124  ;;  %v1114_v25 = vadd.f32 %v1110_v0, %v1097_v53  ;;  %v1806_v5 = vrot.slane %v1802_v31, 3  ;;  %v1807_v49 = vrot.slane %v1803_v2, 3  ;;  %v1243_v0 = vstv %s3730_s28  ;;  %s3949_s28 = sld [smem:[#allocation6 + $0x1e]] }
 0x170   :  { %1712 = vrot.lane.b32.xlu1 %v1708_v4, %s2594_s27  ;;  %v1130_v12 = vadd.f32 %v1125_v28, %v1113_v42  ;;  %v1774_v4 = vsel %vm58_vm2, %v1772_v13, %v1773_v35  ;;  %v1244_v52 = vmul.f32 %v1243_v0, %v3327_v50  ;;  %v3771_v57 = vmul.f32 %v1243_v0, %v3329_v14 }
 0x171   :  { %1727 = vrot.lane.b32.xlu0 %v1726_v18, %s2594_s27  ;;  %v1808_v28 = vsel %vm86_vm1, %v1806_v5, %v1807_v49  ;;  %v1836_v42 = vmul.f32 %v1835_v20, %v3633_v32  ;;  %v1868_v53 = vmul.f32 %v1866_v43, %v3640_v10 }
 0x172   :  { %v1127_v16 = vpop.permute.xlu1 %1126  ;;  %v1248_v7 = vrot.slane %v1244_v52, 2 }
 0x173   :  { %v1139_v6 = vpop.permute.xlu0 %1138  ;;  %v1131_v40 = vadd.f32 %v1127_v16, %v1114_v25  ;;  %v1883_v25 = vstv %s3765_s6  ;;  %v1872_v5 = vrot.slane %v1868_v53, 2  ;;  %s3972_s6 = sld [smem:[#allocation6 + $0x2d]] }
 0x174   :  { %1729 = vrot.lane.b32.xlu1 %v1725_v41, %s2594_s27  ;;  %v1144_v19 = vadd.f32 %v1139_v6, %v1130_v12  ;;  %v3748_v41 = vmul.f32 %v1818_v29, %v3640_v10  ;;  %v1256_v6 = vstv %s3739_s30  ;;  %v1854_v12 = vrot.slane %v1850_v44, 1  ;;  %s3958_s30 = sld [smem:[#allocation6 + $0x48]] }
 0x175   :  { %1744 = vrot.lane.b32.xlu0 %v1743_v8, %s2594_s27  ;;  %v1257_v46 = vmul.f32 %v1256_v6, %v3327_v50  ;;  %v3796_v33 = vmul.f32 %v1256_v6, %v3329_v14  ;;  %v1269_v29 = vstv %s3773_s7  ;;  %v1885_v54 = vmul.f32 %v1883_v25, %v3640_v10  ;;  %s3979_s7 = sld [smem:[#allocation6 + $0x3a]] }
 0x176   :  { %v1141_v59 = vpop.permute.xlu1 %1140  ;;  %v1824_v39 = vrot.slane %v3748_v41, 4  ;;  %v1270_v41 = vmul.f32 %v1269_v29, %v3327_v50 }
 0x177   :  { %v1156_v1 = vpop.permute.xlu0 %1155  ;;  %v1145_v11 = vadd.f32 %v1141_v59, %v1131_v40  ;;  %v1262_v60 = vrot.slane %v3796_v33, 3 }
 0x178   :  { %1746 = vrot.lane.b32.xlu1 %v1742_v9, %s2594_s27  ;;  %v1161_v63 = vadd.f32 %v1156_v1, %v1144_v19  ;;  %v1227_v1 = vadd.f32 %v1225_v21, %v2765_v23  ;;  %v1837_v19 = vmul.f32 %v1835_v20, %v3640_v10 }
 0x179   :  { %1758 = vrot.lane.b32.xlu0 %v1754_v24, %s2595_s9  ;;  %v1825_v24 = vsel %vm100_vm3, %v1823_v34, %v1824_v39 }
 0x17a   :  { %v1158_v26 = vpop.permute.xlu1 %1157 }
 0x17b   :  { %v1173_v51 = vpop.permute.xlu0 %1172  ;;  %v1162_v9 = vadd.f32 %v1158_v26, %v1145_v11  ;;  %v1855_v26 = vrot.slane %v1851_v48, 1  ;;  %v1271_v11 = vmul.f32 %v1269_v29, %v3329_v14 }
 0x17c   :  { %1760 = vrot.lane.b32.xlu1 %v1755_v45, %s2595_s9  ;;  %v1178_v3 = vadd.f32 %v1173_v51, %v1161_v63  ;;  %v1867_v45 = vmul.f32 %v1866_v43, %v3633_v32  ;;  %v1261_v51 = vrot.slane %v1257_v46, 3  ;;  %v1948_v43 = vstv %s3845_s16  ;;  %s2521_s16 = sld [smem:[#allocation6 + $0x3c]] }
 0x17d   :  { %1775 = vrot.lane.b32.xlu0 %v1774_v4, %s2595_s9  ;;  %v1226_v4 = vmul.f32 %v1224_v56, %v3329_v14  ;;  %v1889_v14 = vrot.slane %v1885_v54, 3  ;;  %v1275_v34 = vrot.slane %v1271_v11, 4 }
 0x17e   :  { %v1175_v30 = vpop.permute.xlu1 %1174 }
 0x17f   :  { %v1190_v22 = vpop.permute.xlu0 %1189  ;;  %v1179_v55 = vadd.f32 %v1175_v30, %v1162_v9  ;;  %v1856_v30 = vsel %vm58_vm2, %v1854_v12, %v1855_v26  ;;  %v1263_v9 = vsel %vm86_vm1, %v1261_v51, %v1262_v60 }
 0x180   :  { %1777 = vrot.lane.b32.xlu1 %v1773_v35, %s2595_s9  ;;  %v1195_v18 = vadd.f32 %v1190_v22, %v1178_v3  ;;  %v1237_v35 = vsel %vm58_vm2, %v1235_v38, %v1236_v61  ;;  %v1228_v22 = vadd.f32 %v1226_v4, %v2765_v23  ;;  %v1900_v3 = vstv %s3788_s11  ;;  %s4031_s11 = sld [smem:[#allocation6 + $0x49]] }
 0x181   :  { %1792 = vrot.lane.b32.xlu0 %v1791_v47, %s2595_s9  ;;  %v1240_v40 = vadd.f32 %v1237_v35, %v1227_v1  ;;  %v1871_v47 = vrot.slane %v1867_v45, 2  ;;  %v1901_v23 = vmul.f32 %v1900_v3, %v3633_v32  ;;  %v1950_v45 = vmul.f32 %v1948_v43, %v3640_v10 }
 0x182   :  { %v1192_v58 = vpop.permute.xlu1 %1191 }
 0x183   :  { %v1207_v8 = vpop.permute.xlu0 %1206  ;;  %v1196_v17 = vadd.f32 %v1192_v58, %v1179_v55  ;;  %v1873_v0 = vsel %vm72_vm0, %v1871_v47, %v1872_v5  ;;  %v1902_v58 = vmul.f32 %v1900_v3, %v3640_v10  ;;  %v1954_v29 = vrot.slane %v1950_v45, 2 }
 0x184   :  { %1794 = vrot.lane.b32.xlu1 %v1790_v62, %s2595_s9  ;;  %v1212_v16 = vadd.f32 %v1207_v8, %v1195_v18  ;;  %v1249_v62 = vrot.slane %v3771_v57, 2  ;;  %v1931_v57 = vstv %s3827_s14  ;;  %v1982_v47 = vstv %s3865_s19  ;;  %s2542_s14 = sld [smem:[#allocation6 + $0x45]] }
 0x185   :  { %1809 = vrot.lane.b32.xlu0 %v1808_v28, %s2595_s9  ;;  %v1274_v28 = vrot.slane %v1270_v41, 4  ;;  %v1906_v52 = vrot.slane %v1902_v58, 4  ;;  %v1932_v20 = vmul.f32 %v1931_v57, %v3633_v32  ;;  %v1984_v54 = vmul.f32 %v1982_v47, %v3640_v10  ;;  %s2523_s19 = sld [smem:[#allocation6 + $0x46]] }
 0x186   :  { %v1209_v27 = vpop.permute.xlu1 %1208  ;;  %1215 = vst.msk [vmem:[%s4145_s3] sm:$0xff] %vm1214_vm4, %v1212_v16  ;;  %v1250_v63 = vsel %vm72_vm0, %v1248_v7, %v1249_v62  ;;  %v1905_v16 = vrot.slane %v1901_v23, 4  ;;  %v2108_v45 = vstv %s3906_s17 }
 0x187   :  { %v1213_v59 = vadd.f32 %v1209_v27, %v1196_v17  ;;  %v3786_v13 = vpop.permute.xlu0 %1287  ;;  %v1253_v21 = vadd.f32 %v1250_v63, %v1240_v40  ;;  %v1276_v17 = vsel %vm100_vm3, %v1274_v28, %v1275_v34  ;;  %v1933_v27 = vmul.f32 %v1931_v57, %v3640_v10 }
 0x188   :  { %1811 = vrot.lane.b32.xlu1 %v1807_v49, %s2595_s9  ;;  %v1884_v49 = vmul.f32 %v1883_v25, %v3633_v32  ;;  %v1907_v48 = vsel %vm100_vm3, %v1905_v16, %v1906_v52  ;;  %v1936_v33 = vrot.slane %v1932_v20, 1  ;;  %v2060_v16 = vstv %s3891_s21 }
 0x189   :  { %1826 = vrot.lane.b32.xlu0 %v1825_v24, %s2595_s9  ;;  %1217 = vst.msk [vmem:[%s4145_s3 + $0x8] sm:$0xf] %vm1216_vm5, %v1213_v59  ;;  %v1266_v8 = vadd.f32 %v1263_v9, %v1253_v21  ;;  %v1937_v1 = vrot.slane %v1933_v27, 1 }
 0x18a   :  { %v3808_v31 = vpop.permute.xlu1 %1289  ;;  %v1888_v50 = vrot.slane %v1884_v49, 3 }
 0x18b   :  { %v3813_v2 = vpop.permute.xlu0 %1304  ;;  %v1279_v24 = vadd.f32 %v1276_v17, %v1266_v8  ;;  %v1938_v25 = vsel %vm58_vm2, %v1936_v33, %v1937_v1 }
 0x18c   :  { %1828 = vrot.lane.b32.xlu1 %v1824_v39, %s2595_s9  ;;  %v1241_v39 = vadd.f32 %v1236_v61, %v1228_v22  ;;  %v1890_v37 = vsel %vm86_vm1, %v1888_v50, %v1889_v14  ;;  %v1917_v61 = vstv %s3839_s15  ;;  %v1988_v50 = vrot.slane %v1984_v54, 4  ;;  %s2543_s15 = sld [smem:[#allocation6 + $0x4a]] }
 0x18d   :  { %1840 = vrot.lane.b32.xlu0 %v1836_v42, %s2596_s2  ;;  %v1918_v46 = vmul.f32 %v1917_v61, %v3633_v32  ;;  %v1949_v42 = vmul.f32 %v1948_v43, %v3633_v32  ;;  %v1293_v53 = vadd.f32 %v3786_v13, %v1279_v24  ;;  %v1919_v4 = vmul.f32 %v1917_v61, %v3640_v10 }
 0x18e   :  { %v3822_v56 = vpop.permute.xlu1 %1306  ;;  %v1254_v6 = vadd.f32 %v1249_v62, %v1241_v39  ;;  %v3901_v39 = vld [vmem:[#allocation3 + $0x50] sm:$0xff] }
 0x18f   :  { %v3832_v36 = vpop.permute.xlu0 %1321  ;;  %v1953_v51 = vrot.slane %v1949_v42, 2 }
 0x190   :  { %1842 = vrot.lane.b32.xlu1 %v1837_v19, %s2596_s2  ;;  %v1267_v59 = vadd.f32 %v1262_v60, %v1254_v6  ;;  %v1310_v19 = vadd.f32 %v3813_v2, %v1293_v53  ;;  %v1983_v2 = vmul.f32 %v1982_v47, %v3633_v32 }
 0x191   :  { %1857 = vrot.lane.b32.xlu0 %v1856_v30, %s2596_s2 }
 0x192   :  { %v3841_v18 = vpop.permute.xlu1 %1323  ;;  %v1280_v62 = vadd.f32 %v1275_v34, %v1267_v59  ;;  %v1327_v30 = vadd.f32 %v3832_v36, %v1310_v19 }
 0x193   :  { %v1339_v55 = vpop.permute.xlu0 %1338 }
 0x194   :  { %1859 = vrot.lane.b32.xlu1 %v1855_v26, %s2596_s2  ;;  %v1965_v26 = vstv %s3856_s18  ;;  %v1344_v41 = vadd.f32 %v1339_v55, %v1327_v30  ;;  %v2074_v55 = vstv %s3883_s20  ;;  %s4115_s18 = sld [smem:[#allocation6 + $0x41]] }
 0x195   :  { %1874 = vrot.lane.b32.xlu0 %v1873_v0, %s2596_s2  ;;  %v1966_v40 = vmul.f32 %v1965_v26, %v3633_v32  ;;  %v1967_v13 = vmul.f32 %v1965_v26, %v3640_v10  ;;  %v1987_v0 = vrot.slane %v1983_v2, 4  ;;  %v2075_v17 = vmul.f32 %v2074_v55, %v3901_v39 }
 0x196   :  { %v3851_v38 = vpop.permute.xlu1 %1340 }
 0x197   :  { %v1356_v15 = vpop.permute.xlu0 %1355  ;;  %v1970_v22 = vrot.slane %v1966_v40, 3  ;;  %v1971_v3 = vrot.slane %v1967_v13, 3  ;;  %v2125_v13 = vstv %s3915_s1 }
 0x198   :  { %1876 = vrot.lane.b32.xlu1 %v1872_v5, %s2596_s2  ;;  %v1294_v5 = vadd.f32 %v3808_v31, %v1280_v62  ;;  %v1955_v31 = vsel %vm72_vm0, %v1953_v51, %v1954_v29  ;;  %v1361_v9 = vadd.f32 %v1356_v15, %v1344_v41  ;;  %v2091_v15 = vstv %s3894_s22 }
 0x199   :  { %1891 = vrot.lane.b32.xlu0 %v1890_v37, %s2596_s2  ;;  %v1972_v58 = vsel %vm86_vm1, %v1970_v22, %v1971_v3  ;;  %v1989_v37 = vsel %vm100_vm3, %v1987_v0, %v1988_v50  ;;  %v2126_v54 = vmul.f32 %v2125_v13, %v3901_v39 }
 0x19a   :  { %v1358_v44 = vpop.permute.xlu1 %1357  ;;  %v1311_v49 = vadd.f32 %v3822_v56, %v1294_v5 }
 0x19b   :  { %v1370_v35 = vpop.permute.xlu0 %1369 }
 0x19c   :  { %1893 = vrot.lane.b32.xlu1 %v1889_v14, %s2596_s2  ;;  %v1328_v36 = vadd.f32 %v3841_v18, %v1311_v49  ;;  %v1375_v14 = vadd.f32 %v1370_v35, %v1361_v9  ;;  %v3903_v18 = vld [vmem:[#allocation3 + $0x58] sm:$0xff] }
 0x19d   :  { %1908 = vrot.lane.b32.xlu0 %v1907_v48, %s2596_s2  ;;  %v2076_v6 = vmul.f32 %v2074_v55, %v3903_v18  ;;  %v2092_v48 = vmul.f32 %v2091_v15, %v3901_v39  ;;  %v2093_v43 = vmul.f32 %v2091_v15, %v3903_v18  ;;  %v2110_v19 = vmul.f32 %v2108_v45, %v3903_v18 }
 0x19e   :  { %v1372_v7 = vpop.permute.xlu1 %1371  ;;  %v1345_v21 = vadd.f32 %v3851_v38, %v1328_v36  ;;  %v2127_v41 = vmul.f32 %v2125_v13, %v3903_v18 }
 0x19f   :  { %v1387_v12 = vpop.permute.xlu0 %1386  ;;  %v2080_v33 = vrot.slane %v2076_v6, 1  ;;  %v2097_v26 = vrot.slane %v2093_v43, 2  ;;  %v2114_v2 = vrot.slane %v2110_v19, 3  ;;  %v1645_v19 = vstv %s3965_s5 }
 0x1a0   :  { %1910 = vrot.lane.b32.xlu1 %v1906_v52, %s2596_s2  ;;  %v1362_v28 = vadd.f32 %v1358_v44, %v1345_v21  ;;  %v1392_v8 = vadd.f32 %v1387_v12, %v1375_v14  ;;  %v2061_v44 = vmul.f32 %v2060_v16, %v3901_v39  ;;  %v2096_v12 = vrot.slane %v2092_v48, 2 }
 0x1a1   :  { %1922 = vrot.lane.b32.xlu0 %v1918_v46, %s2597_s0  ;;  %v2079_v46 = vrot.slane %v2075_v17, 1  ;;  %v2131_v9 = vrot.slane %v2127_v41, 4  ;;  %v4009_v41 = vmul.f32 %v1645_v19, %v3640_v10 }
 0x1a2   :  { %v1389_v60 = vpop.permute.xlu1 %1388  ;;  %v1376_v38 = vadd.f32 %v1372_v7, %v1362_v28  ;;  %v2062_v7 = vmul.f32 %v2060_v16, %v3903_v18  ;;  %v2142_v28 = vstv %s3937_s24 }
 0x1a3   :  { %v1404_v63 = vpop.permute.xlu0 %1403  ;;  %v2081_v51 = vsel %vm58_vm2, %v2079_v46, %v2080_v33  ;;  %v2144_v48 = vmul.f32 %v2142_v28, %v3903_v18 }
 0x1a4   :  { %1924 = vrot.lane.b32.xlu1 %v1919_v4, %s2597_s0  ;;  %v1409_v52 = vadd.f32 %v1404_v63, %v1392_v8  ;;  %v1393_v61 = vadd.f32 %v1389_v60, %v1376_v38  ;;  %v2098_v63 = vsel %vm72_vm0, %v2096_v12, %v2097_v26  ;;  %v1632_v12 = vstv %s3961_s4 }
 0x1a5   :  { %1939 = vrot.lane.b32.xlu0 %v1938_v25, %s2597_s0 }
 0x1a6   :  { %v1406_v11 = vpop.permute.xlu1 %1405 }
 0x1a7   :  { %v1421_v56 = vpop.permute.xlu0 %1420  ;;  %v1410_v24 = vadd.f32 %v1406_v11, %v1393_v61 }
 0x1a8   :  { %1941 = vrot.lane.b32.xlu1 %v1937_v1, %s2597_s0  ;;  %v1426_v27 = vadd.f32 %v1421_v56, %v1409_v52  ;;  %v2130_v56 = vrot.slane %v2126_v54, 4  ;;  %v2143_v52 = vmul.f32 %v2142_v28, %v3901_v39  ;;  %v1646_v54 = vmul.f32 %v1645_v19, %v3633_v32 }
 0x1a9   :  { %1956 = vrot.lane.b32.xlu0 %v1955_v31, %s2597_s0 }
 0x1aa   :  { %v1423_v23 = vpop.permute.xlu1 %1422 }
 0x1ab   :  { %v1438_v34 = vpop.permute.xlu0 %1437  ;;  %v1427_v1 = vadd.f32 %v1423_v23, %v1410_v24 }
 0x1ac   :  { %1958 = vrot.lane.b32.xlu1 %v1954_v29, %s2597_s0  ;;  %v1443_v59 = vadd.f32 %v1438_v34, %v1426_v27  ;;  %v2109_v29 = vmul.f32 %v2108_v45, %v3901_v39 }
 0x1ad   :  { %1973 = vrot.lane.b32.xlu0 %v1972_v58, %s2597_s0  ;;  %v2132_v58 = vsel %vm100_vm3, %v2130_v56, %v2131_v9 }
 0x1ae   :  { %v1440_v57 = vpop.permute.xlu1 %1439  ;;  %v2113_v49 = vrot.slane %v2109_v29, 3 }
 0x1af   :  { %v1452_v20 = vpop.permute.xlu0 %1451  ;;  %v1444_v62 = vadd.f32 %v1440_v57, %v1427_v1  ;;  %v2190_v57 = vstv %s3943_s26 }
 0x1b0   :  { %1975 = vrot.lane.b32.xlu1 %v1971_v3, %s2597_s0  ;;  %v1457_v53 = vadd.f32 %v1452_v20, %v1443_v59  ;;  %v2115_v36 = vsel %vm86_vm1, %v2113_v49, %v2114_v2  ;;  %v2191_v43 = vmul.f32 %v2190_v57, %v3901_v39  ;;  %v3976_v59 = vmul.f32 %v2190_v57, %v3903_v18 }
 0x1b1   :  { %1990 = vrot.lane.b32.xlu0 %v1989_v37, %s2597_s0  ;;  %v2173_v37 = vstv %s3939_s25  ;;  %v1634_v49 = vmul.f32 %v1632_v12, %v3640_v10 }
 0x1b2   :  { %v1454_v35 = vpop.permute.xlu1 %1453  ;;  %v2174_v61 = vmul.f32 %v2173_v37, %v3901_v39  ;;  %v2175_v20 = vmul.f32 %v2173_v37, %v3903_v18 }
 0x1b3   :  { %v1469_v42 = vpop.permute.xlu0 %1468  ;;  %v1458_v60 = vadd.f32 %v1454_v35, %v1444_v62 }
 0x1b4   :  { %1992 = vrot.lane.b32.xlu1 %v1988_v50, %s2597_s0  ;;  %v1474_v4 = vadd.f32 %v1469_v42, %v1457_v53  ;;  %v2156_v50 = vstv %s3930_s23  ;;  %v2179_v1 = vrot.slane %v2175_v20, 2  ;;  %v1619_v42 = vstv %s3949_s28 }
 0x1b5   :  { %2065 = vrot.lane.b32.xlu0 %v2061_v44, %s2594_s27  ;;  %v2157_v34 = vmul.f32 %v2156_v50, %v3901_v39  ;;  %v2158_v55 = vmul.f32 %v2156_v50, %v3903_v18  ;;  %v3991_v29 = vmul.f32 %v1619_v42, %v3640_v10 }
 0x1b6   :  { %v1471_v25 = vpop.permute.xlu1 %1470 }
 0x1b7   :  { %v1486_v40 = vpop.permute.xlu0 %1485  ;;  %v1475_v5 = vadd.f32 %v1471_v25, %v1458_v60  ;;  %v2161_v6 = vrot.slane %v2157_v34, 1  ;;  %v2162_v15 = vrot.slane %v2158_v55, 1  ;;  %v1613_v25 = vstv %s3955_s29 }
 0x1b8   :  { %2067 = vrot.lane.b32.xlu1 %v2062_v7, %s2594_s27  ;;  %v1491_v47 = vadd.f32 %v1486_v40, %v1474_v4  ;;  %v2207_v7 = vstv %s3958_s30  ;;  %v2196_v4 = vrot.slane %v3976_v59, 3  ;;  %v1650_v55 = vrot.slane %v1646_v54, 3 }
 0x1b9   :  { %2082 = vrot.lane.b32.xlu0 %v2081_v51, %s2594_s27  ;;  %v2163_v46 = vsel %vm58_vm2, %v2161_v6, %v2162_v15  ;;  %v1620_v51 = vmul.f32 %v1619_v42, %v3633_v32  ;;  %v2208_v13 = vmul.f32 %v2207_v7, %v3901_v39 }
 0x1ba   :  { %v1488_v30 = vpop.permute.xlu1 %1487 }
 0x1bb   :  { %v1492_v11 = vadd.f32 %v1488_v30, %v1475_v5  ;;  %v1503_v31 = vpop.permute.xlu0 %1502  ;;  %v1633_v30 = vmul.f32 %v1632_v12, %v3633_v32 }
 0x1bc   :  { %2084 = vrot.lane.b32.xlu1 %v2080_v33, %s2594_s27  ;;  %v1508_v22 = vadd.f32 %v1503_v31, %v1491_v47  ;;  %v2178_v33 = vrot.slane %v2174_v61, 2  ;;  %v3999_v47 = vmul.f32 %v2207_v7, %v3903_v18  ;;  %v1624_v31 = vrot.slane %v1620_v51, 1 }
 0x1bd   :  { %2099 = vrot.lane.b32.xlu0 %v2098_v63, %s2594_s27 }
 0x1be   :  { %v1505_v3 = vpop.permute.xlu1 %1504  ;;  %v2180_v40 = vsel %vm72_vm0, %v2178_v33, %v2179_v1  ;;  %v2213_v50 = vrot.slane %v3999_v47, 4 }
 0x1bf   :  { %v1509_v21 = vadd.f32 %v1505_v3, %v1492_v11  ;;  %v1520_v0 = vpop.permute.xlu0 %1519  ;;  %v1658_v11 = vstv %s3972_s6 }
 0x1c0   :  { %2101 = vrot.lane.b32.xlu1 %v2097_v26, %s2594_s27  ;;  %v1525_v14 = vadd.f32 %v1520_v0, %v1508_v22  ;;  %v2195_v26 = vrot.slane %v2191_v43, 3  ;;  %v1625_v22 = vrot.slane %v3991_v29, 1  ;;  %v2212_v0 = vrot.slane %v2208_v13, 4 }
 0x1c1   :  { %2116 = vrot.lane.b32.xlu0 %v2115_v36, %s2594_s27  ;;  %v2238_v36 = vstv %s3979_s7  ;;  %v1660_v28 = vmul.f32 %v1658_v11, %v3640_v10 }
 0x1c2   :  { %v1522_v23 = vpop.permute.xlu1 %1521  ;;  %v2197_v3 = vsel %vm86_vm1, %v2195_v26, %v2196_v4  ;;  %v2239_v37 = vmul.f32 %v2238_v36, %v3901_v39  ;;  %v2214_v6 = vsel %vm100_vm3, %v2212_v0, %v2213_v50  ;;  %v2272_v26 = vstv %s4020_s10 }
 0x1c3   :  { %v1526_v8 = vadd.f32 %v1522_v23, %v1509_v21  ;;  %v1534_v38 = vpop.permute.xlu0 %1533  ;;  %v1615_v21 = vmul.f32 %v1613_v25, %v3640_v10  ;;  %v1638_v23 = vrot.slane %v1634_v49, 2  ;;  %v2240_v10 = vmul.f32 %v2238_v36, %v3903_v18 }
 0x1c4   :  { %2118 = vrot.lane.b32.xlu1 %v2114_v2, %s2594_s27  ;;  %v1539_v16 = vadd.f32 %v1534_v38, %v1525_v14  ;;  %v1614_v2 = vmul.f32 %v1613_v25, %v3633_v32  ;;  %v1637_v14 = vrot.slane %v1633_v30, 2  ;;  %v2273_v47 = vmul.f32 %v2272_v26, %v3901_v39 }
 0x1c5   :  { %2133 = vrot.lane.b32.xlu0 %v2132_v58, %s2594_s27  ;;  %v1659_v58 = vmul.f32 %v1658_v11, %v3633_v32  ;;  %v2244_v33 = vrot.slane %v2240_v10, 1  ;;  %v2337_v10 = vstv %s2541_s13 }
 0x1c6   :  { %v1536_v17 = vpop.permute.xlu1 %1535  ;;  %v1639_v61 = vsel %vm72_vm0, %v1637_v14, %v1638_v23  ;;  %v2277_v36 = vrot.slane %v2273_v47, 3 }
 0x1c7   :  { %v1540_v27 = vadd.f32 %v1536_v17, %v1526_v8  ;;  %v1551_v24 = vpop.permute.xlu0 %1550  ;;  %v1651_v8 = vrot.slane %v4009_v41, 3  ;;  %v1663_v20 = vrot.slane %v1659_v58, 4 }
 0x1c8   :  { %2135 = vrot.lane.b32.xlu1 %v2131_v9, %s2594_s27  ;;  %v1556_v44 = vadd.f32 %v1551_v24, %v1539_v16  ;;  %s3994_s27 = sld [smem:[#allocation6 + $0x35]] }
 0x1c9   :  { %2147 = vrot.lane.b32.xlu0 %v2143_v52, %s2595_s9  ;;  %v1626_v52 = vsel %vm58_vm2, %v1624_v31, %v1625_v22 }
 0x1ca   :  { %v1553_v35 = vpop.permute.xlu1 %1552 }
 0x1cb   :  { %v1557_v45 = vadd.f32 %v1553_v35, %v1540_v27  ;;  %v1568_v53 = vpop.permute.xlu0 %1567  ;;  %v1664_v27 = vrot.slane %v1660_v28, 4  ;;  %v2243_v35 = vrot.slane %v2239_v37, 1 }
 0x1cc   :  { %2149 = vrot.lane.b32.xlu1 %v2144_v48, %s2595_s9  ;;  %v1573_v62 = vadd.f32 %v1568_v53, %v1556_v44  ;;  %v1652_v48 = vsel %vm86_vm1, %v1650_v55, %v1651_v8 }
 0x1cd   :  { %2164 = vrot.lane.b32.xlu0 %v2163_v46, %s2595_s9  ;;  %v1665_v7 = vsel %vm100_vm3, %v1663_v20, %v1664_v27  ;;  %v2245_v29 = vsel %vm58_vm2, %v2243_v35, %v2244_v33 }
 0x1ce   :  { %v1570_v60 = vpop.permute.xlu1 %1569  ;;  %v2224_v32 = vstv %s3994_s27 }
 0x1cf   :  { %v1574_v5 = vadd.f32 %v1570_v60, %v1557_v45  ;;  %v1585_v63 = vpop.permute.xlu0 %1584  ;;  %v2225_v59 = vmul.f32 %v2224_v32, %v3901_v39  ;;  %v2226_v25 = vmul.f32 %v2224_v32, %v3903_v18 }
 0x1d0   :  { %2166 = vrot.lane.b32.xlu1 %v2162_v15, %s2595_s9  ;;  %v1590_v56 = vadd.f32 %v1585_v63, %v1573_v62  ;;  %v2255_v15 = vstv %s4001_s8  ;;  %v2289_v63 = vstv %s4031_s11 }
 0x1d1   :  { %2181 = vrot.lane.b32.xlu0 %v2180_v40, %s2595_s9  ;;  %v2257_v42 = vmul.f32 %v2255_v15, %v3903_v18  ;;  %v2290_v41 = vmul.f32 %v2289_v63, %v3901_v39  ;;  %v2291_v11 = vmul.f32 %v2289_v63, %v3903_v18 }
 0x1d2   :  { %v1587_v9 = vpop.permute.xlu1 %1586 }
 0x1d3   :  { %v1602_v34 = vpop.permute.xlu0 %1601  ;;  %v1591_v16 = vadd.f32 %v1587_v9, %v1574_v5  ;;  %v2261_v60 = vrot.slane %v2257_v42, 2  ;;  %v2274_v5 = vmul.f32 %v2272_v26, %v3903_v18  ;;  %v2294_v14 = vrot.slane %v2290_v41, 4 }
 0x1d4   :  { %2183 = vrot.lane.b32.xlu1 %v2179_v1, %s2595_s9  ;;  %v1607_v38 = vadd.f32 %v1602_v34, %v1590_v56  ;;  %v2256_v1 = vmul.f32 %v2255_v15, %v3901_v39  ;;  %v2339_v15 = vmul.f32 %v2337_v10, %v3903_v18 }
 0x1d5   :  { %2198 = vrot.lane.b32.xlu0 %v2197_v3, %s2595_s9  ;;  %v2278_v56 = vrot.slane %v2274_v5, 3 }
 0x1d6   :  { %v1616_v57 = vadd.f32 %v1614_v2, %v1607_v38  ;;  %v1604_v17 = vpop.permute.xlu1 %1603  ;;  %v2260_v19 = vrot.slane %v2256_v1, 2 }
 0x1d7   :  { %v1608_v24 = vadd.f32 %v1604_v17, %v1591_v16  ;;  %v1677_v44 = vpop.permute.xlu0 %1676  ;;  %v2279_v28 = vsel %vm86_vm1, %v2277_v36, %v2278_v56 }
 0x1d8   :  { %v1629_v43 = vadd.f32 %v1626_v52, %v1616_v57  ;;  %2200 = vrot.lane.b32.xlu1 %v2196_v4, %s2595_s9  ;;  %v2262_v3 = vsel %vm72_vm0, %v2260_v19, %v2261_v60 }
 0x1d9   :  { %v1617_v46 = vadd.f32 %v1615_v21, %v1608_v24  ;;  %2215 = vrot.lane.b32.xlu0 %v2214_v6, %s2595_s9  ;;  %v2338_v6 = vmul.f32 %v2337_v10, %v3901_v39 }
 0x1da   :  { %v1642_v45 = vadd.f32 %v1639_v61, %v1629_v43  ;;  %v1679_v53 = vpop.permute.xlu1 %1678 }
 0x1db   :  { %v1630_v62 = vadd.f32 %v1625_v22, %v1617_v46  ;;  %v1694_v12 = vpop.permute.xlu0 %1693  ;;  %v2342_v43 = vrot.slane %v2338_v6, 2 }
 0x1dc   :  { %v1655_v4 = vadd.f32 %v1652_v48, %v1642_v45  ;;  %2217 = vrot.lane.b32.xlu1 %v2213_v50, %s2595_s9  ;;  %s4055_s9 = sld [smem:[#allocation6 + $0x36]]  ;;  %v2371_v45 = vstv %s2543_s15 }
 0x1dd   :  { %v1643_v51 = vadd.f32 %v1638_v23, %v1630_v62  ;;  %2229 = vrot.lane.b32.xlu0 %v2225_v59, %s2596_s2  ;;  %v2295_v23 = vrot.slane %v2291_v11, 4  ;;  %v2343_v59 = vrot.slane %v2339_v15, 2  ;;  %v2372_v26 = vmul.f32 %v2371_v45, %v3901_v39 }
 0x1de   :  { %v1668_v40 = vadd.f32 %v1665_v7, %v1655_v4  ;;  %v1696_v13 = vpop.permute.xlu1 %1695  ;;  %v2373_v4 = vmul.f32 %v2371_v45, %v3903_v18 }
 0x1df   :  { %v1656_v30 = vadd.f32 %v1651_v8, %v1643_v51  ;;  %v1711_v49 = vpop.permute.xlu0 %1710  ;;  %v2320_v8 = vstv %s4049_s12  ;;  %v2296_v38 = vsel %vm100_vm3, %v2294_v14, %v2295_v23  ;;  %v2376_v19 = vrot.slane %v2372_v26, 4 }
 0x1e0   :  { %v1682_v2 = vadd.f32 %v1677_v44, %v1668_v40  ;;  %2231 = vrot.lane.b32.xlu1 %v2226_v25, %s2596_s2  ;;  %v2321_v52 = vmul.f32 %v2320_v8, %v3901_v39  ;;  %v2322_v32 = vmul.f32 %v2320_v8, %v3903_v18  ;;  %v2354_v44 = vstv %s2542_s14 }
 0x1e1   :  { %v1669_v54 = vadd.f32 %v1664_v27, %v1656_v30  ;;  %2246 = vrot.lane.b32.xlu0 %v2245_v29, %s2596_s2  ;;  %v2356_v1 = vmul.f32 %v2354_v44, %v3903_v18 }
 0x1e2   :  { %v1699_v31 = vadd.f32 %v1694_v12, %v1682_v2  ;;  %v1713_v22 = vpop.permute.xlu1 %1712  ;;  %v2306_v16 = vstv %s4055_s9  ;;  %v2325_v20 = vrot.slane %v2321_v52, 1  ;;  %v2326_v27 = vrot.slane %v2322_v32, 1 }
 0x1e3   :  { %v1683_v9 = vadd.f32 %v1679_v53, %v1669_v54  ;;  %v4058_v21 = vpop.permute.xlu0 %1727  ;;  %v2307_v17 = vmul.f32 %v2306_v16, %v3901_v39  ;;  %v2308_v48 = vmul.f32 %v2306_v16, %v3903_v18  ;;  %v2344_v53 = vsel %vm72_vm0, %v2342_v43, %v2343_v59 }
 0x1e4   :  { %v4060_v0 = vadd.f32 %v1711_v49, %v1699_v31  ;;  %2248 = vrot.lane.b32.xlu1 %v2244_v33, %s2596_s2  ;;  %v2327_v46 = vsel %vm58_vm2, %v2325_v20, %v2326_v27  ;;  %v2355_v33 = vmul.f32 %v2354_v44, %v3901_v39  ;;  %v2360_v12 = vrot.slane %v2356_v1, 3 }
 0x1e5   :  { %v1700_v50 = vadd.f32 %v1696_v13, %v1683_v9  ;;  %2263 = vrot.lane.b32.xlu0 %v2262_v3, %s2596_s2 }
 0x1e6   :  { %v4064_v58 = vpop.permute.xlu1 %1729  ;;  %v2359_v62 = vrot.slane %v2355_v33, 3  ;;  %v1733_v11 = vadd.f32 %v4058_v21, %v4060_v0 }
 0x1e7   :  { %v4067_v34 = vadd.f32 %v1713_v22, %v1700_v50  ;;  %v4069_v55 = vpop.permute.xlu0 %1744 }
 0x1e8   :  { %2265 = vrot.lane.b32.xlu1 %v2261_v60, %s2596_s2  ;;  %v2361_v29 = vsel %vm86_vm1, %v2359_v62, %v2360_v12  ;;  %v2377_v60 = vrot.slane %v2373_v4, 4  ;;  %v1750_v36 = vadd.f32 %v4069_v55, %v1733_v11 }
 0x1e9   :  { %2280 = vrot.lane.b32.xlu0 %v2279_v28, %s2596_s2  ;;  %v1734_v22 = vadd.f32 %v4064_v58, %v4067_v34 }
 0x1ea   :  { %v4075_v37 = vpop.permute.xlu1 %1746  ;;  %v2378_v47 = vsel %vm100_vm3, %v2376_v19, %v2377_v60 }
 0x1eb   :  { %v1759_v57 = vpop.permute.xlu0 %1758  ;;  %v1751_v50 = vadd.f32 %v4075_v37, %v1734_v22 }
 0x1ec   :  { %2282 = vrot.lane.b32.xlu1 %v2278_v56, %s2596_s2  ;;  %v1764_v56 = vadd.f32 %v1759_v57, %v1750_v36 }
 0x1ed   :  { %2297 = vrot.lane.b32.xlu0 %v2296_v38, %s2596_s2 }
 0x1ee   :  { %v1761_v61 = vpop.permute.xlu1 %1760 }
 0x1ef   :  { %v1776_v24 = vpop.permute.xlu0 %1775  ;;  %v1765_v28 = vadd.f32 %v1761_v61, %v1751_v50 }
 0x1f0   :  { %2299 = vrot.lane.b32.xlu1 %v2295_v23, %s2596_s2  ;;  %v1781_v23 = vadd.f32 %v1776_v24, %v1764_v56  ;;  %s2520_s2 = sld [smem:[#allocation6 + $0x37]] }
 0x1f1   :  { %2311 = vrot.lane.b32.xlu0 %v2307_v17, %s2597_s0 }
 0x1f2   :  { %v1778_v35 = vpop.permute.xlu1 %1777 }
 0x1f3   :  { %v1793_v42 = vpop.permute.xlu0 %1792  ;;  %v1782_v16 = vadd.f32 %v1778_v35, %v1765_v28  ;;  %v2047_v28 = vstv %s2523_s19 }
 0x1f4   :  { %2313 = vrot.lane.b32.xlu1 %v2308_v48, %s2597_s0  ;;  %v1798_v8 = vadd.f32 %v1793_v42, %v1781_v23 }
 0x1f5   :  { %2328 = vrot.lane.b32.xlu0 %v2327_v46, %s2597_s0 }
 0x1f6   :  { %v1795_v7 = vpop.permute.xlu1 %1794  ;;  %v2008_v45 = vstv %s2520_s2 }
 0x1f7   :  { %v1810_v25 = vpop.permute.xlu0 %1809  ;;  %v1799_v21 = vadd.f32 %v1795_v7, %v1782_v16  ;;  %v2009_v4 = vmul.f32 %v2008_v45, %v3901_v39 }
 0x1f8   :  { %2330 = vrot.lane.b32.xlu1 %v2326_v27, %s2597_s0  ;;  %v1815_v32 = vadd.f32 %v1810_v25, %v1798_v8  ;;  %v2010_v25 = vmul.f32 %v2008_v45, %v3903_v18 }
 0x1f9   :  { %2345 = vrot.lane.b32.xlu0 %v2344_v53, %s2597_s0 }
 0x1fa   :  { %v1812_v51 = vpop.permute.xlu1 %1811 }
 0x1fb   :  { %v1827_v40 = vpop.permute.xlu0 %1826  ;;  %v1816_v17 = vadd.f32 %v1812_v51, %v1799_v21  ;;  %v2021_v51 = vstv %s2521_s16 }
 0x1fc   :  { %2347 = vrot.lane.b32.xlu1 %v2343_v59, %s2597_s0  ;;  %v1832_v0 = vadd.f32 %v1827_v40, %v1815_v32 }
 0x1fd   :  { %2362 = vrot.lane.b32.xlu0 %v2361_v29, %s2597_s0 }
 0x1fe   :  { %v1829_v13 = vpop.permute.xlu1 %1828 }
 0x1ff   :  { %v1841_v5 = vpop.permute.xlu0 %1840  ;;  %v1833_v6 = vadd.f32 %v1829_v13, %v1816_v17 }
 0x200   :  { %2364 = vrot.lane.b32.xlu1 %v2360_v12, %s2597_s0  ;;  %v1846_v34 = vadd.f32 %v1841_v5, %v1832_v0  ;;  %v2023_v5 = vmul.f32 %v2021_v51, %v3903_v18  ;;  %v2048_v0 = vmul.f32 %v2047_v28, %v3901_v39 }
 0x201   :  { %2379 = vrot.lane.b32.xlu0 %v2378_v47, %s2597_s0  ;;  %v2022_v47 = vmul.f32 %v2021_v51, %v3901_v39 }
 0x202   :  { %v1843_v63 = vpop.permute.xlu1 %1842  ;;  %v2027_v36 = vrot.slane %v2023_v5, 2 }
 0x203   :  { %v1858_v30 = vpop.permute.xlu0 %1857  ;;  %v1847_v15 = vadd.f32 %v1843_v63, %v1833_v6 }
 0x204   :  { %2381 = vrot.lane.b32.xlu1 %v2377_v60, %s2597_s0  ;;  %v1863_v55 = vadd.f32 %v1858_v30, %v1846_v34  ;;  %s4111_s0 = sld [smem:[#allocation6 + $0x32]] }
 0x206   :  { %v1860_v49 = vpop.permute.xlu1 %1859 }
 0x207   :  { %v1875_v2 = vpop.permute.xlu0 %1874  ;;  %v1864_v27 = vadd.f32 %v1860_v49, %v1847_v15  ;;  %v2013_v49 = vrot.slane %v2009_v4, 1 }
 0x208   :  { %v1880_v37 = vadd.f32 %v1875_v2, %v1863_v55  ;;  %v2014_v2 = vrot.slane %v2010_v25, 1 }
 0x20a   :  { %v1877_v54 = vpop.permute.xlu1 %1876  ;;  %v2002_v62 = vstv %s4111_s0 }
 0x20b   :  { %v1892_v41 = vpop.permute.xlu0 %1891  ;;  %v1881_v44 = vadd.f32 %v1877_v54, %v1864_v27  ;;  %v2003_v40 = vmul.f32 %v2002_v62, %v3901_v39  ;;  %v2004_v11 = vmul.f32 %v2002_v62, %v3903_v18 }
 0x20c   :  { %v1897_v61 = vadd.f32 %v1892_v41, %v1880_v37  ;;  %v2034_v41 = vstv %s4115_s18 }
 0x20d   :  { %v2035_v50 = vmul.f32 %v2034_v41, %v3901_v39 }
 0x20e   :  { %v1894_v31 = vpop.permute.xlu1 %1893 }
 0x20f   :  { %v1909_v3 = vpop.permute.xlu0 %1908  ;;  %v1898_v59 = vadd.f32 %v1894_v31, %v1881_v44  ;;  %v2039_v32 = vrot.slane %v2035_v50, 3 }
 0x210   :  { %v1914_v43 = vadd.f32 %v1909_v3, %v1897_v61  ;;  %v2026_v3 = vrot.slane %v2022_v47, 2 }
 0x212   :  { %v1911_v9 = vpop.permute.xlu1 %1910  ;;  %v2028_v16 = vsel %vm72_vm0, %v2026_v3, %v2027_v36 }
 0x213   :  { %v1923_v14 = vpop.permute.xlu0 %1922  ;;  %v1915_v33 = vadd.f32 %v1911_v9, %v1898_v59  ;;  %v2015_v9 = vsel %vm58_vm2, %v2013_v49, %v2014_v2 }
 0x214   :  { %v1928_v35 = vadd.f32 %v1923_v14, %v1914_v43  ;;  %v2036_v14 = vmul.f32 %v2034_v41, %v3903_v18 }
 0x216   :  { %v1925_v38 = vpop.permute.xlu1 %1924  ;;  %v2040_v21 = vrot.slane %v2036_v14, 3 }
 0x217   :  { %v1940_v52 = vpop.permute.xlu0 %1939  ;;  %v1929_v53 = vadd.f32 %v1925_v38, %v1915_v33 }
 0x218   :  { %v1945_v42 = vadd.f32 %v1940_v52, %v1928_v35  ;;  %v2041_v55 = vsel %vm86_vm1, %v2039_v32, %v2040_v21 }
 0x21a   :  { %v1942_v10 = vpop.permute.xlu1 %1941 }
 0x21b   :  { %v1957_v58 = vpop.permute.xlu0 %1956  ;;  %v1946_v26 = vadd.f32 %v1942_v10, %v1929_v53  ;;  %v2049_v10 = vmul.f32 %v2047_v28, %v3903_v18 }
 0x21c   :  { %v1962_v7 = vadd.f32 %v1957_v58, %v1945_v42 }
 0x21d   :  { %v2053_v15 = vrot.slane %v2049_v10, 4 }
 0x21e   :  { %v1959_v57 = vpop.permute.xlu1 %1958 }
 0x21f   :  { %v1974_v20 = vpop.permute.xlu0 %1973  ;;  %v1963_v60 = vadd.f32 %v1959_v57, %v1946_v26  ;;  %v2052_v57 = vrot.slane %v2048_v0, 4 }
 0x220   :  { %v1979_v19 = vadd.f32 %v1974_v20, %v1962_v7 }
 0x222   :  { %v1976_v24 = vpop.permute.xlu1 %1975 }
 0x223   :  { %v1991_v48 = vpop.permute.xlu0 %1990  ;;  %v1980_v30 = vadd.f32 %v1976_v24, %v1963_v60  ;;  %v2054_v24 = vsel %vm100_vm3, %v2052_v57, %v2053_v15 }
 0x224   :  { %v1996_v13 = vadd.f32 %v1991_v48, %v1979_v19 }
 0x226   :  { %v1993_v46 = vpop.permute.xlu1 %1992  ;;  %v2005_v22 = vadd.f32 %v2003_v40, %v1996_v13 }
 0x227   :  { %v4113_v1 = vpop.permute.xlu0 %2065  ;;  %v1997_v31 = vadd.f32 %v1993_v46, %v1980_v30 }
 0x228   :  { %v2018_v38 = vadd.f32 %v2015_v9, %v2005_v22 }
 0x229   :  { %v2006_v8 = vadd.f32 %v2004_v11, %v1997_v31 }
 0x22a   :  { %v2068_v12 = vpop.permute.xlu1 %2067  ;;  %v2031_v34 = vadd.f32 %v2028_v16, %v2018_v38 }
 0x22b   :  { %v2083_v29 = vpop.permute.xlu0 %2082  ;;  %v2019_v58 = vadd.f32 %v2014_v2, %v2006_v8 }
 0x22c   :  { %v2044_v27 = vadd.f32 %v2041_v55, %v2031_v34 }
 0x22d   :  { %v2032_v37 = vadd.f32 %v2027_v36, %v2019_v58 }
 0x22e   :  { %v2085_v63 = vpop.permute.xlu1 %2084  ;;  %v2057_v43 = vadd.f32 %v2054_v24, %v2044_v27 }
 0x22f   :  { %v2100_v54 = vpop.permute.xlu0 %2099  ;;  %v2045_v48 = vadd.f32 %v2040_v21, %v2032_v37 }
 0x230   :  { %v2071_v35 = vadd.f32 %v4113_v1, %v2057_v43 }
 0x231   :  { %v2058_v18 = vadd.f32 %v2053_v15, %v2045_v48 }
 0x232   :  { %v2102_v56 = vpop.permute.xlu1 %2101  ;;  %v2088_v45 = vadd.f32 %v2083_v29, %v2071_v35 }
 0x233   :  { %v2117_v23 = vpop.permute.xlu0 %2116  ;;  %v2072_v42 = vadd.f32 %v2068_v12, %v2058_v18 }
 0x234   :  { %v2105_v26 = vadd.f32 %v2100_v54, %v2088_v45 }
 0x235   :  { %v2089_v62 = vadd.f32 %v2085_v63, %v2072_v42 }
 0x236   :  { %v2119_v52 = vpop.permute.xlu1 %2118  ;;  %v2122_v19 = vadd.f32 %v2117_v23, %v2105_v26 }
 0x237   :  { %v2134_v17 = vpop.permute.xlu0 %2133  ;;  %v2106_v51 = vadd.f32 %v2102_v56, %v2089_v62 }
 0x238   :  { %v2139_v47 = vadd.f32 %v2134_v17, %v2122_v19 }
 0x239   :  { %v2123_v13 = vadd.f32 %v2119_v52, %v2106_v51 }
 0x23a   :  { %v2136_v6 = vpop.permute.xlu1 %2135 }
 0x23b   :  { %v2148_v20 = vpop.permute.xlu0 %2147  ;;  %v2140_v1 = vadd.f32 %v2136_v6, %v2123_v13 }
 0x23c   :  { %v2153_v49 = vadd.f32 %v2148_v20, %v2139_v47 }
 0x23e   :  { %v2150_v61 = vpop.permute.xlu1 %2149 }
 0x23f   :  { %v2165_v44 = vpop.permute.xlu0 %2164  ;;  %v2154_v12 = vadd.f32 %v2150_v61, %v2140_v1 }
 0x240   :  { %v2170_v2 = vadd.f32 %v2165_v44, %v2153_v49 }
 0x242   :  { %v2167_v39 = vpop.permute.xlu1 %2166 }
 0x243   :  { %v2182_v59 = vpop.permute.xlu0 %2181  ;;  %v2171_v31 = vadd.f32 %v2167_v39, %v2154_v12 }
 0x244   :  { %v2187_v11 = vadd.f32 %v2182_v59, %v2170_v2 }
 0x246   :  { %v2184_v46 = vpop.permute.xlu1 %2183 }
 0x247   :  { %v2199_v33 = vpop.permute.xlu0 %2198  ;;  %v2188_v22 = vadd.f32 %v2184_v46, %v2171_v31 }
 0x248   :  { %v2204_v63 = vadd.f32 %v2199_v33, %v2187_v11 }
 0x24a   :  { %v2201_v53 = vpop.permute.xlu1 %2200 }
 0x24b   :  { %v2216_v7 = vpop.permute.xlu0 %2215  ;;  %v2205_v56 = vadd.f32 %v2201_v53, %v2188_v22 }
 0x24c   :  { %v2221_v36 = vadd.f32 %v2216_v7, %v2204_v63 }
 0x24e   :  { %v2218_v4 = vpop.permute.xlu1 %2217 }
 0x24f   :  { %v2230_v25 = vpop.permute.xlu0 %2229  ;;  %v2222_v14 = vadd.f32 %v2218_v4, %v2205_v56 }
 0x250   :  { %v2235_v9 = vadd.f32 %v2230_v25, %v2221_v36 }
 0x252   :  { %v2232_v60 = vpop.permute.xlu1 %2231 }
 0x253   :  { %v2247_v40 = vpop.permute.xlu0 %2246  ;;  %v2236_v8 = vadd.f32 %v2232_v60, %v2222_v14 }
 0x254   :  { %v2252_v28 = vadd.f32 %v2247_v40, %v2235_v9 }
 0x256   :  { %v2249_v5 = vpop.permute.xlu1 %2248 }
 0x257   :  { %v2264_v30 = vpop.permute.xlu0 %2263  ;;  %v2253_v52 = vadd.f32 %v2249_v5, %v2236_v8 }
 0x258   :  { %v2269_v38 = vadd.f32 %v2264_v30, %v2252_v28 }
 0x25a   :  { %v2266_v41 = vpop.permute.xlu1 %2265 }
 0x25b   :  { %v2281_v29 = vpop.permute.xlu0 %2280  ;;  %v2270_v0 = vadd.f32 %v2266_v41, %v2253_v52 }
 0x25c   :  { %v2286_v21 = vadd.f32 %v2281_v29, %v2269_v38 }
 0x25e   :  { %v2283_v54 = vpop.permute.xlu1 %2282 }
 0x25f   :  { %v2298_v3 = vpop.permute.xlu0 %2297  ;;  %v2287_v58 = vadd.f32 %v2283_v54, %v2270_v0 }
 0x260   :  { %v2303_v10 = vadd.f32 %v2298_v3, %v2286_v21 }
 0x262   :  { %v2300_v50 = vpop.permute.xlu1 %2299 }
 0x263   :  { %v2312_v23 = vpop.permute.xlu0 %2311  ;;  %v2304_v55 = vadd.f32 %v2300_v50, %v2287_v58 }
 0x264   :  { %v2317_v6 = vadd.f32 %v2312_v23, %v2303_v10 }
 0x266   :  { %v2314_v16 = vpop.permute.xlu1 %2313 }
 0x267   :  { %v2329_v32 = vpop.permute.xlu0 %2328  ;;  %v2318_v20 = vadd.f32 %v2314_v16, %v2304_v55 }
 0x268   :  { %v2334_v57 = vadd.f32 %v2329_v32, %v2317_v6 }
 0x26a   :  { %v2331_v17 = vpop.permute.xlu1 %2330 }
 0x26b   :  { %v2346_v34 = vpop.permute.xlu0 %2345  ;;  %v2335_v61 = vadd.f32 %v2331_v17, %v2318_v20 }
 0x26c   :  { %v2351_v27 = vadd.f32 %v2346_v34, %v2334_v57 }
 0x26e   :  { %v2348_v15 = vpop.permute.xlu1 %2347 }
 0x26f   :  { %v2363_v37 = vpop.permute.xlu0 %2362  ;;  %v2352_v48 = vadd.f32 %v2348_v15, %v2335_v61 }
 0x270   :  { %v2368_v24 = vadd.f32 %v2363_v37, %v2351_v27 }
 0x272   :  { %v2365_v44 = vpop.permute.xlu1 %2364 }
 0x273   :  { %v2380_v43 = vpop.permute.xlu0 %2379  ;;  %v2369_v59 = vadd.f32 %v2365_v44, %v2352_v48 }
 0x274   :  { %v2385_v39 = vadd.f32 %v2380_v43, %v2368_v24 }
 0x276   :  { %2544 = vst.msk [vmem:[%s4145_s3 + $0x10] sm:$0xff] %vm1214_vm4, %v2385_v39  ;;  %v2382_v18 = vpop.permute.xlu1 %2381 }
 0x277   :  { %v2386_v35 = vadd.f32 %v2382_v18, %v2369_v59 }
 0x279   :  { %2545 = vst.msk [vmem:[%s4145_s3 + $0x18] sm:$0xf] %vm1216_vm5, %v2386_v35 }
 0x27a   :  { %2394 = vsyncpa [#allocation4], 1 }
 0x27b   :  { %2395 = vsyncpa [#allocation5], 1 }

</bundles_post_ra>
